<compile_context>
chip_gen: v7x
topology: tpu7x:2x2x1
jax: 0.10.0
libtpu: 0.0.40
codegen_flags: <defaults>
</compile_context>

<pallas_src>
import functools

import jax
import jax.numpy as jnp
from jax.experimental import pallas as pl
from jax.experimental.pallas import tpu as pltpu

HIDDEN = 768          # MARBERT pooled-output width
FEAT_DIM = 128        # feat_dim
NUM_CLASSES = 8       # num_classes
CLS_PAD = 128         # lane-dense padded classifier width
LN_EPS = 1e-5         # torch.nn.LayerNorm default eps
NORM_EPS = 1e-12      # F.normalize default eps
MAX_TB = 256          # cap on the batch tile


def _round_up(n, m):
    return ((n + m - 1) // m) * m


def _layernorm(x, gamma, beta, eps):
    mean = jnp.mean(x, axis=-1, keepdims=True)
    centered = x - mean
    var = jnp.mean(centered * centered, axis=-1, keepdims=True)
    inv = jax.lax.rsqrt(var + eps)              # EUP
    return centered * inv * gamma + beta


def _heads_kernel(x_ref,
                  w1_ref, b1_ref, g1_ref, be1_ref,
                  w2_ref, b2_ref, g2_ref, be2_ref,
                  w3_ref, b3_ref,
                  feat_ref, cls_ref):
    x = x_ref[...]                              # (TB, HIDDEN) f32
    xc = x.astype(w1_ref.dtype)                 # MXU compute dtype (f32 or bf16)

    # ---- head1: Linear(768,768) -> LayerNorm(768) -> ReLU ----
    h = jnp.dot(xc, w1_ref[...], preferred_element_type=jnp.float32) + b1_ref[...]
    h = _layernorm(h, g1_ref[...], be1_ref[...], LN_EPS)
    h = jnp.maximum(h, 0.0)

    # ---- head1 (cont.): Linear(768, feat_dim) -> LayerNorm(feat_dim) ----
    f = jnp.dot(h.astype(w2_ref.dtype), w2_ref[...],
                preferred_element_type=jnp.float32) + b2_ref[...]
    f = _layernorm(f, g2_ref[...], be2_ref[...], LN_EPS)

    # ---- F.normalize(feat, dim=1): L2 along feature axis ----
    norm = jnp.sqrt(jnp.sum(f * f, axis=-1, keepdims=True))
    inv = pl.reciprocal(jnp.maximum(norm, NORM_EPS), approx=True)   # EUP slot
    feat_ref[...] = (f * inv).astype(feat_ref.dtype)

    # ---- head2: Linear(768, num_classes) padded to lane-dense 128 cols ----
    c = jnp.dot(xc, w3_ref[...], preferred_element_type=jnp.float32) + b3_ref[...]
    cls_ref[...] = c.astype(cls_ref.dtype)


@functools.partial(jax.jit, static_argnames=("tb", "compute_dtype"))
def mymodel_heads(x, params, tb=None, compute_dtype=jnp.float32):
    """x: [B, 768] pooled output. Returns (feat [B, feat_dim], classes [B, num_classes]).

    compute_dtype: jnp.float32 (v5e) or jnp.bfloat16 (v6e / v7x MXU); accumulation
    and all LayerNorm / ReLU / normalize arithmetic stays in f32 either way.
    """
    (w1, b1, g1, be1, w2, b2, g2, be2, w3, b3) = params
    B, H = x.shape
    assert H == HIDDEN
    feat_dim = w2.shape[1]
    num_classes = w3.shape[1]

    # Batch tile: whole batch in one grid step when it fits, otherwise 256-row
    # tiles (plenty of MXU rows, trivial VMEM footprint).
    if tb is None:
        tb = min(_round_up(B, 8), MAX_TB)
    B_pad = _round_up(B, tb)
    if B_pad != B:
        x = jnp.pad(x, ((0, B_pad - B), (0, 0)))

    # Cast matmul weights to the MXU compute dtype; biases / LN params stay f32.
    w1c = w1.astype(compute_dtype)
    w2c = w2.astype(compute_dtype)
    # Lane-dense classifier head: pad out to 128 columns (zero columns, sliced
    # off in the wrapper) so the output store is a full-lane unmasked vst.
    pad_c = CLS_PAD - num_classes
    w3c = jnp.pad(w3, ((0, 0), (0, pad_c))).astype(compute_dtype)
    b3p = jnp.pad(b3, ((0, 0), (0, pad_c)))

    grid = (B_pad // tb,)

    def act_map(i):
        return (i, 0)

    def const_map(i):
        return (0, 0)

    itemsize = jnp.dtype(compute_dtype).itemsize
    flops = 2 * B_pad * HIDDEN * (HIDDEN + feat_dim + CLS_PAD)
    bytes_accessed = (
        B_pad * HIDDEN * 4                                       # x
        + (HIDDEN * HIDDEN + HIDDEN * feat_dim + HIDDEN * CLS_PAD) * itemsize  # weights
        + (HIDDEN + HIDDEN + HIDDEN + feat_dim + feat_dim + feat_dim + CLS_PAD) * 4  # bias/LN
        + B_pad * (feat_dim + CLS_PAD) * 4                       # outputs
    )
    cost = pl.CostEstimate(flops=flops,
                           transcendentals=3 * B_pad,
                           bytes_accessed=bytes_accessed)

    feat_full, classes_full = pl.pallas_call(
        _heads_kernel,
        out_shape=(
            jax.ShapeDtypeStruct((B_pad, feat_dim), jnp.float32),
            jax.ShapeDtypeStruct((B_pad, CLS_PAD), jnp.float32),
        ),
        grid_spec=pltpu.PrefetchScalarGridSpec(
            num_scalar_prefetch=0,
            grid=grid,
            in_specs=[
                pl.BlockSpec((tb, HIDDEN), act_map),              # x
                pl.BlockSpec((HIDDEN, HIDDEN), const_map),        # w1
                pl.BlockSpec((1, HIDDEN), const_map),             # b1
                pl.BlockSpec((1, HIDDEN), const_map),             # gamma1
                pl.BlockSpec((1, HIDDEN), const_map),             # beta1
                pl.BlockSpec((HIDDEN, feat_dim), const_map),      # w2
                pl.BlockSpec((1, feat_dim), const_map),           # b2
                pl.BlockSpec((1, feat_dim), const_map),           # gamma2
                pl.BlockSpec((1, feat_dim), const_map),           # beta2
                pl.BlockSpec((HIDDEN, CLS_PAD), const_map),       # w3 (padded)
                pl.BlockSpec((1, CLS_PAD), const_map),            # b3 (padded)
            ],
            out_specs=[
                pl.BlockSpec((tb, feat_dim), act_map),
                pl.BlockSpec((tb, CLS_PAD), act_map),
            ],
        ),
        compiler_params=pltpu.CompilerParams(
            dimension_semantics=("parallel",)),
        cost_estimate=cost,
    )(x, w1c, b1, g1, be1, w2c, b2, g2, be2, w3c, b3p)

    return feat_full[:B], classes_full[:B, :num_classes]


def init_params(key):
    k1, k2, k3 = jax.random.split(key, 3)
    scale1 = 1.0 / jnp.sqrt(HIDDEN)
    w1 = jax.random.uniform(k1, (HIDDEN, HIDDEN), jnp.float32, -scale1, scale1)
    b1 = jnp.zeros((1, HIDDEN), jnp.float32)
    g1 = jnp.ones((1, HIDDEN), jnp.float32)     # LayerNorm weight init
    be1 = jnp.zeros((1, HIDDEN), jnp.float32)   # LayerNorm bias init
    w2 = jax.random.uniform(k2, (HIDDEN, FEAT_DIM), jnp.float32, -scale1, scale1)
    b2 = jnp.zeros((1, FEAT_DIM), jnp.float32)
    g2 = jnp.ones((1, FEAT_DIM), jnp.float32)
    be2 = jnp.zeros((1, FEAT_DIM), jnp.float32)
    w3 = jax.random.uniform(k3, (HIDDEN, NUM_CLASSES), jnp.float32, -scale1, scale1)
    b3 = jnp.zeros((1, NUM_CLASSES), jnp.float32)
    return (w1, b1, g1, be1, w2, b2, g2, be2, w3, b3)


def reference_forward(x, params):
    (w1, b1, g1, be1, w2, b2, g2, be2, w3, b3) = params
    h = x @ w1 + b1
    h = _layernorm(h, g1, be1, LN_EPS)
    h = jnp.maximum(h, 0.0)
    f = h @ w2 + b2
    f = _layernorm(f, g2, be2, LN_EPS)
    f = f / jnp.maximum(jnp.linalg.norm(f, axis=1, keepdims=True), NORM_EPS)
    c = x @ w3 + b3
    return f, c


if __name__ == "__main__":
    key = jax.random.PRNGKey(0)
    kx, kp = jax.random.split(key)

    B = 32
    x = jax.random.normal(kx, (B, HIDDEN), jnp.float32)  # MARBERT pooled output stand-in
    params = init_params(kp)

    feat_ref, classes_ref = reference_forward(x, params)

    # f32 weights (v5e-style path).
    feat, classes = mymodel_heads(x, params)
    jax.block_until_ready((feat, classes))
    assert feat.shape == (B, FEAT_DIM) and classes.shape == (B, NUM_CLASSES)
    assert jnp.allclose(feat, feat_ref, atol=1e-2, rtol=1e-2)      # approx-recip slack
    assert jnp.allclose(classes, classes_ref, atol=1e-3, rtol=1e-3)

    # bf16 weights with f32 accumulation (v6e / v7x MXU path).
    feat_bf, classes_bf = mymodel_heads(x, params, compute_dtype=jnp.bfloat16)
    jax.block_until_ready((feat_bf, classes_bf))
    assert feat_bf.shape == (B, FEAT_DIM) and classes_bf.shape == (B, NUM_CLASSES)
    assert jnp.allclose(feat_bf, feat_ref, atol=5e-2, rtol=5e-2)
    assert jnp.allclose(classes_bf, classes_ref, atol=5e-2, rtol=5e-2)

    print("KERNEL_OK")
</pallas_src>

<mosaic_0001>
module attributes {stable_mosaic.version = 11 : i64} {
  func.func @_heads_kernel(%arg0: i32, %arg1: memref<32x768xf32, #tpu.memory_space<vmem>>, %arg2: memref<768x768xf32, #tpu.memory_space<vmem>>, %arg3: memref<1x768xf32, #tpu.memory_space<vmem>>, %arg4: memref<1x768xf32, #tpu.memory_space<vmem>>, %arg5: memref<1x768xf32, #tpu.memory_space<vmem>>, %arg6: memref<768x128xf32, #tpu.memory_space<vmem>>, %arg7: memref<1x128xf32, #tpu.memory_space<vmem>>, %arg8: memref<1x128xf32, #tpu.memory_space<vmem>>, %arg9: memref<1x128xf32, #tpu.memory_space<vmem>>, %arg10: memref<768x128xf32, #tpu.memory_space<vmem>>, %arg11: memref<1x128xf32, #tpu.memory_space<vmem>>, %arg12: memref<32x128xf32, #tpu.memory_space<vmem>>, %arg13: memref<32x128xf32, #tpu.memory_space<vmem>>) attributes {dimension_semantics = [#tpu.dimension_semantics<parallel>], iteration_bounds = array<i64: 1>, scalar_prefetch = 0 : i64, scratch_operands = 0 : i64, tpu.core_type = #tpu.core_type<tc>, window_params = [{transform_indices = @transform_0, window_bounds = array<i64: 32, 768>}, {pipeline_mode = #tpu.pipeline_mode<synchronous>, transform_indices = @transform_1, window_bounds = array<i64: 768, 768>}, {pipeline_mode = #tpu.pipeline_mode<synchronous>, transform_indices = @transform_2, window_bounds = array<i64: 1, 768>}, {pipeline_mode = #tpu.pipeline_mode<synchronous>, transform_indices = @transform_3, window_bounds = array<i64: 1, 768>}, {pipeline_mode = #tpu.pipeline_mode<synchronous>, transform_indices = @transform_4, window_bounds = array<i64: 1, 768>}, {pipeline_mode = #tpu.pipeline_mode<synchronous>, transform_indices = @transform_5, window_bounds = array<i64: 768, 128>}, {pipeline_mode = #tpu.pipeline_mode<synchronous>, transform_indices = @transform_6, window_bounds = array<i64: 1, 128>}, {pipeline_mode = #tpu.pipeline_mode<synchronous>, transform_indices = @transform_7, window_bounds = array<i64: 1, 128>}, {pipeline_mode = #tpu.pipeline_mode<synchronous>, transform_indices = @transform_8, window_bounds = array<i64: 1, 128>}, {pipeline_mode = #tpu.pipeline_mode<synchronous>, transform_indices = @transform_9, window_bounds = array<i64: 768, 128>}, {pipeline_mode = #tpu.pipeline_mode<synchronous>, transform_indices = @transform_10, window_bounds = array<i64: 1, 128>}, {transform_indices = @transform_11, window_bounds = array<i64: 32, 128>}, {transform_indices = @transform_12, window_bounds = array<i64: 32, 128>}]} {
    %c0 = arith.constant 0 : index
    %c0_0 = arith.constant 0 : index
    %0 = vector.load %arg1[%c0, %c0_0] : memref<32x768xf32, #tpu.memory_space<vmem>>, vector<32x768xf32>
    %c0_1 = arith.constant 0 : index
    %c0_2 = arith.constant 0 : index
    %1 = vector.load %arg2[%c0_1, %c0_2] : memref<768x768xf32, #tpu.memory_space<vmem>>, vector<768x768xf32>
    %cst = arith.constant dense<0.000000e+00> : vector<32x768xf32>
    %2 = tpu.matmul %0, %1, %cst {dimension_numbers = #tpu.dot_dimension_numbers<[1], [0], [0], [1], [0, 0, 1, 1], [], []>} : vector<32x768xf32>, vector<768x768xf32>, vector<32x768xf32> -> vector<32x768xf32>
    %c0_3 = arith.constant 0 : index
    %c0_4 = arith.constant 0 : index
    %3 = vector.load %arg3[%c0_3, %c0_4] : memref<1x768xf32, #tpu.memory_space<vmem>>, vector<1x768xf32>
    %4 = vector.broadcast %3 : vector<1x768xf32> to vector<32x768xf32>
    %5 = arith.addf %2, %4 : vector<32x768xf32>
    %c0_5 = arith.constant 0 : index
    %c0_6 = arith.constant 0 : index
    %6 = vector.load %arg4[%c0_5, %c0_6] : memref<1x768xf32, #tpu.memory_space<vmem>>, vector<1x768xf32>
    %c0_7 = arith.constant 0 : index
    %c0_8 = arith.constant 0 : index
    %7 = vector.load %arg5[%c0_7, %c0_8] : memref<1x768xf32, #tpu.memory_space<vmem>>, vector<1x768xf32>
    %cst_9 = arith.constant dense<0.000000e+00> : vector<32xf32>
    %8 = vector.multi_reduction <add>, %5, %cst_9 [1] : vector<32x768xf32> to vector<32xf32>
    %9 = vector.shape_cast %8 : vector<32xf32> to vector<32x1xf32>
    %cst_10 = arith.constant 7.680000e+02 : f32
    %10 = vector.broadcast %cst_10 : f32 to vector<32x1xf32>
    %11 = arith.divf %9, %10 : vector<32x1xf32>
    %12 = vector.broadcast %11 : vector<32x1xf32> to vector<32x768xf32>
    %13 = arith.subf %5, %12 : vector<32x768xf32>
    %14 = arith.mulf %13, %13 : vector<32x768xf32>
    %cst_11 = arith.constant dense<0.000000e+00> : vector<32xf32>
    %15 = vector.multi_reduction <add>, %14, %cst_11 [1] : vector<32x768xf32> to vector<32xf32>
    %16 = vector.shape_cast %15 : vector<32xf32> to vector<32x1xf32>
    %cst_12 = arith.constant 7.680000e+02 : f32
    %17 = vector.broadcast %cst_12 : f32 to vector<32x1xf32>
    %18 = arith.divf %16, %17 : vector<32x1xf32>
    %cst_13 = arith.constant 9.99999974E-6 : f32
    %19 = vector.broadcast %cst_13 : f32 to vector<32x1xf32>
    %20 = arith.addf %18, %19 : vector<32x1xf32>
    %21 = math.rsqrt %20 : vector<32x1xf32>
    %22 = vector.broadcast %21 : vector<32x1xf32> to vector<32x768xf32>
    %23 = arith.mulf %13, %22 : vector<32x768xf32>
    %24 = vector.broadcast %6 : vector<1x768xf32> to vector<32x768xf32>
    %25 = arith.mulf %23, %24 : vector<32x768xf32>
    %26 = vector.broadcast %7 : vector<1x768xf32> to vector<32x768xf32>
    %27 = arith.addf %25, %26 : vector<32x768xf32>
    %cst_14 = arith.constant 0.000000e+00 : f32
    %28 = vector.broadcast %cst_14 : f32 to vector<32x768xf32>
    %29 = arith.maximumf %27, %28 : vector<32x768xf32>
    %c0_15 = arith.constant 0 : index
    %c0_16 = arith.constant 0 : index
    %30 = vector.load %arg6[%c0_15, %c0_16] : memref<768x128xf32, #tpu.memory_space<vmem>>, vector<768x128xf32>
    %cst_17 = arith.constant dense<0.000000e+00> : vector<32x128xf32>
    %31 = tpu.matmul %29, %30, %cst_17 {dimension_numbers = #tpu.dot_dimension_numbers<[1], [0], [0], [1], [0, 0, 1, 1], [], []>} : vector<32x768xf32>, vector<768x128xf32>, vector<32x128xf32> -> vector<32x128xf32>
    %c0_18 = arith.constant 0 : index
    %c0_19 = arith.constant 0 : index
    %32 = vector.load %arg7[%c0_18, %c0_19] : memref<1x128xf32, #tpu.memory_space<vmem>>, vector<1x128xf32>
    %33 = vector.broadcast %32 : vector<1x128xf32> to vector<32x128xf32>
    %34 = arith.addf %31, %33 : vector<32x128xf32>
    %c0_20 = arith.constant 0 : index
    %c0_21 = arith.constant 0 : index
    %35 = vector.load %arg8[%c0_20, %c0_21] : memref<1x128xf32, #tpu.memory_space<vmem>>, vector<1x128xf32>
    %c0_22 = arith.constant 0 : index
    %c0_23 = arith.constant 0 : index
    %36 = vector.load %arg9[%c0_22, %c0_23] : memref<1x128xf32, #tpu.memory_space<vmem>>, vector<1x128xf32>
    %cst_24 = arith.constant dense<0.000000e+00> : vector<32xf32>
    %37 = vector.multi_reduction <add>, %34, %cst_24 [1] : vector<32x128xf32> to vector<32xf32>
    %38 = vector.shape_cast %37 : vector<32xf32> to vector<32x1xf32>
    %cst_25 = arith.constant 1.280000e+02 : f32
    %39 = vector.broadcast %cst_25 : f32 to vector<32x1xf32>
    %40 = arith.divf %38, %39 : vector<32x1xf32>
    %41 = vector.broadcast %40 : vector<32x1xf32> to vector<32x128xf32>
    %42 = arith.subf %34, %41 : vector<32x128xf32>
    %43 = arith.mulf %42, %42 : vector<32x128xf32>
    %cst_26 = arith.constant dense<0.000000e+00> : vector<32xf32>
    %44 = vector.multi_reduction <add>, %43, %cst_26 [1] : vector<32x128xf32> to vector<32xf32>
    %45 = vector.shape_cast %44 : vector<32xf32> to vector<32x1xf32>
    %cst_27 = arith.constant 1.280000e+02 : f32
    %46 = vector.broadcast %cst_27 : f32 to vector<32x1xf32>
    %47 = arith.divf %45, %46 : vector<32x1xf32>
    %cst_28 = arith.constant 9.99999974E-6 : f32
    %48 = vector.broadcast %cst_28 : f32 to vector<32x1xf32>
    %49 = arith.addf %47, %48 : vector<32x1xf32>
    %50 = math.rsqrt %49 : vector<32x1xf32>
    %51 = vector.broadcast %50 : vector<32x1xf32> to vector<32x128xf32>
    %52 = arith.mulf %42, %51 : vector<32x128xf32>
    %53 = vector.broadcast %35 : vector<1x128xf32> to vector<32x128xf32>
    %54 = arith.mulf %52, %53 : vector<32x128xf32>
    %55 = vector.broadcast %36 : vector<1x128xf32> to vector<32x128xf32>
    %56 = arith.addf %54, %55 : vector<32x128xf32>
    %57 = arith.mulf %56, %56 : vector<32x128xf32>
    %cst_29 = arith.constant dense<0.000000e+00> : vector<32xf32>
    %58 = vector.multi_reduction <add>, %57, %cst_29 [1] : vector<32x128xf32> to vector<32xf32>
    %59 = vector.shape_cast %58 : vector<32xf32> to vector<32x1xf32>
    %60 = math.sqrt %59 : vector<32x1xf32>
    %cst_30 = arith.constant 9.99999996E-13 : f32
    %61 = vector.broadcast %cst_30 : f32 to vector<32x1xf32>
    %62 = arith.maximumf %60, %61 : vector<32x1xf32>
    %63 = tpu.reciprocal %62 {approx = true} : vector<32x1xf32> -> vector<32x1xf32>
    %64 = vector.broadcast %63 : vector<32x1xf32> to vector<32x128xf32>
    %65 = arith.mulf %56, %64 : vector<32x128xf32>
    %c0_31 = arith.constant 0 : index
    %c0_32 = arith.constant 0 : index
    %66 = vector.load %arg12[%c0_31, %c0_32] : memref<32x128xf32, #tpu.memory_space<vmem>>, vector<32x128xf32>
    tpu.vector_store %arg12[%c0_31, %c0_32], %65 {strides = array<i32>} : memref<32x128xf32, #tpu.memory_space<vmem>>, vector<32x128xf32>,
    %c0_33 = arith.constant 0 : index
    %c0_34 = arith.constant 0 : index
    %67 = vector.load %arg10[%c0_33, %c0_34] : memref<768x128xf32, #tpu.memory_space<vmem>>, vector<768x128xf32>
    %cst_35 = arith.constant dense<0.000000e+00> : vector<32x128xf32>
    %68 = tpu.matmul %0, %67, %cst_35 {dimension_numbers = #tpu.dot_dimension_numbers<[1], [0], [0], [1], [0, 0, 1, 1], [], []>} : vector<32x768xf32>, vector<768x128xf32>, vector<32x128xf32> -> vector<32x128xf32>
    %c0_36 = arith.constant 0 : index
    %c0_37 = arith.constant 0 : index
    %69 = vector.load %arg11[%c0_36, %c0_37] : memref<1x128xf32, #tpu.memory_space<vmem>>, vector<1x128xf32>
    %70 = vector.broadcast %69 : vector<1x128xf32> to vector<32x128xf32>
    %71 = arith.addf %68, %70 : vector<32x128xf32>
    %c0_38 = arith.constant 0 : index
    %c0_39 = arith.constant 0 : index
    %72 = vector.load %arg13[%c0_38, %c0_39] : memref<32x128xf32, #tpu.memory_space<vmem>>, vector<32x128xf32>
    tpu.vector_store %arg13[%c0_38, %c0_39], %71 {strides = array<i32>} : memref<32x128xf32, #tpu.memory_space<vmem>>, vector<32x128xf32>,
    return
  }
  func.func @transform_0(%arg0: i32) -> (i32, i32) {
    %c0_i32 = arith.constant 0 : i32
    %c0_i32_0 = arith.constant 0 : i32
    return %arg0, %c0_i32 : i32, i32
  }
  func.func @transform_1(%arg0: i32) -> (i32, i32) {
    %c0_i32 = arith.constant 0 : i32
    %c0_i32_0 = arith.constant 0 : i32
    %c0_i32_1 = arith.constant 0 : i32
    return %c0_i32, %c0_i32_0 : i32, i32
  }
  func.func @transform_2(%arg0: i32) -> (i32, i32) {
    %c0_i32 = arith.constant 0 : i32
    %c0_i32_0 = arith.constant 0 : i32
    %c0_i32_1 = arith.constant 0 : i32
    return %c0_i32, %c0_i32_0 : i32, i32
  }
  func.func @transform_3(%arg0: i32) -> (i32, i32) {
    %c0_i32 = arith.constant 0 : i32
    %c0_i32_0 = arith.constant 0 : i32
    %c0_i32_1 = arith.constant 0 : i32
    return %c0_i32, %c0_i32_0 : i32, i32
  }
  func.func @transform_4(%arg0: i32) -> (i32, i32) {
    %c0_i32 = arith.constant 0 : i32
    %c0_i32_0 = arith.constant 0 : i32
    %c0_i32_1 = arith.constant 0 : i32
    return %c0_i32, %c0_i32_0 : i32, i32
  }
  func.func @transform_5(%arg0: i32) -> (i32, i32) {
    %c0_i32 = arith.constant 0 : i32
    %c0_i32_0 = arith.constant 0 : i32
    %c0_i32_1 = arith.constant 0 : i32
    return %c0_i32, %c0_i32_0 : i32, i32
  }
  func.func @transform_6(%arg0: i32) -> (i32, i32) {
    %c0_i32 = arith.constant 0 : i32
    %c0_i32_0 = arith.constant 0 : i32
    %c0_i32_1 = arith.constant 0 : i32
    return %c0_i32, %c0_i32_0 : i32, i32
  }
  func.func @transform_7(%arg0: i32) -> (i32, i32) {
    %c0_i32 = arith.constant 0 : i32
    %c0_i32_0 = arith.constant 0 : i32
    %c0_i32_1 = arith.constant 0 : i32
    return %c0_i32, %c0_i32_0 : i32, i32
  }
  func.func @transform_8(%arg0: i32) -> (i32, i32) {
    %c0_i32 = arith.constant 0 : i32
    %c0_i32_0 = arith.constant 0 : i32
    %c0_i32_1 = arith.constant 0 : i32
    return %c0_i32, %c0_i32_0 : i32, i32
  }
  func.func @transform_9(%arg0: i32) -> (i32, i32) {
    %c0_i32 = arith.constant 0 : i32
    %c0_i32_0 = arith.constant 0 : i32
    %c0_i32_1 = arith.constant 0 : i32
    return %c0_i32, %c0_i32_0 : i32, i32
  }
  func.func @transform_10(%arg0: i32) -> (i32, i32) {
    %c0_i32 = arith.constant 0 : i32
    %c0_i32_0 = arith.constant 0 : i32
    %c0_i32_1 = arith.constant 0 : i32
    return %c0_i32, %c0_i32_0 : i32, i32
  }
  func.func @transform_11(%arg0: i32) -> (i32, i32) {
    %c0_i32 = arith.constant 0 : i32
    %c0_i32_0 = arith.constant 0 : i32
    return %arg0, %c0_i32 : i32, i32
  }
  func.func @transform_12(%arg0: i32) -> (i32, i32) {
    %c0_i32 = arith.constant 0 : i32
    %c0_i32_0 = arith.constant 0 : i32
    return %arg0, %c0_i32 : i32, i32
  }
}

</mosaic_0001>

<bundles_post_ra>
// kernel: mymodel_heads.1
= control target key start
LH: loop header
LB: loop body
LE: loop exit
PB: predicated region body
PF: predicated region fallthrough
CT: control target
= control target key end

     0   :  { %18 = vsyncpa [#allocation3], 0  ;;  %s5109_s0 = inlined_call_operand.hbm [shape: f32[32,768], index: 0, kind: input, shape index: {}]   ;;  %s5110_s1 = inlined_call_operand.hbm [shape: f32[768,768], index: 1, kind: input, shape index: {}]   ;;  %s5111_s2 = inlined_call_operand.hbm [shape: f32[1,768], index: 2, kind: input, shape index: {}]   ;;  %s5112_s3 = inlined_call_operand.hbm [shape: f32[1,768], index: 3, kind: input, shape index: {}]   ;;  %s5113_s4 = inlined_call_operand.hbm [shape: f32[1,768], index: 4, kind: input, shape index: {}]   ;;  %s5114_s5 = inlined_call_operand.hbm [shape: f32[768,128], index: 5, kind: input, shape index: {}]   ;;  %s5115_s6 = inlined_call_operand.hbm [shape: f32[1,128], index: 6, kind: input, shape index: {}]   ;;  %s5116_s7 = inlined_call_operand.hbm [shape: f32[1,128], index: 7, kind: input, shape index: {}]   ;;  %s5117_s8 = inlined_call_operand.hbm [shape: f32[1,128], index: 8, kind: input, shape index: {}]   ;;  %s5118_s9 = inlined_call_operand.vmem [shape: f32[768,128], index: 9, kind: input, shape index: {}]   ;;  %s5119_s10 = inlined_call_operand.vmem [shape: f32[1,128], index: 10, kind: input, shape index: {}]   ;;  %s5120_s11 = inlined_call_operand.hbm [shape: f32[32,128], index: 11, kind: output, shape index: {0}]   ;;  %s5121_s12 = inlined_call_operand.vmem [shape: f32[32,128], index: 12, kind: output, shape index: {1}]  }
   0x1   :  { %19 = vsyncpa [#allocation6], 0 }
   0x2   :  { %20 = vsyncpa [#allocation9], 0 }
   0x3   :  { %21 = vsyncpa [#allocation12], 0 }
   0x4   :  { %22 = vsyncpa [#allocation15], 0 }
   0x5   :  { %23 = vsyncpa [#allocation4], 0  ;;  %s4160_s21 = smov [#allocation5]   ;;  %s4161_s23 = smov [#allocation8]  }
   0x6   :  { %s41_s22 = sshll.u32 %s4160_s21, 4  ;;  %s64_s24 = sshll.u32 %s4161_s23, 4  ;;  %s42_s22 = int_to_ptr.vmem [resolvable:$true] %s41_s22  ;;  %s65_s24 = int_to_ptr.vmem [resolvable:$true] %s64_s24 }
   0x7   :  { %s3928_s27 = scalar_lea.hbm %s5110_s1, 73728 }
   0x8   :  { %p3929_p0 = scmp.ne.s32.totalorder %s5110_s1, %s3928_s27  ;;  %p3932_p1 = scmp.lt.u32.totalorder %s3928_s27, %s5110_s1 }
   0xa   :  { %p3934_p2 = pnand %p3932_p1, %p3929_p0 }
   0xc   :  { %3937 = shalt.err (!%p3934_p2)
}
   0xd   :  { %s3938_s14 = scalar_lea.vmem %s42_s22, 73728  ;;  %p3943_p4 = scmp.lt.s32.totalorder %s42_s22, %s42_s22 }
   0xe   :  { %p3939_p3 = scmp.ne.s32.totalorder %s42_s22, %s3938_s14  ;;  %p3944_p5 = scmp.lt.s32.totalorder %s3938_s14, %s3938_s14 }
  0x10   :  { %p3945_p6 = por %p3944_p5, %p3943_p4 }
  0x12   :  { %p3946_p7 = pnand %p3945_p6, %p3939_p3 }
  0x14   :  { %3949 = shalt.err (!%p3946_p7)
}
  0x15   :  { %s4162_s15 = smov 768   ;;  %s4163_s16 = smov 48  }
  0x16   :  { %47 = dma.hbm_to_vmem [thread:$0]  %s5110_s1, 73728, %s42_s22, [#allocation6], %s4162_s15, %s4162_s15, %s4163_s16  }
  0x17   :  { %s3950_s21 = scalar_lea.hbm %s5112_s3, 96 }
  0x18   :  { %p3951_p8 = scmp.ne.s32.totalorder %s5112_s3, %s3950_s21  ;;  %p3954_p9 = scmp.lt.u32.totalorder %s3950_s21, %s5112_s3 }
  0x1a   :  { %p3956_p10 = pnand %p3954_p9, %p3951_p8 }
  0x1c   :  { %3959 = shalt.err (!%p3956_p10)
}
  0x1d   :  { %s3960_s28 = scalar_lea.vmem %s65_s24, 96  ;;  %p3965_p12 = scmp.lt.s32.totalorder %s65_s24, %s65_s24 }
  0x1e   :  { %p3961_p11 = scmp.ne.s32.totalorder %s65_s24, %s3960_s28  ;;  %p3966_p13 = scmp.lt.s32.totalorder %s3960_s28, %s3960_s28 }
  0x20   :  { %p3967_p0 = por %p3966_p13, %p3965_p12 }
  0x22   :  { %p3968_p1 = pnand %p3967_p0, %p3961_p11 }
  0x24   :  { %3971 = shalt.err (!%p3968_p1)
}
  0x25   :  { %67 = dma.hbm_to_vmem [thread:$0]  %s5112_s3, 96, %s65_s24, [#allocation9]  }
  0x26   :  { %s4164_s29 = smov [#allocation11]   ;;  %s3972_s17 = scalar_lea.hbm %s5114_s5, 12288 }
  0x27   :  { %s83_s30 = sshll.u32 %s4164_s29, 4  ;;  %p3973_p2 = scmp.ne.s32.totalorder %s5114_s5, %s3972_s17  ;;  %s84_s30 = int_to_ptr.vmem [resolvable:$true] %s83_s30 }
  0x28   :  { %p3976_p3 = scmp.lt.u32.totalorder %s3972_s17, %s5114_s5 }
  0x2a   :  { %p3978_p4 = pnand %p3976_p3, %p3973_p2 }
  0x2c   :  { %3981 = shalt.err (!%p3978_p4)
}
  0x2d   :  { %s3982_s23 = scalar_lea.vmem %s84_s30, 12288  ;;  %p3987_p6 = scmp.lt.s32.totalorder %s84_s30, %s84_s30 }
  0x2e   :  { %p3983_p5 = scmp.ne.s32.totalorder %s84_s30, %s3982_s23  ;;  %p3988_p7 = scmp.lt.s32.totalorder %s3982_s23, %s3982_s23 }
  0x30   :  { %p3989_p8 = por %p3988_p7, %p3987_p6 }
  0x32   :  { %p3990_p9 = pnand %p3989_p8, %p3983_p5 }
  0x34   :  { %3993 = shalt.err (!%p3990_p9)
}
  0x35   :  { %s4165_s3 = smov 128   ;;  %s4166_s24 = smov 8  }
  0x36   :  { %89 = dma.hbm_to_vmem [thread:$0]  %s5114_s5, 12288, %s84_s30, [#allocation12], %s4165_s3, %s4165_s3, %s4166_s24  }
  0x37   :  { %s4167_s27 = smov [#allocation14]   ;;  %s4168_s1 = smov [#allocation2]  }
  0x38   :  { %s106_s28 = sshll.u32 %s4167_s27, 4  ;;  %s29_s22 = sshll.u32 %s4168_s1, 4  ;;  %s107_s28 = int_to_ptr.vmem [resolvable:$true] %s106_s28  ;;  %s30_s22 = int_to_ptr.vmem [resolvable:$true] %s29_s22 }
  0x39   :  { %s3994_s14 = scalar_lea.hbm %s5116_s7, 16 }
  0x3a   :  { %p3995_p10 = scmp.ne.s32.totalorder %s5116_s7, %s3994_s14  ;;  %p3998_p11 = scmp.lt.u32.totalorder %s3994_s14, %s5116_s7 }
  0x3c   :  { %p4000_p12 = pnand %p3998_p11, %p3995_p10 }
  0x3e   :  { %4003 = shalt.err (!%p4000_p12)
}
  0x3f   :  { %s4004_s5 = scalar_lea.vmem %s107_s28, 16  ;;  %s4008_s30 = scalar_lea.vmem %s107_s28, 32 }
  0x40   :  { %p4005_p13 = scmp.ne.s32.totalorder %s107_s28, %s4004_s5  ;;  %p4009_p0 = scmp.lt.s32.totalorder %s107_s28, %s107_s28 }
  0x41   :  { %p4010_p1 = scmp.lt.s32.totalorder %s4008_s30, %s4004_s5 }
  0x43   :  { %p4011_p2 = por %p4010_p1, %p4009_p0 }
  0x45   :  { %p4012_p3 = pnand %p4011_p2, %p4005_p13 }
  0x47   :  { %4015 = shalt.err (!%p4012_p3)
}
  0x48   :  { %109 = dma.hbm_to_vmem [thread:$0]  %s5116_s7, 16, %s107_s28, [#allocation15]  }
  0x49   :  { %s4016_s27 = scalar_lea.hbm %s5109_s0, 3072 }
  0x4a   :  { %p4017_p4 = scmp.ne.s32.totalorder %s5109_s0, %s4016_s27  ;;  %p4020_p5 = scmp.lt.u32.totalorder %s4016_s27, %s5109_s0 }
  0x4c   :  { %p4022_p6 = pnand %p4020_p5, %p4017_p4 }
  0x4e   :  { %4025 = shalt.err (!%p4022_p6)
}
  0x4f   :  { %s4026_s17 = scalar_lea.vmem %s30_s22, 3072  ;;  %p4031_p8 = scmp.lt.s32.totalorder %s30_s22, %s30_s22 }
  0x50   :  { %p4027_p7 = scmp.ne.s32.totalorder %s30_s22, %s4026_s17  ;;  %p4032_p9 = scmp.lt.s32.totalorder %s4026_s17, %s4026_s17 }
  0x52   :  { %p4033_p10 = por %p4032_p9, %p4031_p8 }
  0x54   :  { %p4034_p11 = pnand %p4033_p10, %p4027_p7 }
  0x56   :  { %4037 = shalt.err (!%p4034_p11)
}
  0x57   :  { %35 = dma.hbm_to_vmem [thread:$0]  %s5109_s0, 3072, %s30_s22, [#allocation3], %s4162_s15, %s4162_s15, %s4163_s16  }
  0x58   :  { %s4169_s18 = smov [#allocation7]   ;;  %s4170_s20 = smov [#allocation10]  }
  0x59   :  { %s54_s19 = sshll.u32 %s4169_s18, 4  ;;  %s74_s5 = sshll.u32 %s4170_s20, 4  ;;  %s55_s19 = int_to_ptr.vmem [resolvable:$true] %s54_s19  ;;  %s75_s5 = int_to_ptr.vmem [resolvable:$true] %s74_s5 }
  0x5a   :  { %s4038_s23 = scalar_lea.hbm %s5111_s2, 96 }
  0x5b   :  { %p4039_p12 = scmp.ne.s32.totalorder %s5111_s2, %s4038_s23  ;;  %p4042_p13 = scmp.lt.u32.totalorder %s4038_s23, %s5111_s2 }
  0x5d   :  { %p4044_p0 = pnand %p4042_p13, %p4039_p12 }
  0x5f   :  { %4047 = shalt.err (!%p4044_p0)
}
  0x60   :  { %s4048_s0 = scalar_lea.vmem %s55_s19, 96  ;;  %p4053_p2 = scmp.lt.s32.totalorder %s55_s19, %s55_s19 }
  0x61   :  { %p4049_p1 = scmp.ne.s32.totalorder %s55_s19, %s4048_s0  ;;  %p4054_p3 = scmp.lt.s32.totalorder %s4048_s0, %s4048_s0 }
  0x63   :  { %p4055_p4 = por %p4054_p3, %p4053_p2 }
  0x65   :  { %p4056_p5 = pnand %p4055_p4, %p4049_p1 }
  0x67   :  { %4059 = shalt.err (!%p4056_p5)
}
  0x68   :  { %57 = dma.hbm_to_vmem [thread:$0]  %s5111_s2, 96, %s55_s19, [#allocation6]  }
  0x69   :  { %s4060_s13 = scalar_lea.hbm %s5113_s4, 96 }
  0x6a   :  { %p4061_p6 = scmp.ne.s32.totalorder %s5113_s4, %s4060_s13  ;;  %p4064_p7 = scmp.lt.u32.totalorder %s4060_s13, %s5113_s4 }
  0x6c   :  { %p4066_p8 = pnand %p4064_p7, %p4061_p6 }
  0x6e   :  { %4069 = shalt.err (!%p4066_p8)
}
  0x6f   :  { %s4070_s18 = scalar_lea.vmem %s75_s5, 96  ;;  %p4075_p10 = scmp.lt.s32.totalorder %s75_s5, %s75_s5 }
  0x70   :  { %p4071_p9 = scmp.ne.s32.totalorder %s75_s5, %s4070_s18  ;;  %p4076_p11 = scmp.lt.s32.totalorder %s4070_s18, %s4070_s18 }
  0x72   :  { %p4077_p12 = por %p4076_p11, %p4075_p10 }
  0x74   :  { %p4078_p13 = pnand %p4077_p12, %p4071_p9 }
  0x76   :  { %4081 = shalt.err (!%p4078_p13)
}
  0x77   :  { %77 = dma.hbm_to_vmem [thread:$0]  %s5113_s4, 96, %s75_s5, [#allocation9]  }
  0x78   :  { %s4171_s20 = smov [#allocation13]   ;;  %s4172_s21 = smov [#allocation16]  }
  0x79   :  { %s96_s30 = sshll.u32 %s4171_s20, 4  ;;  %s116_s23 = sshll.u32 %s4172_s21, 4  ;;  %s97_s30 = int_to_ptr.vmem [resolvable:$true] %s96_s30  ;;  %s117_s23 = int_to_ptr.vmem [resolvable:$true] %s116_s23 }
  0x7a   :  { %s4082_s27 = scalar_lea.hbm %s5115_s6, 16 }
  0x7b   :  { %p4083_p0 = scmp.ne.s32.totalorder %s5115_s6, %s4082_s27  ;;  %p4086_p1 = scmp.lt.u32.totalorder %s4082_s27, %s5115_s6 }
  0x7d   :  { %p4088_p2 = pnand %p4086_p1, %p4083_p0 }
  0x7f   :  { %4091 = shalt.err (!%p4088_p2)
}
  0x80   :  { %s4092_s4 = scalar_lea.vmem %s97_s30, 16  ;;  %s4096_s5 = scalar_lea.vmem %s97_s30, 32 }
  0x81   :  { %p4093_p3 = scmp.ne.s32.totalorder %s97_s30, %s4092_s4  ;;  %p4097_p4 = scmp.lt.s32.totalorder %s97_s30, %s97_s30 }
  0x82   :  { %p4098_p5 = scmp.lt.s32.totalorder %s4096_s5, %s4092_s4 }
  0x84   :  { %p4099_p6 = por %p4098_p5, %p4097_p4 }
  0x86   :  { %p4100_p7 = pnand %p4099_p6, %p4093_p3 }
  0x88   :  { %4103 = shalt.err (!%p4100_p7)
}
  0x89   :  { %99 = dma.hbm_to_vmem [thread:$0]  %s5115_s6, 16, %s97_s30, [#allocation12]  }
  0x8a   :  { %s4104_s17 = scalar_lea.hbm %s5117_s8, 16 }
  0x8b   :  { %p4105_p8 = scmp.ne.s32.totalorder %s5117_s8, %s4104_s17  ;;  %p4108_p9 = scmp.lt.u32.totalorder %s4104_s17, %s5117_s8 }
  0x8d   :  { %p4110_p10 = pnand %p4108_p9, %p4105_p8 }
  0x8f   :  { %4113 = shalt.err (!%p4110_p10)
}
  0x90   :  { %s4114_s19 = scalar_lea.vmem %s117_s23, 16  ;;  %s4118_s20 = scalar_lea.vmem %s117_s23, 32 }
  0x91   :  { %p4115_p11 = scmp.ne.s32.totalorder %s117_s23, %s4114_s19  ;;  %p4119_p12 = scmp.lt.s32.totalorder %s117_s23, %s117_s23 }
  0x92   :  { %p4120_p13 = scmp.lt.s32.totalorder %s4118_s20, %s4114_s19 }
  0x94   :  { %p4121_p0 = por %p4120_p13, %p4119_p12 }
  0x96   :  { %p4122_p1 = pnand %p4121_p0, %p4115_p11 }
  0x98   :  { %4125 = shalt.err (!%p4122_p1)
}
  0x99   :  { %119 = dma.hbm_to_vmem [thread:$0]  %s5117_s8, 16, %s117_s23, [#allocation15]  }
  0x9a   :  { %4148 = dma.done.wait [#allocation3], 3072  }
  0x9b   :  { %4149 = vsyncadd [#allocation3], 4294964224 }
  0x9c   :  { %4150 = dma.done.wait [#allocation6], 73824  }
  0x9d   :  { %4151 = vsyncadd [#allocation6], 4294893472 }
  0x9e   :  { %4152 = dma.done.wait [#allocation9], 192  }
  0x9f   :  { %4153 = vsyncadd [#allocation9], 4294967104 }
  0xa0   :  { %4154 = dma.done.wait [#allocation12], 12304  }
  0xa1   :  { %4155 = vsyncadd [#allocation12], 4294954992 }
  0xa2   :  { %4156 = dma.done.wait [#allocation15], 32  }
  0xa3   :  { %4157 = vsyncadd [#allocation15], 4294967264  ;;  %v176_v0 = vld [vmem:[#allocation5 + $0x8] sm:$0xff]  ;;  %v182_v1 = vld [vmem:[#allocation5 + $0x38] sm:$0xff] }
  0xa4   :  { %v175_v2 = vld [vmem:[#allocation5] sm:$0xff]  ;;  %v3001_v3 = vpack.c.bf16 %v182_v1, %v176_v0  ;;  %v181_v4 = vld [vmem:[#allocation5 + $0x30] sm:$0xff]  ;;  %v178_v5 = vld [vmem:[#allocation5 + $0x18] sm:$0xff] }
  0xa5   :  { %v184_v6 = vld [vmem:[#allocation5 + $0x48] sm:$0xff]  ;;  %v3003_v7 = vpack.c.bf16 %v181_v4, %v175_v2  ;;  %v194_v10 = vld [vmem:[#allocation5 + $0x98] sm:$0xff]  ;;  %v177_v11 = vld [vmem:[#allocation5 + $0x10] sm:$0xff] }
  0xa6   :  { %v3193_v8 = vpack.c.bf16 %v184_v6, %v178_v5  ;;  %v188_v9 = vld [vmem:[#allocation5 + $0x68] sm:$0xff]  ;;  %3002 = vmatprep.subr.bf16.mxu0 %v3001_v3  ;;  %v183_v13 = vld [vmem:[#allocation5 + $0x40] sm:$0xff]  ;;  %v193_v15 = vld [vmem:[#allocation5 + $0x90] sm:$0xff] }
  0xa7   :  { %v3005_v12 = vpack.c.bf16 %v194_v10, %v188_v9  ;;  %v187_v14 = vld [vmem:[#allocation5 + $0x60] sm:$0xff]  ;;  %3004 = vmatpush1.bf16.msra.mxu0 %v3003_v7  ;;  %v3195_v16 = vpack.c.bf16 %v183_v13, %v177_v11  ;;  %v190_v18 = vld [vmem:[#allocation5 + $0x78] sm:$0xff]  ;;  %v196_v19 = vld [vmem:[#allocation5 + $0xa8] sm:$0xff] }
  0xa8   :  { %3194 = vmatprep.subr.bf16.mxu1 %v3193_v8  ;;  %v3007_v17 = vpack.c.bf16 %v193_v15, %v187_v14  ;;  %v200_v20 = vld [vmem:[#allocation5 + $0xc8] sm:$0xff]  ;;  %v3197_v21 = vpack.c.bf16 %v196_v19, %v190_v18  ;;  %v206_v22 = vld [vmem:[#allocation5 + $0xf8] sm:$0xff]  ;;  %v189_v23 = vld [vmem:[#allocation5 + $0x70] sm:$0xff] }
  0xa9   :  { %3006 = vmatprep.subr.bf16.mxu0 %v3005_v12  ;;  %v195_v24 = vld [vmem:[#allocation5 + $0xa0] sm:$0xff]  ;;  %3196 = vmatpush1.bf16.msra.mxu1 %v3195_v16  ;;  %v3009_v25 = vpack.c.bf16 %v206_v22, %v200_v20  ;;  %v205_v28 = vld [vmem:[#allocation5 + $0xf0] sm:$0xff]  ;;  %v202_v29 = vld [vmem:[#allocation5 + $0xd8] sm:$0xff] }
  0xaa   :  { %v3199_v26 = vpack.c.bf16 %v195_v24, %v189_v23  ;;  %v199_v27 = vld [vmem:[#allocation5 + $0xc0] sm:$0xff]  ;;  %3198 = vmatprep.subr.bf16.mxu1 %v3197_v21  ;;  %v208_v30 = vld [vmem:[#allocation5 + $0x108] sm:$0xff]  ;;  %v218_v32 = vld [vmem:[#allocation5 + $0x158] sm:$0xff] }
  0xab   :  { %v212_v31 = vld [vmem:[#allocation5 + $0x128] sm:$0xff]  ;;  %3008 = vmatpush1.bf16.msra.mxu0 %v3007_v17  ;;  %v3011_v33 = vpack.c.bf16 %v205_v28, %v199_v27  ;;  %v3201_v34 = vpack.c.bf16 %v208_v30, %v202_v29  ;;  %v201_v35 = vld [vmem:[#allocation5 + $0xd0] sm:$0xff]  ;;  %v207_v36 = vld [vmem:[#allocation5 + $0x100] sm:$0xff] }
  0xac   :  { %v211_v37 = vld [vmem:[#allocation5 + $0x120] sm:$0xff]  ;;  %3010 = vmatprep.subr.bf16.mxu0 %v3009_v25  ;;  %v3013_v38 = vpack.c.bf16 %v218_v32, %v212_v31  ;;  %v217_v39 = vld [vmem:[#allocation5 + $0x150] sm:$0xff]  ;;  %v214_v40 = vld [vmem:[#allocation5 + $0x138] sm:$0xff]  ;;  %v3203_v42 = vpack.c.bf16 %v207_v36, %v201_v35 }
  0xad   :  { %v220_v41 = vld [vmem:[#allocation5 + $0x168] sm:$0xff]  ;;  %3200 = vmatpush1.bf16.msra.mxu1 %v3199_v26  ;;  %v230_v44 = vld [vmem:[#allocation5 + $0x1b8] sm:$0xff]  ;;  %v213_v46 = vld [vmem:[#allocation5 + $0x130] sm:$0xff]  ;;  %v3015_v48 = vpack.c.bf16 %v217_v39, %v211_v37 }
  0xae   :  { %v224_v43 = vld [vmem:[#allocation5 + $0x188] sm:$0xff]  ;;  %3202 = vmatprep.subr.bf16.mxu1 %v3201_v34  ;;  %v3205_v45 = vpack.c.bf16 %v220_v41, %v214_v40  ;;  %v219_v47 = vld [vmem:[#allocation5 + $0x160] sm:$0xff]  ;;  %v226_v49 = vld [vmem:[#allocation5 + $0x198] sm:$0xff] }
  0xaf   :  { %3012 = vmatpush1.bf16.msra.mxu0 %v3011_v33  ;;  %v232_v50 = vld [vmem:[#allocation5 + $0x1c8] sm:$0xff]  ;;  %v3017_v51 = vpack.c.bf16 %v230_v44, %v224_v43  ;;  %v223_v52 = vld [vmem:[#allocation5 + $0x180] sm:$0xff]  ;;  %v229_v53 = vld [vmem:[#allocation5 + $0x1b0] sm:$0xff]  ;;  %v3207_v54 = vpack.c.bf16 %v219_v47, %v213_v46 }
  0xb0   :  { %3014 = vmatprep.subr.bf16.mxu0 %v3013_v38  ;;  %v236_v55 = vld [vmem:[#allocation5 + $0x1e8] sm:$0xff]  ;;  %v242_v56 = vld [vmem:[#allocation5 + $0x218] sm:$0xff]  ;;  %v3209_v57 = vpack.c.bf16 %v232_v50, %v226_v49  ;;  %v225_v58 = vld [vmem:[#allocation5 + $0x190] sm:$0xff]  ;;  %v3019_v60 = vpack.c.bf16 %v229_v53, %v223_v52 }
  0xb1   :  { %3204 = vmatpush1.bf16.msra.mxu1 %v3203_v42  ;;  %v231_v59 = vld [vmem:[#allocation5 + $0x1c0] sm:$0xff]  ;;  %v238_v61 = vld [vmem:[#allocation5 + $0x1f8] sm:$0xff]  ;;  %v244_v62 = vld [vmem:[#allocation5 + $0x228] sm:$0xff]  ;;  %v3021_v63 = vpack.c.bf16 %v242_v56, %v236_v55 }
  0xb2   :  { %3206 = vmatprep.subr.bf16.mxu1 %v3205_v45  ;;  %v235_v0 = vld [vmem:[#allocation5 + $0x1e0] sm:$0xff]  ;;  %v241_v1 = vld [vmem:[#allocation5 + $0x210] sm:$0xff]  ;;  %v3211_v2 = vpack.c.bf16 %v231_v59, %v225_v58  ;;  %v248_v3 = vld [vmem:[#allocation5 + $0x248] sm:$0xff]  ;;  %v3213_v5 = vpack.c.bf16 %v244_v62, %v238_v61 }
  0xb3   :  { %3016 = vmatpush1.bf16.msra.mxu0 %v3015_v48  ;;  %v254_v4 = vld [vmem:[#allocation5 + $0x278] sm:$0xff]  ;;  %v237_v6 = vld [vmem:[#allocation5 + $0x1f0] sm:$0xff]  ;;  %v243_v7 = vld [vmem:[#allocation5 + $0x220] sm:$0xff]  ;;  %v3023_v8 = vpack.c.bf16 %v241_v1, %v235_v0 }
  0xb4   :  { %3018 = vmatprep.subr.bf16.mxu0 %v3017_v51  ;;  %v250_v9 = vld [vmem:[#allocation5 + $0x258] sm:$0xff]  ;;  %v256_v10 = vld [vmem:[#allocation5 + $0x288] sm:$0xff]  ;;  %v3025_v11 = vpack.c.bf16 %v254_v4, %v248_v3  ;;  %v247_v12 = vld [vmem:[#allocation5 + $0x240] sm:$0xff]  ;;  %v3215_v14 = vpack.c.bf16 %v243_v7, %v237_v6 }
  0xb5   :  { %3208 = vmatpush1.bf16.msra.mxu1 %v3207_v54  ;;  %v253_v13 = vld [vmem:[#allocation5 + $0x270] sm:$0xff]  ;;  %v260_v15 = vld [vmem:[#allocation5 + $0x2a8] sm:$0xff]  ;;  %v266_v16 = vld [vmem:[#allocation5 + $0x2d8] sm:$0xff]  ;;  %v3217_v17 = vpack.c.bf16 %v256_v10, %v250_v9 }
  0xb6   :  { %3210 = vmatprep.subr.bf16.mxu1 %v3209_v57  ;;  %v249_v18 = vld [vmem:[#allocation5 + $0x250] sm:$0xff]  ;;  %v255_v19 = vld [vmem:[#allocation5 + $0x280] sm:$0xff]  ;;  %v3027_v20 = vpack.c.bf16 %v253_v13, %v247_v12  ;;  %v262_v21 = vld [vmem:[#allocation5 + $0x2b8] sm:$0xff]  ;;  %v3029_v23 = vpack.c.bf16 %v266_v16, %v260_v15 }
  0xb7   :  { %3020 = vmatpush1.bf16.msra.mxu0 %v3019_v60  ;;  %v268_v22 = vld [vmem:[#allocation5 + $0x2e8] sm:$0xff]  ;;  %v259_v24 = vld [vmem:[#allocation5 + $0x2a0] sm:$0xff]  ;;  %v265_v25 = vld [vmem:[#allocation5 + $0x2d0] sm:$0xff]  ;;  %v3219_v26 = vpack.c.bf16 %v255_v19, %v249_v18 }
  0xb8   :  { %3022 = vmatprep.subr.bf16.mxu0 %v3021_v63  ;;  %v272_v27 = vld [vmem:[#allocation5 + $0x308] sm:$0xff]  ;;  %v278_v28 = vld [vmem:[#allocation5 + $0x338] sm:$0xff]  ;;  %v3221_v29 = vpack.c.bf16 %v268_v22, %v262_v21  ;;  %v261_v30 = vld [vmem:[#allocation5 + $0x2b0] sm:$0xff]  ;;  %v3031_v32 = vpack.c.bf16 %v265_v25, %v259_v24 }
  0xb9   :  { %3212 = vmatpush1.bf16.msra.mxu1 %v3211_v2  ;;  %v267_v31 = vld [vmem:[#allocation5 + $0x2e0] sm:$0xff]  ;;  %v274_v33 = vld [vmem:[#allocation5 + $0x318] sm:$0xff]  ;;  %v280_v34 = vld [vmem:[#allocation5 + $0x348] sm:$0xff]  ;;  %v3033_v35 = vpack.c.bf16 %v278_v28, %v272_v27 }
  0xba   :  { %3214 = vmatprep.subr.bf16.mxu1 %v3213_v5  ;;  %v271_v36 = vld [vmem:[#allocation5 + $0x300] sm:$0xff]  ;;  %v277_v37 = vld [vmem:[#allocation5 + $0x330] sm:$0xff]  ;;  %v3223_v38 = vpack.c.bf16 %v267_v31, %v261_v30  ;;  %v284_v39 = vld [vmem:[#allocation5 + $0x368] sm:$0xff]  ;;  %v3225_v41 = vpack.c.bf16 %v280_v34, %v274_v33 }
  0xbb   :  { %3024 = vmatpush1.bf16.msra.mxu0 %v3023_v8  ;;  %v290_v40 = vld [vmem:[#allocation5 + $0x398] sm:$0xff]  ;;  %v273_v42 = vld [vmem:[#allocation5 + $0x310] sm:$0xff]  ;;  %v279_v43 = vld [vmem:[#allocation5 + $0x340] sm:$0xff]  ;;  %v3035_v44 = vpack.c.bf16 %v277_v37, %v271_v36 }
  0xbc   :  { %3026 = vmatprep.subr.bf16.mxu0 %v3025_v11  ;;  %v286_v45 = vld [vmem:[#allocation5 + $0x378] sm:$0xff]  ;;  %v292_v46 = vld [vmem:[#allocation5 + $0x3a8] sm:$0xff]  ;;  %v3037_v47 = vpack.c.bf16 %v290_v40, %v284_v39  ;;  %v283_v48 = vld [vmem:[#allocation5 + $0x360] sm:$0xff]  ;;  %v3227_v50 = vpack.c.bf16 %v279_v43, %v273_v42 }
  0xbd   :  { %3216 = vmatpush1.bf16.msra.mxu1 %v3215_v14  ;;  %v289_v49 = vld [vmem:[#allocation5 + $0x390] sm:$0xff]  ;;  %v296_v51 = vld [vmem:[#allocation5 + $0x3c8] sm:$0xff]  ;;  %v302_v52 = vld [vmem:[#allocation5 + $0x3f8] sm:$0xff]  ;;  %v3229_v53 = vpack.c.bf16 %v292_v46, %v286_v45 }
  0xbe   :  { %3218 = vmatprep.subr.bf16.mxu1 %v3217_v17  ;;  %v285_v54 = vld [vmem:[#allocation5 + $0x370] sm:$0xff]  ;;  %v291_v55 = vld [vmem:[#allocation5 + $0x3a0] sm:$0xff]  ;;  %v3039_v56 = vpack.c.bf16 %v289_v49, %v283_v48  ;;  %v298_v57 = vld [vmem:[#allocation5 + $0x3d8] sm:$0xff]  ;;  %v3041_v59 = vpack.c.bf16 %v302_v52, %v296_v51 }
  0xbf   :  { %3028 = vmatpush1.bf16.msra.mxu0 %v3027_v20  ;;  %v304_v58 = vld [vmem:[#allocation5 + $0x408] sm:$0xff]  ;;  %v295_v60 = vld [vmem:[#allocation5 + $0x3c0] sm:$0xff]  ;;  %v301_v61 = vld [vmem:[#allocation5 + $0x3f0] sm:$0xff]  ;;  %v3231_v62 = vpack.c.bf16 %v291_v55, %v285_v54 }
  0xc0   :  { %3030 = vmatprep.subr.bf16.mxu0 %v3029_v23  ;;  %v308_v63 = vld [vmem:[#allocation5 + $0x428] sm:$0xff]  ;;  %v314_v0 = vld [vmem:[#allocation5 + $0x458] sm:$0xff]  ;;  %v3233_v1 = vpack.c.bf16 %v304_v58, %v298_v57  ;;  %v297_v2 = vld [vmem:[#allocation5 + $0x3d0] sm:$0xff]  ;;  %v3043_v4 = vpack.c.bf16 %v301_v61, %v295_v60 }
  0xc1   :  { %3220 = vmatpush1.bf16.msra.mxu1 %v3219_v26  ;;  %v303_v3 = vld [vmem:[#allocation5 + $0x400] sm:$0xff]  ;;  %v310_v5 = vld [vmem:[#allocation5 + $0x438] sm:$0xff]  ;;  %v316_v6 = vld [vmem:[#allocation5 + $0x468] sm:$0xff]  ;;  %v3045_v7 = vpack.c.bf16 %v314_v0, %v308_v63 }
  0xc2   :  { %3222 = vmatprep.subr.bf16.mxu1 %v3221_v29  ;;  %v307_v8 = vld [vmem:[#allocation5 + $0x420] sm:$0xff]  ;;  %v313_v9 = vld [vmem:[#allocation5 + $0x450] sm:$0xff]  ;;  %v3235_v10 = vpack.c.bf16 %v303_v3, %v297_v2  ;;  %v320_v11 = vld [vmem:[#allocation5 + $0x488] sm:$0xff]  ;;  %v3237_v14 = vpack.c.bf16 %v316_v6, %v310_v5 }
  0xc3   :  { %3032 = vmatpush1.bf16.msra.mxu0 %v3031_v32  ;;  %v326_v12 = vld [vmem:[#allocation5 + $0x4b8] sm:$0xff]  ;;  %v152_v13 = vld [vmem:[#allocation2 + $0x8] sm:$0xff]  ;;  %v309_v15 = vld [vmem:[#allocation5 + $0x430] sm:$0xff]  ;;  %v3047_v17 = vpack.c.bf16 %v313_v9, %v307_v8 }
  0xc4   :  { %3034 = vmatprep.subr.bf16.mxu0 %v3033_v35  ;;  %v315_v16 = vld [vmem:[#allocation5 + $0x460] sm:$0xff]  ;;  %847 = vmatprep.mubr.f32.mxu0 %v152_v13  ;;  %v322_v18 = vld [vmem:[#allocation5 + $0x498] sm:$0xff]  ;;  %v328_v19 = vld [vmem:[#allocation5 + $0x4c8] sm:$0xff]  ;;  %v3049_v20 = vpack.c.bf16 %v326_v12, %v320_v11 }
  0xc5   :  { %3224 = vmatpush1.bf16.msra.mxu1 %v3223_v38  ;;  %1114 = vmatprep.mubr.f32.mxu1 %v152_v13  ;;  %v319_v21 = vld [vmem:[#allocation5 + $0x480] sm:$0xff]  ;;  %v325_v22 = vld [vmem:[#allocation5 + $0x4b0] sm:$0xff]  ;;  %v3239_v23 = vpack.c.bf16 %v315_v16, %v309_v15  ;;  %v332_v24 = vld [vmem:[#allocation5 + $0x4e8] sm:$0xff]  ;;  %v3241_v26 = vpack.c.bf16 %v328_v19, %v322_v18 }
  0xc6   :  { %3226 = vmatprep.subr.bf16.mxu1 %v3225_v41  ;;  %v338_v25 = vld [vmem:[#allocation5 + $0x518] sm:$0xff]  ;;  %v321_v27 = vld [vmem:[#allocation5 + $0x490] sm:$0xff]  ;;  %v327_v28 = vld [vmem:[#allocation5 + $0x4c0] sm:$0xff]  ;;  %v3051_v29 = vpack.c.bf16 %v325_v22, %v319_v21 }
  0xc7   :  { %3036 = vmatpush1.bf16.msra.mxu0 %v3035_v44  ;;  %v334_v30 = vld [vmem:[#allocation5 + $0x4f8] sm:$0xff]  ;;  %v340_v31 = vld [vmem:[#allocation5 + $0x528] sm:$0xff]  ;;  %v3053_v32 = vpack.c.bf16 %v338_v25, %v332_v24  ;;  %v331_v33 = vld [vmem:[#allocation5 + $0x4e0] sm:$0xff]  ;;  %v3243_v35 = vpack.c.bf16 %v327_v28, %v321_v27 }
  0xc8   :  { %3038 = vmatprep.subr.bf16.mxu0 %v3037_v47  ;;  %v337_v34 = vld [vmem:[#allocation5 + $0x510] sm:$0xff]  ;;  %v344_v36 = vld [vmem:[#allocation5 + $0x548] sm:$0xff]  ;;  %v350_v37 = vld [vmem:[#allocation5 + $0x578] sm:$0xff]  ;;  %v3245_v38 = vpack.c.bf16 %v340_v31, %v334_v30 }
  0xc9   :  { %3228 = vmatpush1.bf16.msra.mxu1 %v3227_v50  ;;  %v333_v39 = vld [vmem:[#allocation5 + $0x4f0] sm:$0xff]  ;;  %v339_v40 = vld [vmem:[#allocation5 + $0x520] sm:$0xff]  ;;  %v3055_v41 = vpack.c.bf16 %v337_v34, %v331_v33  ;;  %v346_v42 = vld [vmem:[#allocation5 + $0x558] sm:$0xff]  ;;  %v3057_v44 = vpack.c.bf16 %v350_v37, %v344_v36 }
  0xca   :  { %3230 = vmatprep.subr.bf16.mxu1 %v3229_v53  ;;  %v352_v43 = vld [vmem:[#allocation5 + $0x588] sm:$0xff]  ;;  %v343_v45 = vld [vmem:[#allocation5 + $0x540] sm:$0xff]  ;;  %v349_v46 = vld [vmem:[#allocation5 + $0x570] sm:$0xff]  ;;  %v3247_v47 = vpack.c.bf16 %v339_v40, %v333_v39 }
  0xcb   :  { %3040 = vmatpush1.bf16.msra.mxu0 %v3039_v56  ;;  %v356_v48 = vld [vmem:[#allocation5 + $0x5a8] sm:$0xff]  ;;  %v362_v49 = vld [vmem:[#allocation5 + $0x5d8] sm:$0xff]  ;;  %v3249_v50 = vpack.c.bf16 %v352_v43, %v346_v42  ;;  %v345_v51 = vld [vmem:[#allocation5 + $0x550] sm:$0xff]  ;;  %v3059_v53 = vpack.c.bf16 %v349_v46, %v343_v45 }
  0xcc   :  { %3042 = vmatprep.subr.bf16.mxu0 %v3041_v59  ;;  %v351_v52 = vld [vmem:[#allocation5 + $0x580] sm:$0xff]  ;;  %v358_v54 = vld [vmem:[#allocation5 + $0x5b8] sm:$0xff]  ;;  %v364_v55 = vld [vmem:[#allocation5 + $0x5e8] sm:$0xff]  ;;  %v3061_v56 = vpack.c.bf16 %v362_v49, %v356_v48 }
  0xcd   :  { %3232 = vmatpush1.bf16.msra.mxu1 %v3231_v62  ;;  %v355_v57 = vld [vmem:[#allocation5 + $0x5a0] sm:$0xff]  ;;  %v361_v58 = vld [vmem:[#allocation5 + $0x5d0] sm:$0xff]  ;;  %v3251_v59 = vpack.c.bf16 %v351_v52, %v345_v51  ;;  %v368_v60 = vld [vmem:[#allocation5 + $0x608] sm:$0xff]  ;;  %v3253_v62 = vpack.c.bf16 %v364_v55, %v358_v54 }
  0xce   :  { %3234 = vmatprep.subr.bf16.mxu1 %v3233_v1  ;;  %v374_v61 = vld [vmem:[#allocation5 + $0x638] sm:$0xff]  ;;  %v357_v63 = vld [vmem:[#allocation5 + $0x5b0] sm:$0xff]  ;;  %v363_v0 = vld [vmem:[#allocation5 + $0x5e0] sm:$0xff]  ;;  %v3063_v1 = vpack.c.bf16 %v361_v58, %v355_v57 }
  0xcf   :  { %3044 = vmatpush1.bf16.msra.mxu0 %v3043_v4  ;;  %v370_v2 = vld [vmem:[#allocation5 + $0x618] sm:$0xff]  ;;  %v376_v3 = vld [vmem:[#allocation5 + $0x648] sm:$0xff]  ;;  %v3065_v4 = vpack.c.bf16 %v374_v61, %v368_v60  ;;  %v367_v5 = vld [vmem:[#allocation5 + $0x600] sm:$0xff] }
  0xd0   :  { %3046 = vmatprep.subr.bf16.mxu0 %v3045_v7  ;;  %v373_v6 = vld [vmem:[#allocation5 + $0x630] sm:$0xff]  ;;  %v3255_v7 = vpack.c.bf16 %v363_v0, %v357_v63  ;;  %v380_v8 = vld [vmem:[#allocation5 + $0x668] sm:$0xff]  ;;  %v386_v9 = vld [vmem:[#allocation5 + $0x698] sm:$0xff] }
  0xd1   :  { %3236 = vmatpush1.bf16.msra.mxu1 %v3235_v10  ;;  %v3257_v10 = vpack.c.bf16 %v376_v3, %v370_v2  ;;  %v369_v11 = vld [vmem:[#allocation5 + $0x610] sm:$0xff]  ;;  %v375_v12 = vld [vmem:[#allocation5 + $0x640] sm:$0xff]  ;;  %v382_v15 = vld [vmem:[#allocation5 + $0x678] sm:$0xff] }
  0xd2   :  { %3238 = vmatprep.subr.bf16.mxu1 %v3237_v14  ;;  %v151_v13 = vld [vmem:[#allocation2] sm:$0xff]  ;;  %v3067_v14 = vpack.c.bf16 %v373_v6, %v367_v5  ;;  %v388_v16 = vld [vmem:[#allocation5 + $0x6a8] sm:$0xff]  ;;  %v385_v19 = vld [vmem:[#allocation5 + $0x690] sm:$0xff] }
  0xd3   :  { %3048 = vmatpush1.bf16.msra.mxu0 %v3047_v17  ;;  %v3069_v17 = vpack.c.bf16 %v386_v9, %v380_v8  ;;  %v379_v18 = vld [vmem:[#allocation5 + $0x660] sm:$0xff]  ;;  %v392_v21 = vld [vmem:[#allocation5 + $0x6c8] sm:$0xff]  ;;  %v398_v22 = vld [vmem:[#allocation5 + $0x6f8] sm:$0xff] }
  0xd4   :  { %3050 = vmatprep.subr.bf16.mxu0 %v3049_v20  ;;  %v3259_v20 = vpack.c.bf16 %v375_v12, %v369_v11  ;;  %v381_v24 = vld [vmem:[#allocation5 + $0x670] sm:$0xff]  ;;  %v387_v25 = vld [vmem:[#allocation5 + $0x6a0] sm:$0xff]  ;;  %v394_v27 = vld [vmem:[#allocation5 + $0x6d8] sm:$0xff] }
  0xd5   :  { %3240 = vmatpush1.bf16.msra.mxu1 %v3239_v23  ;;  %v3261_v23 = vpack.c.bf16 %v388_v16, %v382_v15  ;;  %v400_v28 = vld [vmem:[#allocation5 + $0x708] sm:$0xff]  ;;  %v391_v30 = vld [vmem:[#allocation5 + $0x6c0] sm:$0xff]  ;;  %v397_v31 = vld [vmem:[#allocation5 + $0x6f0] sm:$0xff] }
  0xd6   :  { %3242 = vmatprep.subr.bf16.mxu1 %v3241_v26  ;;  %v3071_v26 = vpack.c.bf16 %v385_v19, %v379_v18  ;;  %v404_v33 = vld [vmem:[#allocation5 + $0x728] sm:$0xff]  ;;  %v410_v34 = vld [vmem:[#allocation5 + $0x758] sm:$0xff]  ;;  %v393_v36 = vld [vmem:[#allocation5 + $0x6d0] sm:$0xff] }
  0xd7   :  { %3052 = vmatpush1.bf16.msra.mxu0 %v3051_v29  ;;  %v3073_v29 = vpack.c.bf16 %v398_v22, %v392_v21  ;;  %v399_v37 = vld [vmem:[#allocation5 + $0x700] sm:$0xff]  ;;  %v406_v39 = vld [vmem:[#allocation5 + $0x738] sm:$0xff]  ;;  %v412_v40 = vld [vmem:[#allocation5 + $0x768] sm:$0xff] }
  0xd8   :  { %3054 = vmatprep.subr.bf16.mxu0 %v3053_v32  ;;  %v3263_v32 = vpack.c.bf16 %v387_v25, %v381_v24  ;;  %v403_v42 = vld [vmem:[#allocation5 + $0x720] sm:$0xff]  ;;  %v409_v43 = vld [vmem:[#allocation5 + $0x750] sm:$0xff]  ;;  %v416_v45 = vld [vmem:[#allocation5 + $0x788] sm:$0xff] }
  0xd9   :  { %3244 = vmatpush1.bf16.msra.mxu1 %v3243_v35  ;;  %v3265_v35 = vpack.c.bf16 %v400_v28, %v394_v27  ;;  %v422_v46 = vld [vmem:[#allocation5 + $0x7b8] sm:$0xff]  ;;  %v405_v48 = vld [vmem:[#allocation5 + $0x730] sm:$0xff]  ;;  %v411_v49 = vld [vmem:[#allocation5 + $0x760] sm:$0xff] }
  0xda   :  { %3246 = vmatprep.subr.bf16.mxu1 %v3245_v38  ;;  %v3075_v38 = vpack.c.bf16 %v397_v31, %v391_v30  ;;  %v418_v51 = vld [vmem:[#allocation5 + $0x798] sm:$0xff]  ;;  %v424_v52 = vld [vmem:[#allocation5 + $0x7c8] sm:$0xff]  ;;  %v415_v54 = vld [vmem:[#allocation5 + $0x780] sm:$0xff]  ;;  %v3271_v57 = vpack.c.bf16 %v411_v49, %v405_v48 }
  0xdb   :  { %3056 = vmatpush1.bf16.msra.mxu0 %v3055_v41  ;;  %v3077_v41 = vpack.c.bf16 %v410_v34, %v404_v33  ;;  %v421_v55 = vld [vmem:[#allocation5 + $0x7b0] sm:$0xff]  ;;  %v428_v58 = vld [vmem:[#allocation5 + $0x7e8] sm:$0xff]  ;;  %v3273_v60 = vpack.c.bf16 %v424_v52, %v418_v51  ;;  %v427_v5 = vld [vmem:[#allocation5 + $0x7e0] sm:$0xff] }
  0xdc   :  { %3058 = vmatprep.subr.bf16.mxu0 %v3057_v44  ;;  %v3267_v44 = vpack.c.bf16 %v399_v37, %v393_v36  ;;  %v417_v61 = vld [vmem:[#allocation5 + $0x790] sm:$0xff]  ;;  %v3083_v0 = vpack.c.bf16 %v421_v55, %v415_v54  ;;  %v436_v2 = vld [vmem:[#allocation5 + $0x828] sm:$0xff]  ;;  %v446_v9 = vld [vmem:[#allocation5 + $0x878] sm:$0xff] }
  0xdd   :  { %3248 = vmatpush1.bf16.msra.mxu1 %v3247_v47  ;;  %v3269_v47 = vpack.c.bf16 %v412_v40, %v406_v39  ;;  %v157_v63 = vld [vmem:[#allocation2 + $0x30] sm:$0xff]  ;;  %v164_v3 = vld [vmem:[#allocation2 + $0x68] sm:$0xff]  ;;  %v442_v15 = vld [vmem:[#allocation5 + $0x858] sm:$0xff] }
  0xde   :  { %3250 = vmatprep.subr.bf16.mxu1 %v3249_v50  ;;  %v3079_v50 = vpack.c.bf16 %v409_v43, %v403_v42  ;;  %v433_v6 = vld [vmem:[#allocation5 + $0x810] sm:$0xff]  ;;  %v440_v8 = vld [vmem:[#allocation5 + $0x848] sm:$0xff]  ;;  %v439_v19 = vld [vmem:[#allocation5 + $0x840] sm:$0xff] }
  0xdf   :  { %3060 = vmatpush1.bf16.msra.mxu0 %v3059_v53  ;;  %v3081_v53 = vpack.c.bf16 %v422_v46, %v416_v45  ;;  %v429_v12 = vld [vmem:[#allocation5 + $0x7f0] sm:$0xff]  ;;  %v448_v16 = vld [vmem:[#allocation5 + $0x888] sm:$0xff]  ;;  %v3089_v18 = vpack.c.bf16 %v446_v9, %v440_v8  ;;  %v447_v27 = vld [vmem:[#allocation5 + $0x880] sm:$0xff] }
  0xe0   :  { %3062 = vmatprep.subr.bf16.mxu0 %v3061_v56  ;;  %v158_v56 = vld [vmem:[#allocation2 + $0x38] sm:$0xff]  ;;  %v452_v22 = vld [vmem:[#allocation5 + $0x8a8] sm:$0xff]  ;;  %v169_v24 = vld [vmem:[#allocation2 + $0x90] sm:$0xff]  ;;  %v3281_v25 = vpack.c.bf16 %v448_v16, %v442_v15 }
  0xe1   :  { %3252 = vmatpush1.bf16.msra.mxu1 %v3251_v59  ;;  %v434_v59 = vld [vmem:[#allocation5 + $0x818] sm:$0xff]  ;;  %v460_v31 = vld [vmem:[#allocation5 + $0x8e8] sm:$0xff]  ;;  %v451_v33 = vld [vmem:[#allocation5 + $0x8a0] sm:$0xff] }
  0xe2   :  { %3254 = vmatprep.subr.bf16.mxu1 %v3253_v62  ;;  %v423_v62 = vld [vmem:[#allocation5 + $0x7c0] sm:$0xff]  ;;  %v154_v28 = vld [vmem:[#allocation2 + $0x18] sm:$0xff]  ;;  %v457_v34 = vld [vmem:[#allocation5 + $0x8d0] sm:$0xff] }
  0xe3   :  { %3064 = vmatpush1.bf16.msra.mxu0 %v3063_v1  ;;  %v430_v1 = vld [vmem:[#allocation5 + $0x7f8] sm:$0xff]  ;;  %v464_v36 = vld [vmem:[#allocation5 + $0x908] sm:$0xff]  ;;  %v453_v39 = vld [vmem:[#allocation5 + $0x8b0] sm:$0xff] }
  0xe4   :  { %3066 = vmatprep.subr.bf16.mxu0 %v3065_v4  ;;  %v3085_v4 = vpack.c.bf16 %v434_v59, %v428_v58  ;;  %v3277_v11 = vpack.c.bf16 %v436_v2, %v430_v1  ;;  %v454_v30 = vld [vmem:[#allocation5 + $0x8b8] sm:$0xff]  ;;  %v459_v40 = vld [vmem:[#allocation5 + $0x8e0] sm:$0xff]  ;;  %v472_v43 = vld [vmem:[#allocation5 + $0x948] sm:$0xff] }
  0xe5   :  { %3256 = vmatpush1.bf16.msra.mxu1 %v3255_v7  ;;  %v3275_v7 = vpack.c.bf16 %v423_v62, %v417_v61  ;;  %v470_v37 = vld [vmem:[#allocation5 + $0x938] sm:$0xff]  ;;  %v463_v45 = vld [vmem:[#allocation5 + $0x900] sm:$0xff]  ;;  %v469_v46 = vld [vmem:[#allocation5 + $0x930] sm:$0xff] }
  0xe6   :  { %848 = vmatmul.mubr.f32.vlgmr.msra.gmra.mrb[0].mxu0 %v151_v13  ;;  %3258 = vmatprep.subr.bf16.mxu1 %v3257_v10  ;;  %v163_v10 = vld [vmem:[#allocation2 + $0x60] sm:$0xff]  ;;  %v466_v42 = vld [vmem:[#allocation5 + $0x918] sm:$0xff]  ;;  %v476_v48 = vld [vmem:[#allocation5 + $0x968] sm:$0xff] }
  0xe7   :  { %3068 = vmatpush1.bf16.msra.mxu0 %v3067_v14  ;;  %853 = vmatprep.mubr.f32.mxu0 %v158_v56  ;;  %v3087_v14 = vpack.c.bf16 %v433_v6, %v427_v5  ;;  %v482_v49 = vld [vmem:[#allocation5 + $0x998] sm:$0xff]  ;;  %v465_v51 = vld [vmem:[#allocation5 + $0x910] sm:$0xff]  ;;  %v471_v52 = vld [vmem:[#allocation5 + $0x940] sm:$0xff] }
  0xe8   :  { %3070 = vmatprep.subr.bf16.mxu0 %v3069_v17  ;;  %1115 = vmatmul.mubr.f32.vlgmr.msra.gmra.mrb[0].mxu1 %v151_v13  ;;  %v435_v13 = vld [vmem:[#allocation5 + $0x820] sm:$0xff]  ;;  %v170_v17 = vld [vmem:[#allocation2 + $0x98] sm:$0xff]  ;;  %v484_v55 = vld [vmem:[#allocation5 + $0x9a8] sm:$0xff]  ;;  %v3291_v59 = vpack.c.bf16 %v471_v52, %v465_v51 }
  0xe9   :  { %3260 = vmatpush1.bf16.msra.mxu1 %v3259_v20  ;;  %1120 = vmatprep.mubr.f32.mxu1 %v158_v56  ;;  %v445_v20 = vld [vmem:[#allocation5 + $0x870] sm:$0xff]  ;;  %v3279_v21 = vpack.c.bf16 %v435_v13, %v429_v12  ;;  %v478_v54 = vld [vmem:[#allocation5 + $0x978] sm:$0xff]  ;;  %v3101_v56 = vpack.c.bf16 %v482_v49, %v476_v48  ;;  %v487_v5 = vld [vmem:[#allocation5 + $0x9c0] sm:$0xff] }
  0xea   :  { %3262 = vmatprep.subr.bf16.mxu1 %v3261_v23  ;;  %854 = vmatmul.mubr.f32.gmra.mrb[2].mxu0 %v157_v63  ;;  %v458_v23 = vld [vmem:[#allocation5 + $0x8d8] sm:$0xff]  ;;  %v481_v58 = vld [vmem:[#allocation5 + $0x990] sm:$0xff]  ;;  %v3293_v62 = vpack.c.bf16 %v484_v55, %v478_v54  ;;  %v500_v8 = vld [vmem:[#allocation5 + $0xa28] sm:$0xff] }
  0xeb   :  { %3072 = vmatpush1.bf16.msra.mxu0 %v3071_v26  ;;  %859 = vmatprep.mubr.f32.mxu0 %v164_v3  ;;  %v441_v26 = vld [vmem:[#allocation5 + $0x850] sm:$0xff]  ;;  %v494_v61 = vld [vmem:[#allocation5 + $0x9f8] sm:$0xff]  ;;  %v495_v12 = vld [vmem:[#allocation5 + $0xa00] sm:$0xff] }
  0xec   :  { %3074 = vmatprep.subr.bf16.mxu0 %v3073_v29  ;;  %1121 = vmatmul.mubr.f32.gmra.mrb[2].mxu1 %v157_v63  ;;  %v3091_v29 = vpack.c.bf16 %v445_v20, %v439_v19  ;;  %v477_v63 = vld [vmem:[#allocation5 + $0x970] sm:$0xff]  ;;  %v490_v2 = vld [vmem:[#allocation5 + $0x9d8] sm:$0xff]  ;;  %v508_v15 = vld [vmem:[#allocation5 + $0xa68] sm:$0xff] }
  0xed   :  { %3264 = vmatpush1.bf16.msra.mxu1 %v3263_v32  ;;  %1126 = vmatprep.mubr.f32.mxu1 %v164_v3  ;;  %v3093_v32 = vpack.c.bf16 %v458_v23, %v452_v22  ;;  %v496_v3 = vld [vmem:[#allocation5 + $0xa08] sm:$0xff]  ;;  %v493_v6 = vld [vmem:[#allocation5 + $0x9f0] sm:$0xff]  ;;  %v506_v9 = vld [vmem:[#allocation5 + $0xa58] sm:$0xff] }
  0xee   :  { %3266 = vmatprep.subr.bf16.mxu1 %v3265_v35  ;;  %860 = vmatmul.mubr.f32.gmra.mrb[4].mxu0 %v163_v10  ;;  %v3283_v35 = vpack.c.bf16 %v447_v27, %v441_v26  ;;  %v3107_v13 = vpack.c.bf16 %v493_v6, %v487_v5  ;;  %v3109_v16 = vpack.c.bf16 %v506_v9, %v500_v8  ;;  %v512_v20 = vld [vmem:[#allocation5 + $0xa88] sm:$0xff]  ;;  %v501_v23 = vld [vmem:[#allocation5 + $0xa30] sm:$0xff]  ;;  %v514_v26 = vld [vmem:[#allocation5 + $0xa98] sm:$0xff] }
  0xef   :  { %3076 = vmatpush1.bf16.msra.mxu0 %v3075_v38  ;;  %865 = vmatprep.mubr.f32.mxu0 %v170_v17  ;;  %v3285_v38 = vpack.c.bf16 %v460_v31, %v454_v30  ;;  %v520_v27 = vld [vmem:[#allocation5 + $0xac8] sm:$0xff]  ;;  %v517_v30 = vld [vmem:[#allocation5 + $0xab0] sm:$0xff]  ;;  %v531_v48 = vld [vmem:[#allocation5 + $0xb20] sm:$0xff] }
  0xf0   :  { %3078 = vmatprep.subr.bf16.mxu0 %v3077_v41  ;;  %1127 = vmatmul.mubr.f32.gmra.mrb[4].mxu1 %v163_v10  ;;  %v3095_v41 = vpack.c.bf16 %v457_v34, %v451_v33  ;;  %v3297_v10 = vpack.c.bf16 %v496_v3, %v490_v2  ;;  %v530_v33 = vld [vmem:[#allocation5 + $0xb18] sm:$0xff]  ;;  %v3305_v34 = vpack.c.bf16 %v520_v27, %v514_v26  ;;  %v544_v51 = vld [vmem:[#allocation5 + $0xb88] sm:$0xff]  ;;  %v541_v54 = vld [vmem:[#allocation5 + $0xb70] sm:$0xff] }
  0xf1   :  { %3268 = vmatpush1.bf16.msra.mxu1 %v3267_v44  ;;  %1132 = vmatprep.mubr.f32.mxu1 %v170_v17  ;;  %v3097_v44 = vpack.c.bf16 %v470_v37, %v464_v36  ;;  %v499_v17 = vld [vmem:[#allocation5 + $0xa20] sm:$0xff]  ;;  %v553_v2 = vld [vmem:[#allocation5 + $0xbd0] sm:$0xff]  ;;  %v566_v5 = vld [vmem:[#allocation5 + $0xc38] sm:$0xff] }
  0xf2   :  { %3270 = vmatprep.subr.bf16.mxu1 %v3269_v47  ;;  %866 = vmatmul.mubr.f32.gmra.mrb[6].mxu0 %v169_v24  ;;  %v3287_v47 = vpack.c.bf16 %v459_v40, %v453_v39  ;;  %v519_v36 = vld [vmem:[#allocation5 + $0xac0] sm:$0xff]  ;;  %v532_v39 = vld [vmem:[#allocation5 + $0xb28] sm:$0xff]  ;;  %v577_v27 = vld [vmem:[#allocation5 + $0xc90] sm:$0xff] }
  0xf3   :  { %3080 = vmatpush1.bf16.msra.mxu0 %v3079_v50  ;;  %936 = vmatprep.mubr.f32.mxu0 %v154_v28  ;;  %v3289_v50 = vpack.c.bf16 %v472_v43, %v466_v42  ;;  %v529_v42 = vld [vmem:[#allocation5 + $0xb10] sm:$0xff]  ;;  %v555_v8 = vld [vmem:[#allocation5 + $0xbe0] sm:$0xff] }
  0xf4   :  { %3082 = vmatprep.subr.bf16.mxu0 %v3081_v53  ;;  %1133 = vmatmul.mubr.f32.gmra.mrb[6].mxu1 %v169_v24  ;;  %v3099_v53 = vpack.c.bf16 %v469_v46, %v463_v45  ;;  %v507_v24 = vld [vmem:[#allocation5 + $0xa60] sm:$0xff]  ;;  %v542_v45 = vld [vmem:[#allocation5 + $0xb78] sm:$0xff] }
  0xf5   :  { %3272 = vmatpush1.bf16.msra.mxu1 %v3271_v57  ;;  %1203 = vmatprep.mubr.f32.mxu1 %v154_v28  ;;  %v475_v57 = vld [vmem:[#allocation5 + $0x960] sm:$0xff]  ;;  %v3303_v31 = vpack.c.bf16 %v507_v24, %v501_v23  ;;  %v574_v23 = vld [vmem:[#allocation5 + $0xc78] sm:$0xff]  ;;  %v580_v24 = vld [vmem:[#allocation5 + $0xca8] sm:$0xff] }
  0xf6   :  { %3274 = vmatprep.subr.bf16.mxu1 %v3273_v60  ;;  %v488_v60 = vld [vmem:[#allocation5 + $0x9c8] sm:$0xff]  ;;  %v3103_v1 = vpack.c.bf16 %v481_v58, %v475_v57  ;;  %v554_v57 = vld [vmem:[#allocation5 + $0xbd8] sm:$0xff]  ;;  %v571_v26 = vld [vmem:[#allocation5 + $0xc60] sm:$0xff] }
  0xf7   :  { %3084 = vmatpush1.bf16.msra.mxu0 %v3083_v0  ;;  %v483_v0 = vld [vmem:[#allocation5 + $0x9a0] sm:$0xff] }
  0xf8   :  { %3086 = vmatprep.subr.bf16.mxu0 %v3085_v4  ;;  %v3105_v4 = vpack.c.bf16 %v494_v61, %v488_v60  ;;  %v543_v60 = vld [vmem:[#allocation5 + $0xb80] sm:$0xff] }
  0xf9   :  { %3276 = vmatpush1.bf16.msra.mxu1 %v3275_v7  ;;  %v3295_v7 = vpack.c.bf16 %v483_v0, %v477_v63  ;;  %v556_v63 = vld [vmem:[#allocation5 + $0xbe8] sm:$0xff] }
  0xfa   :  { %3278 = vmatprep.subr.bf16.mxu1 %v3277_v11  ;;  %v489_v11 = vld [vmem:[#allocation5 + $0x9d0] sm:$0xff] }
  0xfb   :  { %3088 = vmatpush1.bf16.msra.mxu0 %v3087_v14  ;;  %v502_v14 = vld [vmem:[#allocation5 + $0xa38] sm:$0xff]  ;;  %v3299_v19 = vpack.c.bf16 %v495_v12, %v489_v11  ;;  %v568_v11 = vld [vmem:[#allocation5 + $0xc48] sm:$0xff] }
  0xfc   :  { %3090 = vmatprep.subr.bf16.mxu0 %v3089_v18  ;;  %v505_v18 = vld [vmem:[#allocation5 + $0xa50] sm:$0xff]  ;;  %v3301_v22 = vpack.c.bf16 %v508_v15, %v502_v14 }
  0xfd   :  { %3280 = vmatpush1.bf16.msra.mxu1 %v3279_v21  ;;  %v518_v21 = vld [vmem:[#allocation5 + $0xab8] sm:$0xff]  ;;  %v565_v14 = vld [vmem:[#allocation5 + $0xc30] sm:$0xff] }
  0xfe   :  { %3282 = vmatprep.subr.bf16.mxu1 %v3281_v25  ;;  %v3111_v25 = vpack.c.bf16 %v505_v18, %v499_v17  ;;  %v3113_v28 = vpack.c.bf16 %v518_v21, %v512_v20  ;;  %v578_v17 = vld [vmem:[#allocation5 + $0xc98] sm:$0xff]  ;;  %v567_v20 = vld [vmem:[#allocation5 + $0xc40] sm:$0xff]  ;;  %v153_v21 = vld [vmem:[#allocation2 + $0x10] sm:$0xff] }
  0xff   :  { %3092 = vmatpush1.bf16.msra.mxu0 %v3091_v29  ;;  %v511_v29 = vld [vmem:[#allocation5 + $0xa80] sm:$0xff] }
 0x100   :  { %3094 = vmatprep.subr.bf16.mxu0 %v3093_v32  ;;  %v524_v32 = vld [vmem:[#allocation5 + $0xae8] sm:$0xff]  ;;  %v3115_v37 = vpack.c.bf16 %v517_v30, %v511_v29 }
 0x101   :  { %3284 = vmatpush1.bf16.msra.mxu1 %v3283_v35  ;;  %v513_v35 = vld [vmem:[#allocation5 + $0xa90] sm:$0xff]  ;;  %v3117_v40 = vpack.c.bf16 %v530_v33, %v524_v32  ;;  %v584_v30 = vld [vmem:[#allocation5 + $0xcc8] sm:$0xff]  ;;  %v3325_v32 = vpack.c.bf16 %v580_v24, %v574_v23  ;;  %v627_v24 = vld [vmem:[#allocation5 + $0xe20] sm:$0xff] }
 0x102   :  { %3286 = vmatprep.subr.bf16.mxu1 %v3285_v38  ;;  %v526_v38 = vld [vmem:[#allocation5 + $0xaf8] sm:$0xff]  ;;  %v3307_v43 = vpack.c.bf16 %v519_v36, %v513_v35  ;;  %v573_v33 = vld [vmem:[#allocation5 + $0xc70] sm:$0xff]  ;;  %v3135_v35 = vpack.c.bf16 %v577_v27, %v571_v26  ;;  %v640_v27 = vld [vmem:[#allocation5 + $0xe88] sm:$0xff] }
 0x103   :  { %3096 = vmatpush1.bf16.msra.mxu0 %v3095_v41  ;;  %v523_v41 = vld [vmem:[#allocation5 + $0xae0] sm:$0xff]  ;;  %v3309_v46 = vpack.c.bf16 %v532_v39, %v526_v38  ;;  %v586_v36 = vld [vmem:[#allocation5 + $0xcd8] sm:$0xff]  ;;  %v621_v23 = vld [vmem:[#allocation5 + $0xdf0] sm:$0xff] }
 0x104   :  { %3098 = vmatprep.subr.bf16.mxu0 %v3097_v44  ;;  %v536_v44 = vld [vmem:[#allocation5 + $0xb48] sm:$0xff]  ;;  %v3119_v49 = vpack.c.bf16 %v529_v42, %v523_v41  ;;  %v159_v38 = vld [vmem:[#allocation2 + $0x40] sm:$0xff]  ;;  %v589_v41 = vld [vmem:[#allocation5 + $0xcf0] sm:$0xff] }
 0x105   :  { %3288 = vmatpush1.bf16.msra.mxu1 %v3287_v47  ;;  %v525_v47 = vld [vmem:[#allocation5 + $0xaf0] sm:$0xff]  ;;  %v3121_v52 = vpack.c.bf16 %v542_v45, %v536_v44  ;;  %v166_v42 = vld [vmem:[#allocation2 + $0x78] sm:$0xff]  ;;  %v596_v44 = vld [vmem:[#allocation5 + $0xd28] sm:$0xff] }
 0x106   :  { %3290 = vmatprep.subr.bf16.mxu1 %v3289_v50  ;;  %v538_v50 = vld [vmem:[#allocation5 + $0xb58] sm:$0xff]  ;;  %v3311_v55 = vpack.c.bf16 %v531_v48, %v525_v47  ;;  %v585_v47 = vld [vmem:[#allocation5 + $0xcd0] sm:$0xff]  ;;  %v591_v48 = vld [vmem:[#allocation5 + $0xd00] sm:$0xff] }
 0x107   :  { %3100 = vmatpush1.bf16.msra.mxu0 %v3099_v53  ;;  %v535_v53 = vld [vmem:[#allocation5 + $0xb40] sm:$0xff]  ;;  %v3313_v58 = vpack.c.bf16 %v544_v51, %v538_v50  ;;  %v602_v45 = vld [vmem:[#allocation5 + $0xd58] sm:$0xff]  ;;  %v604_v51 = vld [vmem:[#allocation5 + $0xd68] sm:$0xff] }
 0x108   :  { %3102 = vmatprep.subr.bf16.mxu0 %v3101_v56  ;;  %v548_v56 = vld [vmem:[#allocation5 + $0xba8] sm:$0xff]  ;;  %v3123_v61 = vpack.c.bf16 %v541_v54, %v535_v53  ;;  %v598_v50 = vld [vmem:[#allocation5 + $0xd38] sm:$0xff]  ;;  %v3141_v53 = vpack.c.bf16 %v602_v45, %v596_v44  ;;  %v595_v54 = vld [vmem:[#allocation5 + $0xd20] sm:$0xff] }
 0x109   :  { %3292 = vmatpush1.bf16.msra.mxu1 %v3291_v59  ;;  %v537_v59 = vld [vmem:[#allocation5 + $0xb50] sm:$0xff]  ;;  %v3125_v0 = vpack.c.bf16 %v554_v57, %v548_v56  ;;  %v172_v56 = vld [vmem:[#allocation2 + $0xa8] sm:$0xff]  ;;  %v3331_v57 = vpack.c.bf16 %v591_v48, %v585_v47  ;;  %v634_v26 = vld [vmem:[#allocation5 + $0xe58] sm:$0xff] }
 0x10a   :  { %3294 = vmatprep.subr.bf16.mxu1 %v3293_v62  ;;  %v550_v62 = vld [vmem:[#allocation5 + $0xbb8] sm:$0xff]  ;;  %v3315_v3 = vpack.c.bf16 %v543_v60, %v537_v59  ;;  %v3333_v60 = vpack.c.bf16 %v604_v51, %v598_v50  ;;  %v656_v44 = vld [vmem:[#allocation5 + $0xf08] sm:$0xff]  ;;  %v645_v47 = vld [vmem:[#allocation5 + $0xeb0] sm:$0xff] }
 0x10b   :  { %3104 = vmatpush1.bf16.msra.mxu0 %v3103_v1  ;;  %v547_v1 = vld [vmem:[#allocation5 + $0xba0] sm:$0xff]  ;;  %v3317_v6 = vpack.c.bf16 %v556_v63, %v550_v62  ;;  %v614_v59 = vld [vmem:[#allocation5 + $0xdb8] sm:$0xff]  ;;  %v664_v51 = vld [vmem:[#allocation5 + $0xf48] sm:$0xff] }
 0x10c   :  { %3106 = vmatprep.subr.bf16.mxu0 %v3105_v4  ;;  %v560_v4 = vld [vmem:[#allocation5 + $0xc08] sm:$0xff]  ;;  %v3127_v9 = vpack.c.bf16 %v553_v2, %v547_v1  ;;  %v603_v62 = vld [vmem:[#allocation5 + $0xd60] sm:$0xff]  ;;  %v662_v45 = vld [vmem:[#allocation5 + $0xf38] sm:$0xff] }
 0x10d   :  { %3296 = vmatpush1.bf16.msra.mxu1 %v3295_v7  ;;  %v549_v7 = vld [vmem:[#allocation5 + $0xbb0] sm:$0xff]  ;;  %v3129_v12 = vpack.c.bf16 %v566_v5, %v560_v4  ;;  %v616_v1 = vld [vmem:[#allocation5 + $0xdc8] sm:$0xff]  ;;  %v171_v2 = vld [vmem:[#allocation2 + $0xa0] sm:$0xff] }
 0x10e   :  { %3298 = vmatprep.subr.bf16.mxu1 %v3297_v10  ;;  %v562_v10 = vld [vmem:[#allocation5 + $0xc18] sm:$0xff]  ;;  %v3319_v15 = vpack.c.bf16 %v555_v8, %v549_v7  ;;  %v607_v4 = vld [vmem:[#allocation5 + $0xd80] sm:$0xff]  ;;  %v613_v5 = vld [vmem:[#allocation5 + $0xdb0] sm:$0xff] }
 0x10f   :  { %3108 = vmatpush1.bf16.msra.mxu0 %v3107_v13  ;;  %v559_v13 = vld [vmem:[#allocation5 + $0xc00] sm:$0xff]  ;;  %v3321_v18 = vpack.c.bf16 %v568_v11, %v562_v10  ;;  %v620_v8 = vld [vmem:[#allocation5 + $0xde8] sm:$0xff]  ;;  %v609_v11 = vld [vmem:[#allocation5 + $0xd90] sm:$0xff] }
 0x110   :  { %3110 = vmatprep.subr.bf16.mxu0 %v3109_v16  ;;  %v572_v16 = vld [vmem:[#allocation5 + $0xc68] sm:$0xff]  ;;  %v651_v48 = vld [vmem:[#allocation5 + $0xee0] sm:$0xff]  ;;  %v658_v50 = vld [vmem:[#allocation5 + $0xf18] sm:$0xff] }
 0x111   :  { %3300 = vmatpush1.bf16.msra.mxu1 %v3299_v19  ;;  %v561_v19 = vld [vmem:[#allocation5 + $0xc10] sm:$0xff] }
 0x112   :  { %3302 = vmatprep.subr.bf16.mxu1 %v3301_v22  ;;  %v3131_v22 = vpack.c.bf16 %v565_v14, %v559_v13  ;;  %v3323_v29 = vpack.c.bf16 %v567_v20, %v561_v19  ;;  %v3147_v13 = vpack.c.bf16 %v613_v5, %v607_v4  ;;  %v622_v14 = vld [vmem:[#allocation5 + $0xdf8] sm:$0xff]  ;;  %v632_v20 = vld [vmem:[#allocation5 + $0xe48] sm:$0xff] }
 0x113   :  { %3112 = vmatpush1.bf16.msra.mxu0 %v3111_v25  ;;  %v3133_v25 = vpack.c.bf16 %v578_v17, %v572_v16  ;;  %v619_v17 = vld [vmem:[#allocation5 + $0xde0] sm:$0xff]  ;;  %v680_v4 = vld [vmem:[#allocation5 + $0xfc8] sm:$0xff]  ;;  %v686_v5 = vld [vmem:[#allocation5 + $0xff8] sm:$0xff] }
 0x114   :  { %3114 = vmatprep.subr.bf16.mxu0 %v3113_v28  ;;  %v160_v28 = vld [vmem:[#allocation2 + $0x48] sm:$0xff] }
 0x115   :  { %3304 = vmatpush1.bf16.msra.mxu1 %v3303_v31  ;;  %v590_v31 = vld [vmem:[#allocation5 + $0xcf8] sm:$0xff] }
 0x116   :  { %3306 = vmatprep.subr.bf16.mxu1 %v3305_v34  ;;  %v579_v34 = vld [vmem:[#allocation5 + $0xca0] sm:$0xff]  ;;  %v3137_v39 = vpack.c.bf16 %v590_v31, %v584_v30  ;;  %v637_v30 = vld [vmem:[#allocation5 + $0xe70] sm:$0xff]  ;;  %v3343_v31 = vpack.c.bf16 %v627_v24, %v621_v23  ;;  %v700_v23 = vld [vmem:[#allocation5 + $0x1068] sm:$0xff] }
 0x117   :  { %3116 = vmatpush1.bf16.msra.mxu0 %v3115_v37  ;;  %v592_v37 = vld [vmem:[#allocation5 + $0xd08] sm:$0xff] }
 0x118   :  { %3118 = vmatprep.subr.bf16.mxu0 %v3117_v40  ;;  %v583_v40 = vld [vmem:[#allocation5 + $0xcc0] sm:$0xff] }
 0x119   :  { %3308 = vmatpush1.bf16.msra.mxu1 %v3307_v43  ;;  %v3327_v43 = vpack.c.bf16 %v579_v34, %v573_v33  ;;  %v650_v33 = vld [vmem:[#allocation5 + $0xed8] sm:$0xff]  ;;  %v3345_v34 = vpack.c.bf16 %v640_v27, %v634_v26  ;;  %v697_v26 = vld [vmem:[#allocation5 + $0x1050] sm:$0xff] }
 0x11a   :  { %3310 = vmatprep.subr.bf16.mxu1 %v3309_v46  ;;  %v3329_v46 = vpack.c.bf16 %v592_v37, %v586_v36  ;;  %v639_v36 = vld [vmem:[#allocation5 + $0xe80] sm:$0xff] }
 0x11b   :  { %3120 = vmatpush1.bf16.msra.mxu0 %v3119_v49  ;;  %v3139_v49 = vpack.c.bf16 %v589_v41, %v583_v40  ;;  %v643_v41 = vld [vmem:[#allocation5 + $0xea0] sm:$0xff] }
 0x11c   :  { %3122 = vmatprep.subr.bf16.mxu0 %v3121_v52  ;;  %v165_v52 = vld [vmem:[#allocation2 + $0x70] sm:$0xff] }
 0x11d   :  { %3312 = vmatpush1.bf16.msra.mxu1 %v3311_v55  ;;  %v601_v55 = vld [vmem:[#allocation5 + $0xd50] sm:$0xff] }
 0x11e   :  { %3314 = vmatprep.subr.bf16.mxu1 %v3313_v58  ;;  %v608_v58 = vld [vmem:[#allocation5 + $0xd88] sm:$0xff]  ;;  %v3143_v63 = vpack.c.bf16 %v601_v55, %v595_v54  ;;  %v661_v54 = vld [vmem:[#allocation5 + $0xf30] sm:$0xff]  ;;  %v3351_v55 = vpack.c.bf16 %v651_v48, %v645_v47 }
 0x11f   :  { %3124 = vmatpush1.bf16.msra.mxu0 %v3123_v61  ;;  %v597_v61 = vld [vmem:[#allocation5 + $0xd30] sm:$0xff]  ;;  %v724_v47 = vld [vmem:[#allocation5 + $0x1128] sm:$0xff] }
 0x120   :  { %3126 = vmatprep.subr.bf16.mxu0 %v3125_v0  ;;  %v610_v0 = vld [vmem:[#allocation5 + $0xd98] sm:$0xff]  ;;  %v3335_v7 = vpack.c.bf16 %v603_v62, %v597_v61 }
 0x121   :  { %3316 = vmatpush1.bf16.msra.mxu1 %v3315_v3  ;;  %v3145_v3 = vpack.c.bf16 %v614_v59, %v608_v58  ;;  %v3337_v10 = vpack.c.bf16 %v616_v1, %v610_v0  ;;  %v3353_v58 = vpack.c.bf16 %v664_v51, %v658_v50  ;;  %v657_v59 = vld [vmem:[#allocation5 + $0xf10] sm:$0xff]  ;;  %v670_v62 = vld [vmem:[#allocation5 + $0xf78] sm:$0xff]  ;;  %v667_v1 = vld [vmem:[#allocation5 + $0xf60] sm:$0xff] }
 0x122   :  { %3318 = vmatprep.subr.bf16.mxu1 %v3317_v6  ;;  %v156_v6 = vld [vmem:[#allocation2 + $0x28] sm:$0xff]  ;;  %v721_v50 = vld [vmem:[#allocation5 + $0x1110] sm:$0xff] }
 0x123   :  { %3128 = vmatpush1.bf16.msra.mxu0 %v3127_v9  ;;  %v626_v9 = vld [vmem:[#allocation5 + $0xe18] sm:$0xff] }
 0x124   :  { %3130 = vmatprep.subr.bf16.mxu0 %v3129_v12  ;;  %v615_v12 = vld [vmem:[#allocation5 + $0xdc0] sm:$0xff]  ;;  %v3149_v16 = vpack.c.bf16 %v626_v9, %v620_v8 }
 0x125   :  { %3320 = vmatpush1.bf16.msra.mxu1 %v3319_v15  ;;  %v628_v15 = vld [vmem:[#allocation5 + $0xe28] sm:$0xff]  ;;  %v3339_v19 = vpack.c.bf16 %v615_v12, %v609_v11  ;;  %v675_v8 = vld [vmem:[#allocation5 + $0xfa0] sm:$0xff]  ;;  %v3169_v12 = vpack.c.bf16 %v686_v5, %v680_v4 }
 0x126   :  { %937 = vmatmul.mubr.f32.vlgmr.msra.gmra.mrb[0].mxu0 %v153_v21  ;;  %3322 = vmatprep.subr.bf16.mxu1 %v3321_v18  ;;  %v625_v18 = vld [vmem:[#allocation5 + $0xe10] sm:$0xff]  ;;  %v688_v11 = vld [vmem:[#allocation5 + $0x1008] sm:$0xff]  ;;  %v735_v4 = vld [vmem:[#allocation5 + $0x1180] sm:$0xff] }
 0x127   :  { %3132 = vmatpush1.bf16.msra.mxu0 %v3131_v22  ;;  %942 = vmatprep.mubr.f32.mxu0 %v160_v28  ;;  %v3341_v22 = vpack.c.bf16 %v628_v15, %v622_v14  ;;  %v685_v14 = vld [vmem:[#allocation5 + $0xff0] sm:$0xff] }
 0x128   :  { %3134 = vmatprep.subr.bf16.mxu0 %v3133_v25  ;;  %1204 = vmatmul.mubr.f32.vlgmr.msra.gmra.mrb[0].mxu1 %v153_v21  ;;  %v638_v21 = vld [vmem:[#allocation5 + $0xe78] sm:$0xff]  ;;  %v3151_v25 = vpack.c.bf16 %v625_v18, %v619_v17 }
 0x129   :  { %3324 = vmatpush1.bf16.msra.mxu1 %v3323_v29  ;;  %1209 = vmatprep.mubr.f32.mxu1 %v160_v28  ;;  %v3153_v28 = vpack.c.bf16 %v638_v21, %v632_v20  ;;  %v631_v29 = vld [vmem:[#allocation5 + $0xe40] sm:$0xff]  ;;  %v698_v17 = vld [vmem:[#allocation5 + $0x1058] sm:$0xff] }
 0x12a   :  { %3326 = vmatprep.subr.bf16.mxu1 %v3325_v32  ;;  %943 = vmatmul.mubr.f32.gmra.mrb[2].mxu0 %v159_v38  ;;  %v644_v32 = vld [vmem:[#allocation5 + $0xea8] sm:$0xff]  ;;  %v3155_v37 = vpack.c.bf16 %v637_v30, %v631_v29  ;;  %v687_v20 = vld [vmem:[#allocation5 + $0x1000] sm:$0xff]  ;;  %v710_v29 = vld [vmem:[#allocation5 + $0x10b8] sm:$0xff] }
 0x12b   :  { %3136 = vmatpush1.bf16.msra.mxu0 %v3135_v35  ;;  %948 = vmatprep.mubr.f32.mxu0 %v166_v42  ;;  %v633_v35 = vld [vmem:[#allocation5 + $0xe50] sm:$0xff]  ;;  %v3157_v40 = vpack.c.bf16 %v650_v33, %v644_v32  ;;  %v699_v32 = vld [vmem:[#allocation5 + $0x1060] sm:$0xff] }
 0x12c   :  { %3138 = vmatprep.subr.bf16.mxu0 %v3137_v39  ;;  %1210 = vmatmul.mubr.f32.gmra.mrb[2].mxu1 %v159_v38  ;;  %v646_v38 = vld [vmem:[#allocation5 + $0xeb8] sm:$0xff]  ;;  %v652_v39 = vld [vmem:[#allocation5 + $0xee8] sm:$0xff] }
 0x12d   :  { %3328 = vmatpush1.bf16.msra.mxu1 %v3327_v43  ;;  %1215 = vmatprep.mubr.f32.mxu1 %v166_v42  ;;  %v649_v42 = vld [vmem:[#allocation5 + $0xed0] sm:$0xff]  ;;  %v3347_v43 = vpack.c.bf16 %v639_v36, %v633_v35  ;;  %v712_v35 = vld [vmem:[#allocation5 + $0x10c8] sm:$0xff] }
 0x12e   :  { %3330 = vmatprep.subr.bf16.mxu1 %v3329_v46  ;;  %949 = vmatmul.mubr.f32.gmra.mrb[4].mxu0 %v165_v52  ;;  %v3349_v46 = vpack.c.bf16 %v652_v39, %v646_v38  ;;  %v709_v38 = vld [vmem:[#allocation5 + $0x10b0] sm:$0xff] }
 0x12f   :  { %3140 = vmatpush1.bf16.msra.mxu0 %v3139_v49  ;;  %954 = vmatprep.mubr.f32.mxu0 %v172_v56  ;;  %v3159_v49 = vpack.c.bf16 %v649_v42, %v643_v41  ;;  %v722_v41 = vld [vmem:[#allocation5 + $0x1118] sm:$0xff] }
 0x130   :  { %3142 = vmatprep.subr.bf16.mxu0 %v3141_v53  ;;  %1216 = vmatmul.mubr.f32.gmra.mrb[4].mxu1 %v165_v52  ;;  %v3161_v52 = vpack.c.bf16 %v662_v45, %v656_v44  ;;  %v655_v53 = vld [vmem:[#allocation5 + $0xf00] sm:$0xff] }
 0x131   :  { %3332 = vmatpush1.bf16.msra.mxu1 %v3331_v57  ;;  %1221 = vmatprep.mubr.f32.mxu1 %v172_v56  ;;  %v668_v56 = vld [vmem:[#allocation5 + $0xf68] sm:$0xff]  ;;  %v674_v57 = vld [vmem:[#allocation5 + $0xf98] sm:$0xff]  ;;  %v3163_v61 = vpack.c.bf16 %v661_v54, %v655_v53  ;;  %v711_v44 = vld [vmem:[#allocation5 + $0x10c0] sm:$0xff] }
 0x132   :  { %3334 = vmatprep.subr.bf16.mxu1 %v3333_v60  ;;  %955 = vmatmul.mubr.f32.gmra.mrb[6].mxu0 %v171_v2  ;;  %v663_v60 = vld [vmem:[#allocation5 + $0xf40] sm:$0xff]  ;;  %v3165_v0 = vpack.c.bf16 %v674_v57, %v668_v56  ;;  %v734_v53 = vld [vmem:[#allocation5 + $0x1178] sm:$0xff] }
 0x133   :  { %3144 = vmatpush1.bf16.msra.mxu0 %v3143_v63  ;;  %1025 = vmatprep.mubr.f32.mxu0 %v156_v6  ;;  %v676_v63 = vld [vmem:[#allocation5 + $0xfa8] sm:$0xff]  ;;  %v723_v56 = vld [vmem:[#allocation5 + $0x1120] sm:$0xff] }
 0x134   :  { %3146 = vmatprep.subr.bf16.mxu0 %v3145_v3  ;;  %1222 = vmatmul.mubr.f32.gmra.mrb[6].mxu1 %v171_v2  ;;  %v673_v2 = vld [vmem:[#allocation5 + $0xf90] sm:$0xff]  ;;  %v3355_v3 = vpack.c.bf16 %v663_v60, %v657_v59  ;;  %v736_v59 = vld [vmem:[#allocation5 + $0x1188] sm:$0xff] }
 0x135   :  { %3336 = vmatpush1.bf16.msra.mxu1 %v3335_v7  ;;  %1292 = vmatprep.mubr.f32.mxu1 %v156_v6  ;;  %v3357_v6 = vpack.c.bf16 %v676_v63, %v670_v62  ;;  %v669_v7 = vld [vmem:[#allocation5 + $0xf70] sm:$0xff]  ;;  %v3167_v9 = vpack.c.bf16 %v673_v2, %v667_v1  ;;  %v746_v1 = vld [vmem:[#allocation5 + $0x11d8] sm:$0xff] }
 0x136   :  { %3338 = vmatprep.subr.bf16.mxu1 %v3337_v10  ;;  %v682_v10 = vld [vmem:[#allocation5 + $0xfd8] sm:$0xff]  ;;  %v3359_v15 = vpack.c.bf16 %v675_v8, %v669_v7  ;;  %v733_v62 = vld [vmem:[#allocation5 + $0x1170] sm:$0xff]  ;;  %v748_v7 = vld [vmem:[#allocation5 + $0x11e8] sm:$0xff] }
 0x137   :  { %3148 = vmatpush1.bf16.msra.mxu0 %v3147_v13  ;;  %v679_v13 = vld [vmem:[#allocation5 + $0xfc0] sm:$0xff]  ;;  %v3361_v18 = vpack.c.bf16 %v688_v11, %v682_v10  ;;  %v745_v10 = vld [vmem:[#allocation5 + $0x11d0] sm:$0xff] }
 0x138   :  { %3150 = vmatprep.subr.bf16.mxu0 %v3149_v16  ;;  %v692_v16 = vld [vmem:[#allocation5 + $0x1028] sm:$0xff]  ;;  %v3171_v21 = vpack.c.bf16 %v685_v14, %v679_v13  ;;  %v186_v13 = vld [vmem:[#allocation5 + $0x58] sm:$0xff] }
 0x139   :  { %3340 = vmatpush1.bf16.msra.mxu1 %v3339_v19  ;;  %v681_v19 = vld [vmem:[#allocation5 + $0xfd0] sm:$0xff]  ;;  %v3173_v24 = vpack.c.bf16 %v698_v17, %v692_v16  ;;  %v747_v16 = vld [vmem:[#allocation5 + $0x11e0] sm:$0xff] }
 0x13a   :  { %3342 = vmatprep.subr.bf16.mxu1 %v3341_v22  ;;  %v694_v22 = vld [vmem:[#allocation5 + $0x1038] sm:$0xff]  ;;  %v3363_v27 = vpack.c.bf16 %v687_v20, %v681_v19  ;;  %v179_v19 = vld [vmem:[#allocation5 + $0x20] sm:$0xff]  ;;  %v185_v20 = vld [vmem:[#allocation5 + $0x50] sm:$0xff] }
 0x13b   :  { %3152 = vmatpush1.bf16.msra.mxu0 %v3151_v25  ;;  %v691_v25 = vld [vmem:[#allocation5 + $0x1020] sm:$0xff]  ;;  %v3365_v30 = vpack.c.bf16 %v700_v23, %v694_v22  ;;  %v192_v22 = vld [vmem:[#allocation5 + $0x88] sm:$0xff]  ;;  %v198_v23 = vld [vmem:[#allocation5 + $0xb8] sm:$0xff] }
 0x13c   :  { %3154 = vmatprep.subr.bf16.mxu0 %v3153_v28  ;;  %v704_v28 = vld [vmem:[#allocation5 + $0x1088] sm:$0xff]  ;;  %v3175_v33 = vpack.c.bf16 %v697_v26, %v691_v25  ;;  %v3387_v25 = vpack.c.bf16 %v185_v20, %v179_v19  ;;  %v4358_v26 = vld [vmem:[#allocation2 + $0x58] sm:$0xff]  ;;  %v293_v19 = vld [vmem:[#allocation5 + $0x3b0] sm:$0xff] }
 0x13d   :  { %3344 = vmatpush1.bf16.msra.mxu1 %v3343_v31  ;;  %v693_v31 = vld [vmem:[#allocation5 + $0x1030] sm:$0xff]  ;;  %v3177_v36 = vpack.c.bf16 %v710_v29, %v704_v28  ;;  %v191_v28 = vld [vmem:[#allocation5 + $0x80] sm:$0xff]  ;;  %v300_v20 = vld [vmem:[#allocation5 + $0x3e8] sm:$0xff] }
 0x13e   :  { %3346 = vmatprep.subr.bf16.mxu1 %v3345_v34  ;;  %v706_v34 = vld [vmem:[#allocation5 + $0x1098] sm:$0xff]  ;;  %v3367_v39 = vpack.c.bf16 %v699_v32, %v693_v31  ;;  %v197_v29 = vld [vmem:[#allocation5 + $0xb0] sm:$0xff] }
 0x13f   :  { %3156 = vmatpush1.bf16.msra.mxu0 %v3155_v37  ;;  %v703_v37 = vld [vmem:[#allocation5 + $0x1080] sm:$0xff]  ;;  %v3369_v42 = vpack.c.bf16 %v712_v35, %v706_v34  ;;  %v210_v31 = vld [vmem:[#allocation5 + $0x118] sm:$0xff]  ;;  %v4362_v32 = vld [vmem:[#allocation2 + $0x50] sm:$0xff] }
 0x140   :  { %3158 = vmatprep.subr.bf16.mxu0 %v3157_v40  ;;  %v716_v40 = vld [vmem:[#allocation5 + $0x10e8] sm:$0xff]  ;;  %v3179_v45 = vpack.c.bf16 %v709_v38, %v703_v37  ;;  %v209_v37 = vld [vmem:[#allocation5 + $0x110] sm:$0xff] }
 0x141   :  { %3348 = vmatpush1.bf16.msra.mxu1 %v3347_v43  ;;  %v705_v43 = vld [vmem:[#allocation5 + $0x1090] sm:$0xff]  ;;  %v3181_v48 = vpack.c.bf16 %v722_v41, %v716_v40  ;;  %v4365_v34 = vld [vmem:[#allocation2 + $0x88] sm:$0xff]  ;;  %v4370_v40 = vld [vmem:[#allocation2 + $0x80] sm:$0xff] }
 0x142   :  { %3350 = vmatprep.subr.bf16.mxu1 %v3349_v46  ;;  %v718_v46 = vld [vmem:[#allocation5 + $0x10f8] sm:$0xff]  ;;  %v3371_v51 = vpack.c.bf16 %v711_v44, %v705_v43  ;;  %v216_v38 = vld [vmem:[#allocation5 + $0x148] sm:$0xff]  ;;  %v215_v44 = vld [vmem:[#allocation5 + $0x140] sm:$0xff] }
 0x143   :  { %3160 = vmatpush1.bf16.msra.mxu0 %v3159_v49  ;;  %v715_v49 = vld [vmem:[#allocation5 + $0x10e0] sm:$0xff]  ;;  %v3373_v54 = vpack.c.bf16 %v724_v47, %v718_v46  ;;  %v228_v46 = vld [vmem:[#allocation5 + $0x1a8] sm:$0xff]  ;;  %v234_v47 = vld [vmem:[#allocation5 + $0x1d8] sm:$0xff] }
 0x144   :  { %3162 = vmatprep.subr.bf16.mxu0 %v3161_v52  ;;  %v728_v52 = vld [vmem:[#allocation5 + $0x1148] sm:$0xff]  ;;  %v3183_v57 = vpack.c.bf16 %v721_v50, %v715_v49  ;;  %v3401_v50 = vpack.c.bf16 %v234_v47, %v228_v46 }
 0x145   :  { %3352 = vmatpush1.bf16.msra.mxu1 %v3351_v55  ;;  %v717_v55 = vld [vmem:[#allocation5 + $0x10f0] sm:$0xff]  ;;  %v3185_v60 = vpack.c.bf16 %v734_v53, %v728_v52  ;;  %v240_v53 = vld [vmem:[#allocation5 + $0x208] sm:$0xff] }
 0x146   :  { %3354 = vmatprep.subr.bf16.mxu1 %v3353_v58  ;;  %v730_v58 = vld [vmem:[#allocation5 + $0x1158] sm:$0xff]  ;;  %v3375_v63 = vpack.c.bf16 %v723_v56, %v717_v55  ;;  %v233_v52 = vld [vmem:[#allocation5 + $0x1d0] sm:$0xff]  ;;  %v3887_v56 = vld [vmem:[#allocation2 + $0x8] sm:$0xff] }
 0x147   :  { %3164 = vmatpush1.bf16.msra.mxu0 %v3163_v61  ;;  %v727_v61 = vld [vmem:[#allocation5 + $0x1140] sm:$0xff]  ;;  %v3377_v2 = vpack.c.bf16 %v736_v59, %v730_v58  ;;  %v245_v59 = vld [vmem:[#allocation5 + $0x230] sm:$0xff] }
 0x148   :  { %3166 = vmatprep.subr.bf16.mxu0 %v3165_v0  ;;  %v740_v0 = vld [vmem:[#allocation5 + $0x11a8] sm:$0xff]  ;;  %v3187_v5 = vpack.c.bf16 %v733_v62, %v727_v61  ;;  %v239_v58 = vld [vmem:[#allocation5 + $0x200] sm:$0xff]  ;;  %v258_v61 = vld [vmem:[#allocation5 + $0x298] sm:$0xff] }
 0x149   :  { %3356 = vmatpush1.bf16.msra.mxu1 %v3355_v3  ;;  %v729_v3 = vld [vmem:[#allocation5 + $0x1150] sm:$0xff]  ;;  %v3189_v8 = vpack.c.bf16 %v746_v1, %v740_v0  ;;  %v3407_v62 = vpack.c.bf16 %v245_v59, %v239_v58  ;;  %v251_v0 = vld [vmem:[#allocation5 + $0x260] sm:$0xff]  ;;  %v366_v58 = vld [vmem:[#allocation5 + $0x5f8] sm:$0xff] }
 0x14a   :  { %3358 = vmatprep.subr.bf16.mxu1 %v3357_v6  ;;  %v742_v6 = vld [vmem:[#allocation5 + $0x11b8] sm:$0xff]  ;;  %v3379_v11 = vpack.c.bf16 %v735_v4, %v729_v3  ;;  %v257_v1 = vld [vmem:[#allocation5 + $0x290] sm:$0xff] }
 0x14b   :  { %3168 = vmatpush1.bf16.msra.mxu0 %v3167_v9  ;;  %v739_v9 = vld [vmem:[#allocation5 + $0x11a0] sm:$0xff]  ;;  %v3381_v14 = vpack.c.bf16 %v748_v7, %v742_v6  ;;  %v270_v3 = vld [vmem:[#allocation5 + $0x2f8] sm:$0xff]  ;;  %v3411_v4 = vpack.c.bf16 %v257_v1, %v251_v0  ;;  %v269_v7 = vld [vmem:[#allocation5 + $0x2f0] sm:$0xff] }
 0x14c   :  { %3170 = vmatprep.subr.bf16.mxu0 %v3169_v12  ;;  %v180_v12 = vld [vmem:[#allocation5 + $0x28] sm:$0xff]  ;;  %v3191_v17 = vpack.c.bf16 %v745_v10, %v739_v9  ;;  %v263_v6 = vld [vmem:[#allocation5 + $0x2c0] sm:$0xff]  ;;  %v282_v9 = vld [vmem:[#allocation5 + $0x358] sm:$0xff] }
 0x14d   :  { %3360 = vmatpush1.bf16.msra.mxu1 %v3359_v15  ;;  %v741_v15 = vld [vmem:[#allocation5 + $0x11b0] sm:$0xff]  ;;  %v3415_v10 = vpack.c.bf16 %v269_v7, %v263_v6  ;;  %v378_v0 = vld [vmem:[#allocation5 + $0x658] sm:$0xff] }
 0x14e   :  { %3362 = vmatprep.subr.bf16.mxu1 %v3361_v18  ;;  %v3385_v18 = vpack.c.bf16 %v186_v13, %v180_v12  ;;  %v275_v12 = vld [vmem:[#allocation5 + $0x320] sm:$0xff]  ;;  %v281_v13 = vld [vmem:[#allocation5 + $0x350] sm:$0xff]  ;;  %v390_v6 = vld [vmem:[#allocation5 + $0x6b8] sm:$0xff] }
 0x14f   :  { %3172 = vmatpush1.bf16.msra.mxu0 %v3171_v21  ;;  %v3383_v21 = vpack.c.bf16 %v747_v16, %v741_v15  ;;  %v294_v15 = vld [vmem:[#allocation5 + $0x3b8] sm:$0xff]  ;;  %v3419_v16 = vpack.c.bf16 %v281_v13, %v275_v12  ;;  %v3888_v13 = vld [vmem:[#allocation2] sm:$0xff] }
 0x150   :  { %3174 = vmatprep.subr.bf16.mxu0 %v3173_v24  ;;  %v4356_v24 = vld [vmem:[#allocation2 + $0x20] sm:$0xff]  ;;  %v402_v12 = vld [vmem:[#allocation5 + $0x718] sm:$0xff] }
 0x151   :  { %3364 = vmatpush1.bf16.msra.mxu1 %v3363_v27  ;;  %v3389_v27 = vpack.c.bf16 %v198_v23, %v192_v22 }
 0x152   :  { %3366 = vmatprep.subr.bf16.mxu1 %v3365_v30  ;;  %v204_v30 = vld [vmem:[#allocation5 + $0xe8] sm:$0xff] }
 0x153   :  { %3176 = vmatpush1.bf16.msra.mxu0 %v3175_v33  ;;  %v3391_v33 = vpack.c.bf16 %v197_v29, %v191_v28  ;;  %v3393_v35 = vpack.c.bf16 %v210_v31, %v204_v30  ;;  %v312_v28 = vld [vmem:[#allocation5 + $0x448] sm:$0xff]  ;;  %v318_v29 = vld [vmem:[#allocation5 + $0x478] sm:$0xff] }
 0x154   :  { %3178 = vmatprep.subr.bf16.mxu0 %v3177_v36  ;;  %v203_v36 = vld [vmem:[#allocation5 + $0xe0] sm:$0xff]  ;;  %v3429_v31 = vpack.c.bf16 %v318_v29, %v312_v28  ;;  %v413_v28 = vld [vmem:[#allocation5 + $0x770] sm:$0xff]  ;;  %v420_v29 = vld [vmem:[#allocation5 + $0x7a8] sm:$0xff] }
 0x155   :  { %3368 = vmatpush1.bf16.msra.mxu1 %v3367_v39  ;;  %v222_v39 = vld [vmem:[#allocation5 + $0x178] sm:$0xff]  ;;  %v3395_v41 = vpack.c.bf16 %v209_v37, %v203_v36  ;;  %v324_v36 = vld [vmem:[#allocation5 + $0x4a8] sm:$0xff] }
 0x156   :  { %3370 = vmatprep.subr.bf16.mxu1 %v3369_v42  ;;  %v4373_v42 = vld [vmem:[#allocation2 + $0xb8] sm:$0xff]  ;;  %v3397_v43 = vpack.c.bf16 %v222_v39, %v216_v38 }
 0x157   :  { %3180 = vmatpush1.bf16.msra.mxu0 %v3179_v45  ;;  %v221_v45 = vld [vmem:[#allocation5 + $0x170] sm:$0xff]  ;;  %v330_v37 = vld [vmem:[#allocation5 + $0x4d8] sm:$0xff] }
 0x158   :  { %3182 = vmatprep.subr.bf16.mxu0 %v3181_v48  ;;  %v4378_v48 = vld [vmem:[#allocation2 + $0xb0] sm:$0xff]  ;;  %v3399_v49 = vpack.c.bf16 %v221_v45, %v215_v44  ;;  %v3433_v39 = vpack.c.bf16 %v330_v37, %v324_v36  ;;  %v336_v44 = vld [vmem:[#allocation5 + $0x508] sm:$0xff]  ;;  %v342_v45 = vld [vmem:[#allocation5 + $0x538] sm:$0xff] }
 0x159   :  { %3372 = vmatpush1.bf16.msra.mxu1 %v3371_v51  ;;  %v227_v51 = vld [vmem:[#allocation5 + $0x1a0] sm:$0xff]  ;;  %v3437_v47 = vpack.c.bf16 %v342_v45, %v336_v44  ;;  %v3895_v45 = vld [vmem:[#allocation2 + $0x18] sm:$0xff] }
 0x15a   :  { %3374 = vmatprep.subr.bf16.mxu1 %v3373_v54  ;;  %v246_v54 = vld [vmem:[#allocation5 + $0x238] sm:$0xff]  ;;  %v3403_v55 = vpack.c.bf16 %v233_v52, %v227_v51  ;;  %v348_v51 = vld [vmem:[#allocation5 + $0x568] sm:$0xff]  ;;  %v419_v37 = vld [vmem:[#allocation5 + $0x7a0] sm:$0xff] }
 0x15b   :  { %3184 = vmatpush1.bf16.msra.mxu0 %v3183_v57  ;;  %v3405_v57 = vpack.c.bf16 %v246_v54, %v240_v53  ;;  %v354_v52 = vld [vmem:[#allocation5 + $0x598] sm:$0xff] }
 0x15c   :  { %3186 = vmatprep.subr.bf16.mxu0 %v3185_v60  ;;  %v252_v60 = vld [vmem:[#allocation5 + $0x268] sm:$0xff]  ;;  %v3441_v54 = vpack.c.bf16 %v354_v52, %v348_v51  ;;  %v450_v51 = vld [vmem:[#allocation5 + $0x898] sm:$0xff] }
 0x15d   :  { %3376 = vmatpush1.bf16.msra.mxu1 %v3375_v63  ;;  %v3409_v63 = vpack.c.bf16 %v258_v61, %v252_v60  ;;  %v359_v61 = vld [vmem:[#allocation5 + $0x5c0] sm:$0xff] }
 0x15e   :  { %3378 = vmatprep.subr.bf16.mxu1 %v3377_v2  ;;  %v264_v2 = vld [vmem:[#allocation5 + $0x2c8] sm:$0xff] }
 0x15f   :  { %3188 = vmatpush1.bf16.msra.mxu0 %v3187_v5  ;;  %v3413_v5 = vpack.c.bf16 %v270_v3, %v264_v2  ;;  %v371_v3 = vld [vmem:[#allocation5 + $0x620] sm:$0xff] }
 0x160   :  { %3190 = vmatprep.subr.bf16.mxu0 %v3189_v8  ;;  %v276_v8 = vld [vmem:[#allocation5 + $0x328] sm:$0xff] }
 0x161   :  { %3380 = vmatpush1.bf16.msra.mxu1 %v3379_v11  ;;  %v3417_v11 = vpack.c.bf16 %v282_v9, %v276_v8  ;;  %v383_v9 = vld [vmem:[#allocation5 + $0x680] sm:$0xff] }
 0x162   :  { %3382 = vmatprep.subr.bf16.mxu1 %v3381_v14  ;;  %v288_v14 = vld [vmem:[#allocation5 + $0x388] sm:$0xff] }
 0x163   :  { %3192 = vmatpush1.bf16.msra.mxu0 %v3191_v17  ;;  %v3421_v17 = vpack.c.bf16 %v294_v15, %v288_v14  ;;  %v3889_v15 = vld [vmem:[#allocation2 + $0x38] sm:$0xff] }
 0x164   :  { %3386 = vmatprep.subr.bf16.mxu0 %v3385_v18  ;;  %v287_v18 = vld [vmem:[#allocation5 + $0x380] sm:$0xff] }
 0x165   :  { %3384 = vmatpush1.bf16.msra.mxu1 %v3383_v21  ;;  %v306_v21 = vld [vmem:[#allocation5 + $0x418] sm:$0xff]  ;;  %v3423_v22 = vpack.c.bf16 %v293_v19, %v287_v18  ;;  %v401_v18 = vld [vmem:[#allocation5 + $0x710] sm:$0xff]  ;;  %v408_v19 = vld [vmem:[#allocation5 + $0x748] sm:$0xff] }
 0x166   :  { %1026 = vmatmul.mubr.f32.vlgmr.msra.gmra.mrb[0].mxu0 %v4356_v24  ;;  %v3425_v23 = vpack.c.bf16 %v306_v21, %v300_v20  ;;  %v414_v20 = vld [vmem:[#allocation5 + $0x778] sm:$0xff]  ;;  %v3890_v21 = vld [vmem:[#allocation2 + $0x30] sm:$0xff] }
 0x167   :  { %3388 = vmatpush1.bf16.msra.mxu0 %v3387_v25  ;;  %1031 = vmatprep.mubr.f32.mxu0 %v4358_v26  ;;  %v299_v25 = vld [vmem:[#allocation5 + $0x3e0] sm:$0xff] }
 0x168   :  { %1293 = vmatmul.mubr.f32.vlgmr.msra.gmra.mrb[0].mxu1 %v4356_v24  ;;  %3390 = vmatprep.subr.bf16.mxu0 %v3389_v27  ;;  %v305_v27 = vld [vmem:[#allocation5 + $0x410] sm:$0xff] }
 0x169   :  { %1298 = vmatprep.mubr.f32.mxu1 %v4358_v26  ;;  %v3427_v30 = vpack.c.bf16 %v305_v27, %v299_v25  ;;  %v3461_v25 = vpack.c.bf16 %v414_v20, %v408_v19  ;;  %v407_v27 = vld [vmem:[#allocation5 + $0x740] sm:$0xff] }
 0x16a   :  { %1032 = vmatmul.mubr.f32.gmra.mrb[2].mxu0 %v4362_v32  ;;  %v503_v20 = vld [vmem:[#allocation5 + $0xa40] sm:$0xff] }
 0x16b   :  { %3392 = vmatpush1.bf16.msra.mxu0 %v3391_v33  ;;  %1037 = vmatprep.mubr.f32.mxu0 %v4365_v34  ;;  %v311_v33 = vld [vmem:[#allocation5 + $0x440] sm:$0xff] }
 0x16c   :  { %1299 = vmatmul.mubr.f32.gmra.mrb[2].mxu1 %v4362_v32  ;;  %3394 = vmatprep.subr.bf16.mxu0 %v3393_v35  ;;  %v317_v35 = vld [vmem:[#allocation5 + $0x470] sm:$0xff] }
 0x16d   :  { %1304 = vmatprep.mubr.f32.mxu1 %v4365_v34  ;;  %v3431_v38 = vpack.c.bf16 %v317_v35, %v311_v33  ;;  %v3463_v33 = vpack.c.bf16 %v413_v28, %v407_v27  ;;  %v3893_v35 = vld [vmem:[#allocation2 + $0x98] sm:$0xff]  ;;  %v515_v28 = vld [vmem:[#allocation5 + $0xaa0] sm:$0xff] }
 0x16e   :  { %1038 = vmatmul.mubr.f32.gmra.mrb[4].mxu0 %v4370_v40 }
 0x16f   :  { %3396 = vmatpush1.bf16.msra.mxu0 %v3395_v41  ;;  %1043 = vmatprep.mubr.f32.mxu0 %v4373_v42  ;;  %v323_v41 = vld [vmem:[#allocation5 + $0x4a0] sm:$0xff] }
 0x170   :  { %1305 = vmatmul.mubr.f32.gmra.mrb[4].mxu1 %v4370_v40  ;;  %3398 = vmatprep.subr.bf16.mxu0 %v3397_v43  ;;  %v329_v43 = vld [vmem:[#allocation5 + $0x4d0] sm:$0xff] }
 0x171   :  { %1310 = vmatprep.mubr.f32.mxu1 %v4373_v42  ;;  %v3435_v46 = vpack.c.bf16 %v329_v43, %v323_v41  ;;  %v438_v41 = vld [vmem:[#allocation5 + $0x838] sm:$0xff]  ;;  %v3894_v43 = vld [vmem:[#allocation2 + $0x90] sm:$0xff] }
 0x172   :  { %1044 = vmatmul.mubr.f32.gmra.mrb[6].mxu0 %v4378_v48 }
 0x173   :  { %3400 = vmatpush1.bf16.msra.mxu0 %v3399_v49  ;;  %1381 = vmatprep.mubr.f32.mxu0 %v3887_v56  ;;  %v335_v49 = vld [vmem:[#allocation5 + $0x500] sm:$0xff]  ;;  %v353_v56 = vld [vmem:[#allocation5 + $0x590] sm:$0xff] }
 0x174   :  { %1311 = vmatmul.mubr.f32.gmra.mrb[6].mxu1 %v4378_v48  ;;  %3402 = vmatprep.subr.bf16.mxu0 %v3401_v50  ;;  %v341_v50 = vld [vmem:[#allocation5 + $0x530] sm:$0xff] }
 0x175   :  { %v3439_v53 = vpack.c.bf16 %v341_v50, %v335_v49  ;;  %v437_v49 = vld [vmem:[#allocation5 + $0x830] sm:$0xff]  ;;  %v444_v50 = vld [vmem:[#allocation5 + $0x868] sm:$0xff] }
 0x177   :  { %3404 = vmatpush1.bf16.msra.mxu0 %v3403_v55  ;;  %v347_v55 = vld [vmem:[#allocation5 + $0x560] sm:$0xff] }
 0x178   :  { %3406 = vmatprep.subr.bf16.mxu0 %v3405_v57  ;;  %v360_v57 = vld [vmem:[#allocation5 + $0x5c8] sm:$0xff]  ;;  %v3443_v59 = vpack.c.bf16 %v353_v56, %v347_v55  ;;  %v449_v55 = vld [vmem:[#allocation5 + $0x890] sm:$0xff] }
 0x179   :  { %v3445_v60 = vpack.c.bf16 %v366_v58, %v360_v57  ;;  %v456_v56 = vld [vmem:[#allocation5 + $0x8c8] sm:$0xff]  ;;  %v462_v57 = vld [vmem:[#allocation5 + $0x8f8] sm:$0xff] }
 0x17b   :  { %3408 = vmatpush1.bf16.msra.mxu0 %v3407_v62  ;;  %v365_v62 = vld [vmem:[#allocation5 + $0x5f0] sm:$0xff] }
 0x17c   :  { %3410 = vmatprep.subr.bf16.mxu0 %v3409_v63  ;;  %v372_v63 = vld [vmem:[#allocation5 + $0x628] sm:$0xff]  ;;  %v3447_v1 = vpack.c.bf16 %v365_v62, %v359_v61  ;;  %v461_v61 = vld [vmem:[#allocation5 + $0x8f0] sm:$0xff] }
 0x17d   :  { %v3449_v2 = vpack.c.bf16 %v378_v0, %v372_v63  ;;  %v468_v62 = vld [vmem:[#allocation5 + $0x928] sm:$0xff]  ;;  %v474_v63 = vld [vmem:[#allocation5 + $0x958] sm:$0xff] }
 0x17f   :  { %3412 = vmatpush1.bf16.msra.mxu0 %v3411_v4  ;;  %v377_v4 = vld [vmem:[#allocation5 + $0x650] sm:$0xff] }
 0x180   :  { %3414 = vmatprep.subr.bf16.mxu0 %v3413_v5  ;;  %v384_v5 = vld [vmem:[#allocation5 + $0x688] sm:$0xff]  ;;  %v3451_v7 = vpack.c.bf16 %v377_v4, %v371_v3  ;;  %v473_v3 = vld [vmem:[#allocation5 + $0x950] sm:$0xff] }
 0x181   :  { %v3453_v8 = vpack.c.bf16 %v390_v6, %v384_v5  ;;  %v480_v4 = vld [vmem:[#allocation5 + $0x988] sm:$0xff]  ;;  %v486_v5 = vld [vmem:[#allocation5 + $0x9b8] sm:$0xff] }
 0x183   :  { %3416 = vmatpush1.bf16.msra.mxu0 %v3415_v10  ;;  %v389_v10 = vld [vmem:[#allocation5 + $0x6b0] sm:$0xff] }
 0x184   :  { %3418 = vmatprep.subr.bf16.mxu0 %v3417_v11  ;;  %v396_v11 = vld [vmem:[#allocation5 + $0x6e8] sm:$0xff]  ;;  %v3455_v14 = vpack.c.bf16 %v389_v10, %v383_v9  ;;  %v485_v9 = vld [vmem:[#allocation5 + $0x9b0] sm:$0xff] }
 0x185   :  { %v492_v10 = vld [vmem:[#allocation5 + $0x9e8] sm:$0xff] }
 0x187   :  { %3420 = vmatpush1.bf16.msra.mxu0 %v3419_v16  ;;  %v3457_v16 = vpack.c.bf16 %v402_v12, %v396_v11  ;;  %v498_v11 = vld [vmem:[#allocation5 + $0xa18] sm:$0xff] }
 0x188   :  { %3422 = vmatprep.subr.bf16.mxu0 %v3421_v17  ;;  %v395_v17 = vld [vmem:[#allocation5 + $0x6e0] sm:$0xff] }
 0x18b   :  { %3424 = vmatpush1.bf16.msra.mxu0 %v3423_v22  ;;  %v3459_v22 = vpack.c.bf16 %v401_v18, %v395_v17  ;;  %v510_v17 = vld [vmem:[#allocation5 + $0xa78] sm:$0xff] }
 0x18c   :  { %3426 = vmatprep.subr.bf16.mxu0 %v3425_v23  ;;  %v3891_v23 = vld [vmem:[#allocation2 + $0x68] sm:$0xff] }
 0x18f   :  { %3428 = vmatpush1.bf16.msra.mxu0 %v3427_v30  ;;  %v426_v30 = vld [vmem:[#allocation5 + $0x7d8] sm:$0xff] }
 0x190   :  { %3430 = vmatprep.subr.bf16.mxu0 %v3429_v31  ;;  %v3892_v31 = vld [vmem:[#allocation2 + $0x60] sm:$0xff]  ;;  %v3465_v36 = vpack.c.bf16 %v426_v30, %v420_v29  ;;  %v521_v29 = vld [vmem:[#allocation5 + $0xad0] sm:$0xff]  ;;  %v528_v30 = vld [vmem:[#allocation5 + $0xb08] sm:$0xff] }
 0x193   :  { %3432 = vmatpush1.bf16.msra.mxu0 %v3431_v38  ;;  %v425_v38 = vld [vmem:[#allocation5 + $0x7d0] sm:$0xff] }
 0x194   :  { %3434 = vmatprep.subr.bf16.mxu0 %v3433_v39  ;;  %v432_v39 = vld [vmem:[#allocation5 + $0x808] sm:$0xff]  ;;  %v3467_v44 = vpack.c.bf16 %v425_v38, %v419_v37  ;;  %v533_v37 = vld [vmem:[#allocation5 + $0xb30] sm:$0xff] }
 0x195   :  { %v540_v38 = vld [vmem:[#allocation5 + $0xb68] sm:$0xff] }
 0x197   :  { %3436 = vmatpush1.bf16.msra.mxu0 %v3435_v46  ;;  %v3469_v46 = vpack.c.bf16 %v438_v41, %v432_v39  ;;  %v546_v39 = vld [vmem:[#allocation5 + $0xb98] sm:$0xff] }
 0x198   :  { %3438 = vmatprep.subr.bf16.mxu0 %v3437_v47  ;;  %v431_v47 = vld [vmem:[#allocation5 + $0x800] sm:$0xff] }
 0x199   :  { %v3471_v52 = vpack.c.bf16 %v437_v49, %v431_v47  ;;  %v558_v47 = vld [vmem:[#allocation5 + $0xbf8] sm:$0xff] }
 0x19b   :  { %3440 = vmatpush1.bf16.msra.mxu0 %v3439_v53  ;;  %v3473_v53 = vpack.c.bf16 %v450_v51, %v444_v50  ;;  %v551_v51 = vld [vmem:[#allocation5 + $0xbc0] sm:$0xff] }
 0x19c   :  { %3442 = vmatprep.subr.bf16.mxu0 %v3441_v54  ;;  %v443_v54 = vld [vmem:[#allocation5 + $0x860] sm:$0xff] }
 0x19d   :  { %v3475_v58 = vpack.c.bf16 %v449_v55, %v443_v54  ;;  %v570_v54 = vld [vmem:[#allocation5 + $0xc58] sm:$0xff] }
 0x19f   :  { %3444 = vmatpush1.bf16.msra.mxu0 %v3443_v59  ;;  %v3477_v59 = vpack.c.bf16 %v462_v57, %v456_v56  ;;  %v563_v57 = vld [vmem:[#allocation5 + $0xc20] sm:$0xff] }
 0x1a0   :  { %3446 = vmatprep.subr.bf16.mxu0 %v3445_v60  ;;  %v455_v60 = vld [vmem:[#allocation5 + $0x8c0] sm:$0xff] }
 0x1a1   :  { %v3479_v0 = vpack.c.bf16 %v461_v61, %v455_v60  ;;  %v582_v60 = vld [vmem:[#allocation5 + $0xcb8] sm:$0xff] }
 0x1a3   :  { %3448 = vmatpush1.bf16.msra.mxu0 %v3447_v1  ;;  %v3481_v1 = vpack.c.bf16 %v474_v63, %v468_v62  ;;  %v575_v63 = vld [vmem:[#allocation5 + $0xc80] sm:$0xff] }
 0x1a4   :  { %3450 = vmatprep.subr.bf16.mxu0 %v3449_v2  ;;  %v467_v2 = vld [vmem:[#allocation5 + $0x920] sm:$0xff] }
 0x1a5   :  { %v3483_v6 = vpack.c.bf16 %v473_v3, %v467_v2  ;;  %v594_v2 = vld [vmem:[#allocation5 + $0xd18] sm:$0xff]  ;;  %v3896_v3 = vld [vmem:[#allocation2 + $0x10] sm:$0xff] }
 0x1a6   :  { %1382 = vmatmul.mubr.f32.vlgmr.msra.gmra.mrb[8].mxu0 %v3888_v13  ;;  %v3489_v13 = vpack.c.bf16 %v498_v11, %v492_v10  ;;  %v606_v10 = vld [vmem:[#allocation5 + $0xd78] sm:$0xff]  ;;  %v3898_v11 = vld [vmem:[#allocation2 + $0x40] sm:$0xff] }
 0x1a7   :  { %3452 = vmatpush1.bf16.msra.mxu0 %v3451_v7  ;;  %1387 = vmatprep.mubr.f32.mxu0 %v3889_v15  ;;  %v3485_v7 = vpack.c.bf16 %v486_v5, %v480_v4  ;;  %v497_v15 = vld [vmem:[#allocation5 + $0xa10] sm:$0xff]  ;;  %v3897_v5 = vld [vmem:[#allocation2 + $0x48] sm:$0xff] }
 0x1a8   :  { %3454 = vmatprep.subr.bf16.mxu0 %v3453_v8  ;;  %v479_v8 = vld [vmem:[#allocation5 + $0x980] sm:$0xff] }
 0x1a9   :  { %v3487_v12 = vpack.c.bf16 %v485_v9, %v479_v8  ;;  %v593_v8 = vld [vmem:[#allocation5 + $0xd10] sm:$0xff]  ;;  %v600_v9 = vld [vmem:[#allocation5 + $0xd48] sm:$0xff] }
 0x1aa   :  { %1388 = vmatmul.mubr.f32.gmra.mrb[10].mxu0 %v3890_v21  ;;  %v509_v21 = vld [vmem:[#allocation5 + $0xa70] sm:$0xff] }
 0x1ab   :  { %3456 = vmatpush1.bf16.msra.mxu0 %v3455_v14  ;;  %1393 = vmatprep.mubr.f32.mxu0 %v3891_v23  ;;  %v491_v14 = vld [vmem:[#allocation5 + $0x9e0] sm:$0xff]  ;;  %v522_v23 = vld [vmem:[#allocation5 + $0xad8] sm:$0xff] }
 0x1ac   :  { %3458 = vmatprep.subr.bf16.mxu0 %v3457_v16  ;;  %v504_v16 = vld [vmem:[#allocation5 + $0xa48] sm:$0xff]  ;;  %v3491_v18 = vpack.c.bf16 %v497_v15, %v491_v14  ;;  %v3525_v14 = vpack.c.bf16 %v606_v10, %v600_v9  ;;  %v599_v15 = vld [vmem:[#allocation5 + $0xd40] sm:$0xff] }
 0x1ad   :  { %v3493_v19 = vpack.c.bf16 %v510_v17, %v504_v16  ;;  %v605_v16 = vld [vmem:[#allocation5 + $0xd70] sm:$0xff]  ;;  %v612_v17 = vld [vmem:[#allocation5 + $0xda8] sm:$0xff]  ;;  %v695_v10 = vld [vmem:[#allocation5 + $0x1040] sm:$0xff] }
 0x1ae   :  { %1394 = vmatmul.mubr.f32.gmra.mrb[12].mxu0 %v3892_v31  ;;  %v534_v31 = vld [vmem:[#allocation5 + $0xb38] sm:$0xff] }
 0x1af   :  { %3460 = vmatpush1.bf16.msra.mxu0 %v3459_v22  ;;  %1399 = vmatprep.mubr.f32.mxu0 %v3893_v35  ;;  %v516_v22 = vld [vmem:[#allocation5 + $0xaa8] sm:$0xff]  ;;  %v3501_v35 = vpack.c.bf16 %v534_v31, %v528_v30 }
 0x1b0   :  { %3462 = vmatprep.subr.bf16.mxu0 %v3461_v25  ;;  %v3495_v25 = vpack.c.bf16 %v509_v21, %v503_v20  ;;  %v3497_v27 = vpack.c.bf16 %v522_v23, %v516_v22  ;;  %v3527_v20 = vpack.c.bf16 %v605_v16, %v599_v15  ;;  %v3901_v21 = vld [vmem:[#allocation2 + $0xa8] sm:$0xff]  ;;  %v611_v23 = vld [vmem:[#allocation5 + $0xda0] sm:$0xff] }
 0x1b1   :  { %v3903_v31 = vld [vmem:[#allocation2 + $0x28] sm:$0xff]  ;;  %v707_v16 = vld [vmem:[#allocation5 + $0x10a0] sm:$0xff] }
 0x1b2   :  { %1400 = vmatmul.mubr.f32.gmra.mrb[14].mxu0 %v3894_v43  ;;  %v3505_v43 = vpack.c.bf16 %v546_v39, %v540_v38  ;;  %v642_v38 = vld [vmem:[#allocation5 + $0xe98] sm:$0xff] }
 0x1b3   :  { %3464 = vmatpush1.bf16.msra.mxu0 %v3463_v33  ;;  %1470 = vmatprep.mubr.f32.mxu0 %v3895_v45  ;;  %v3499_v33 = vpack.c.bf16 %v521_v29, %v515_v28  ;;  %v545_v45 = vld [vmem:[#allocation5 + $0xb90] sm:$0xff]  ;;  %v630_v28 = vld [vmem:[#allocation5 + $0xe38] sm:$0xff]  ;;  %v3902_v29 = vld [vmem:[#allocation2 + $0xa0] sm:$0xff] }
 0x1b4   :  { %3466 = vmatprep.subr.bf16.mxu0 %v3465_v36  ;;  %v527_v36 = vld [vmem:[#allocation5 + $0xb00] sm:$0xff] }
 0x1b5   :  { %v3503_v41 = vpack.c.bf16 %v533_v37, %v527_v36  ;;  %v629_v36 = vld [vmem:[#allocation5 + $0xe30] sm:$0xff]  ;;  %v636_v37 = vld [vmem:[#allocation5 + $0xe68] sm:$0xff] }
 0x1b7   :  { %3468 = vmatpush1.bf16.msra.mxu0 %v3467_v44  ;;  %v539_v44 = vld [vmem:[#allocation5 + $0xb60] sm:$0xff] }
 0x1b8   :  { %3470 = vmatprep.subr.bf16.mxu0 %v3469_v46  ;;  %v552_v46 = vld [vmem:[#allocation5 + $0xbc8] sm:$0xff]  ;;  %v3507_v49 = vpack.c.bf16 %v545_v45, %v539_v44  ;;  %v641_v44 = vld [vmem:[#allocation5 + $0xe90] sm:$0xff] }
 0x1b9   :  { %v3509_v50 = vpack.c.bf16 %v558_v47, %v552_v46  ;;  %v648_v45 = vld [vmem:[#allocation5 + $0xec8] sm:$0xff]  ;;  %v654_v46 = vld [vmem:[#allocation5 + $0xef8] sm:$0xff] }
 0x1bb   :  { %3472 = vmatpush1.bf16.msra.mxu0 %v3471_v52  ;;  %v557_v52 = vld [vmem:[#allocation5 + $0xbf0] sm:$0xff] }
 0x1bc   :  { %3474 = vmatprep.subr.bf16.mxu0 %v3473_v53  ;;  %v564_v53 = vld [vmem:[#allocation5 + $0xc28] sm:$0xff]  ;;  %v3511_v55 = vpack.c.bf16 %v557_v52, %v551_v51  ;;  %v653_v51 = vld [vmem:[#allocation5 + $0xef0] sm:$0xff] }
 0x1bd   :  { %v3513_v56 = vpack.c.bf16 %v570_v54, %v564_v53  ;;  %v660_v52 = vld [vmem:[#allocation5 + $0xf28] sm:$0xff]  ;;  %v666_v53 = vld [vmem:[#allocation5 + $0xf58] sm:$0xff] }
 0x1bf   :  { %3476 = vmatpush1.bf16.msra.mxu0 %v3475_v58  ;;  %v569_v58 = vld [vmem:[#allocation5 + $0xc50] sm:$0xff] }
 0x1c0   :  { %3478 = vmatprep.subr.bf16.mxu0 %v3477_v59  ;;  %v576_v59 = vld [vmem:[#allocation5 + $0xc88] sm:$0xff]  ;;  %v3515_v61 = vpack.c.bf16 %v569_v58, %v563_v57  ;;  %v665_v57 = vld [vmem:[#allocation5 + $0xf50] sm:$0xff] }
 0x1c1   :  { %v3517_v62 = vpack.c.bf16 %v582_v60, %v576_v59  ;;  %v672_v58 = vld [vmem:[#allocation5 + $0xf88] sm:$0xff]  ;;  %v678_v59 = vld [vmem:[#allocation5 + $0xfb8] sm:$0xff] }
 0x1c3   :  { %3480 = vmatpush1.bf16.msra.mxu0 %v3479_v0  ;;  %v581_v0 = vld [vmem:[#allocation5 + $0xcb0] sm:$0xff] }
 0x1c4   :  { %3482 = vmatprep.subr.bf16.mxu0 %v3481_v1  ;;  %v588_v1 = vld [vmem:[#allocation5 + $0xce8] sm:$0xff]  ;;  %v3519_v4 = vpack.c.bf16 %v581_v0, %v575_v63  ;;  %v677_v63 = vld [vmem:[#allocation5 + $0xfb0] sm:$0xff] }
 0x1c5   :  { %v684_v0 = vld [vmem:[#allocation5 + $0xfe8] sm:$0xff] }
 0x1c7   :  { %3484 = vmatpush1.bf16.msra.mxu0 %v3483_v6  ;;  %v3521_v6 = vpack.c.bf16 %v594_v2, %v588_v1  ;;  %v690_v1 = vld [vmem:[#allocation5 + $0x1018] sm:$0xff] }
 0x1c8   :  { %3486 = vmatprep.subr.bf16.mxu0 %v3485_v7  ;;  %v587_v7 = vld [vmem:[#allocation5 + $0xce0] sm:$0xff] }
 0x1cb   :  { %3488 = vmatpush1.bf16.msra.mxu0 %v3487_v12  ;;  %v3523_v12 = vpack.c.bf16 %v593_v8, %v587_v7  ;;  %v702_v7 = vld [vmem:[#allocation5 + $0x1078] sm:$0xff] }
 0x1cc   :  { %3490 = vmatprep.subr.bf16.mxu0 %v3489_v13  ;;  %v3899_v13 = vld [vmem:[#allocation2 + $0x78] sm:$0xff] }
 0x1cf   :  { %3492 = vmatpush1.bf16.msra.mxu0 %v3491_v18  ;;  %v618_v18 = vld [vmem:[#allocation5 + $0xdd8] sm:$0xff] }
 0x1d0   :  { %3494 = vmatprep.subr.bf16.mxu0 %v3493_v19  ;;  %v3900_v19 = vld [vmem:[#allocation2 + $0x70] sm:$0xff]  ;;  %v3529_v22 = vpack.c.bf16 %v618_v18, %v612_v17  ;;  %v720_v18 = vld [vmem:[#allocation5 + $0x1108] sm:$0xff] }
 0x1d1   :  { %v713_v17 = vld [vmem:[#allocation5 + $0x10d0] sm:$0xff] }
 0x1d3   :  { %3496 = vmatpush1.bf16.msra.mxu0 %v3495_v25  ;;  %v617_v25 = vld [vmem:[#allocation5 + $0xdd0] sm:$0xff] }
 0x1d4   :  { %3498 = vmatprep.subr.bf16.mxu0 %v3497_v27  ;;  %v624_v27 = vld [vmem:[#allocation5 + $0xe08] sm:$0xff]  ;;  %v3531_v30 = vpack.c.bf16 %v617_v25, %v611_v23  ;;  %v725_v23 = vld [vmem:[#allocation5 + $0x1130] sm:$0xff] }
 0x1d5   :  { %v732_v25 = vld [vmem:[#allocation5 + $0x1168] sm:$0xff] }
 0x1d7   :  { %3500 = vmatpush1.bf16.msra.mxu0 %v3499_v33  ;;  %v3533_v33 = vpack.c.bf16 %v630_v28, %v624_v27  ;;  %v738_v27 = vld [vmem:[#allocation5 + $0x1198] sm:$0xff] }
 0x1d8   :  { %3502 = vmatprep.subr.bf16.mxu0 %v3501_v35  ;;  %v623_v35 = vld [vmem:[#allocation5 + $0xe00] sm:$0xff] }
 0x1d9   :  { %v3535_v39 = vpack.c.bf16 %v629_v36, %v623_v35  ;;  %v750_v35 = vld [vmem:[#allocation5 + $0x11f8] sm:$0xff] }
 0x1db   :  { %3504 = vmatpush1.bf16.msra.mxu0 %v3503_v41  ;;  %v3537_v41 = vpack.c.bf16 %v642_v38, %v636_v37  ;;  %v743_v38 = vld [vmem:[#allocation5 + $0x11c0] sm:$0xff] }
 0x1dc   :  { %3506 = vmatprep.subr.bf16.mxu0 %v3505_v43  ;;  %v635_v43 = vld [vmem:[#allocation5 + $0xe60] sm:$0xff] }
 0x1dd   :  { %v3539_v47 = vpack.c.bf16 %v641_v44, %v635_v43 }
 0x1df   :  { %3508 = vmatpush1.bf16.msra.mxu0 %v3507_v49  ;;  %v3541_v49 = vpack.c.bf16 %v654_v46, %v648_v45 }
 0x1e0   :  { %3510 = vmatprep.subr.bf16.mxu0 %v3509_v50  ;;  %v647_v50 = vld [vmem:[#allocation5 + $0xec0] sm:$0xff] }
 0x1e1   :  { %v3543_v54 = vpack.c.bf16 %v653_v51, %v647_v50 }
 0x1e3   :  { %3512 = vmatpush1.bf16.msra.mxu0 %v3511_v55  ;;  %v3545_v55 = vpack.c.bf16 %v666_v53, %v660_v52 }
 0x1e4   :  { %3514 = vmatprep.subr.bf16.mxu0 %v3513_v56  ;;  %v659_v56 = vld [vmem:[#allocation5 + $0xf20] sm:$0xff] }
 0x1e5   :  { %v3547_v60 = vpack.c.bf16 %v665_v57, %v659_v56  ;;  %v751_v57 = vld [vmem:[#allocation7] sm:$0x3f] }
 0x1e6   :  { %1471 = vmatmul.mubr.f32.vlgmr.msra.gmra.mrb[8].mxu0 %v3896_v3  ;;  %v3553_v3 = vpack.c.bf16 %v690_v1, %v684_v0 }
 0x1e7   :  { %3516 = vmatpush1.bf16.msra.mxu0 %v3515_v61  ;;  %1476 = vmatprep.mubr.f32.mxu0 %v3897_v5  ;;  %v3549_v61 = vpack.c.bf16 %v678_v59, %v672_v58  ;;  %v689_v5 = vld [vmem:[#allocation5 + $0x1010] sm:$0xff] }
 0x1e8   :  { %3518 = vmatprep.subr.bf16.mxu0 %v3517_v62  ;;  %v671_v62 = vld [vmem:[#allocation5 + $0xf80] sm:$0xff] }
 0x1e9   :  { %v3551_v2 = vpack.c.bf16 %v677_v63, %v671_v62 }
 0x1ea   :  { %1477 = vmatmul.mubr.f32.gmra.mrb[10].mxu0 %v3898_v11  ;;  %v701_v11 = vld [vmem:[#allocation5 + $0x1070] sm:$0xff] }
 0x1eb   :  { %3520 = vmatpush1.bf16.msra.mxu0 %v3519_v4  ;;  %1482 = vmatprep.mubr.f32.mxu0 %v3899_v13  ;;  %v683_v4 = vld [vmem:[#allocation5 + $0xfe0] sm:$0xff]  ;;  %v714_v13 = vld [vmem:[#allocation5 + $0x10d8] sm:$0xff] }
 0x1ec   :  { %3522 = vmatprep.subr.bf16.mxu0 %v3521_v6  ;;  %v696_v6 = vld [vmem:[#allocation5 + $0x1048] sm:$0xff]  ;;  %v3555_v8 = vpack.c.bf16 %v689_v5, %v683_v4 }
 0x1ed   :  { %v3557_v9 = vpack.c.bf16 %v702_v7, %v696_v6 }
 0x1ee   :  { %1483 = vmatmul.mubr.f32.gmra.mrb[12].mxu0 %v3900_v19  ;;  %v726_v19 = vld [vmem:[#allocation5 + $0x1138] sm:$0xff] }
 0x1ef   :  { %3524 = vmatpush1.bf16.msra.mxu0 %v3523_v12  ;;  %1488 = vmatprep.mubr.f32.mxu0 %v3901_v21  ;;  %v708_v12 = vld [vmem:[#allocation5 + $0x10a8] sm:$0xff]  ;;  %v3565_v21 = vpack.c.bf16 %v726_v19, %v720_v18 }
 0x1f0   :  { %3526 = vmatprep.subr.bf16.mxu0 %v3525_v14  ;;  %v3559_v14 = vpack.c.bf16 %v701_v11, %v695_v10  ;;  %v3561_v15 = vpack.c.bf16 %v714_v13, %v708_v12 }
 0x1f2   :  { %1489 = vmatmul.mubr.f32.gmra.mrb[14].mxu0 %v3902_v29  ;;  %v3569_v29 = vpack.c.bf16 %v738_v27, %v732_v25 }
 0x1f3   :  { %3528 = vmatpush1.bf16.msra.mxu0 %v3527_v20  ;;  %1559 = vmatprep.mubr.f32.mxu0 %v3903_v31  ;;  %v3563_v20 = vpack.c.bf16 %v713_v17, %v707_v16  ;;  %v737_v31 = vld [vmem:[#allocation5 + $0x1190] sm:$0xff] }
 0x1f4   :  { %3530 = vmatprep.subr.bf16.mxu0 %v3529_v22  ;;  %v719_v22 = vld [vmem:[#allocation5 + $0x1100] sm:$0xff] }
 0x1f5   :  { %v3567_v28 = vpack.c.bf16 %v725_v23, %v719_v22 }
 0x1f7   :  { %3532 = vmatpush1.bf16.msra.mxu0 %v3531_v30  ;;  %v731_v30 = vld [vmem:[#allocation5 + $0x1160] sm:$0xff] }
 0x1f8   :  { %3534 = vmatprep.subr.bf16.mxu0 %v3533_v33  ;;  %v744_v33 = vld [vmem:[#allocation5 + $0x11c8] sm:$0xff]  ;;  %v3571_v36 = vpack.c.bf16 %v737_v31, %v731_v30 }
 0x1f9   :  { %v3573_v37 = vpack.c.bf16 %v750_v35, %v744_v33 }
 0x1fb   :  { %3536 = vmatpush1.bf16.msra.mxu0 %v3535_v39  ;;  %v749_v39 = vld [vmem:[#allocation5 + $0x11f0] sm:$0xff] }
 0x1fc   :  { %3538 = vmatprep.subr.bf16.mxu0 %v3537_v41  ;;  %v3575_v41 = vpack.c.bf16 %v749_v39, %v743_v38 }
 0x1ff   :  { %3540 = vmatpush1.bf16.msra.mxu0 %v3539_v47 }
 0x200   :  { %3542 = vmatprep.subr.bf16.mxu0 %v3541_v49 }
 0x203   :  { %3544 = vmatpush1.bf16.msra.mxu0 %v3543_v54 }
 0x204   :  { %3546 = vmatprep.subr.bf16.mxu0 %v3545_v55  ;;  %v753_v55 = vlaneseq }
 0x207   :  { %3548 = vmatpush1.bf16.msra.mxu0 %v3547_v60 }
 0x208   :  { %3550 = vmatprep.subr.bf16.mxu0 %v3549_v61 }
 0x20b   :  { %3552 = vmatpush1.bf16.msra.mxu0 %v3551_v2 }
 0x20c   :  { %3554 = vmatprep.subr.bf16.mxu0 %v3553_v3 }
 0x20f   :  { %3556 = vmatpush1.bf16.msra.mxu0 %v3555_v8 }
 0x210   :  { %3558 = vmatprep.subr.bf16.mxu0 %v3557_v9 }
 0x213   :  { %3560 = vmatpush1.bf16.msra.mxu0 %v3559_v14 }
 0x214   :  { %3562 = vmatprep.subr.bf16.mxu0 %v3561_v15 }
 0x217   :  { %3564 = vmatpush1.bf16.msra.mxu0 %v3563_v20 }
 0x218   :  { %3566 = vmatprep.subr.bf16.mxu0 %v3565_v21 }
 0x21b   :  { %3568 = vmatpush1.bf16.msra.mxu0 %v3567_v28 }
 0x21c   :  { %3570 = vmatprep.subr.bf16.mxu0 %v3569_v29 }
 0x21f   :  { %3572 = vmatpush1.bf16.msra.mxu0 %v3571_v36 }
 0x220   :  { %3574 = vmatprep.subr.bf16.mxu0 %v3573_v37 }
 0x223   :  { %3576 = vmatpush1.bf16.msra.mxu0 %v3575_v41 }
 0x226   :  { %1560 = vmatmul.mubr.f32.vlgmr.msra.gmra.mrb[8].mxu0 %v4356_v24 }
 0x227   :  { %1565 = vmatprep.mubr.f32.mxu0 %v4358_v26 }
 0x22a   :  { %1566 = vmatmul.mubr.f32.gmra.mrb[10].mxu0 %v4362_v32 }
 0x22b   :  { %1571 = vmatprep.mubr.f32.mxu0 %v4365_v34 }
 0x22e   :  { %1572 = vmatmul.mubr.f32.gmra.mrb[12].mxu0 %v4370_v40 }
 0x22f   :  { %1577 = vmatprep.mubr.f32.mxu0 %v4373_v42  ;;  %v754_v42 = vshrl.u32 %v753_v55, 7 }
 0x231   :  { %v4391_v56 = vsub.s32 0, %v754_v42  ;;  %v4397_v60 = vsub.s32 2, %v754_v42  ;;  %v4404_v0 = vsub.s32 3, %v754_v42  ;;  %v4415_v6 = vsub.s32 4, %v754_v42 }
 0x232   :  { %1578 = vmatmul.mubr.f32.gmra.mrb[14].mxu0 %v4378_v48  ;;  %v4393_v48 = vsub.s32 1, %v754_v42  ;;  %v4417_v7 = vsub.s32 5, %v754_v42 }
 0x233   :  { %v756_v58 = vrot.slane %v751_v57, %v4391_v56  ;;  %v764_v63 = vrot.slane %v751_v57, %v4397_v60  ;;  %v768_v5 = vrot.slane %v751_v57, %v4404_v0  ;;  %v772_v14 = vrot.slane %v751_v57, %v4415_v6 }
 0x234   :  { %v760_v59 = vrot.slane %v751_v57, %v4393_v48  ;;  %v776_v15 = vrot.slane %v751_v57, %v4417_v7 }
 0x239   :  { %v1027_v43 = vpop.f32.mrb[0].mxu0 }
 0x23a   :  { %v1029_v44 = vpop.f32.mrb[1].mxu0  ;;  %v4399_v61 = vadd.f32 %v1027_v43, %v756_v58 }
 0x23b   :  { %v1294_v45 = vpop.f32.mrb[0].mxu1  ;;  %v4401_v62 = vadd.f32 %v1029_v44, %v760_v59 }
 0x23c   :  { %v1296_v46 = vpop.f32.mrb[1].mxu1  ;;  %v4412_v4 = vadd.f32 %v1294_v45, %v764_v63 }
 0x23d   :  { %v1033_v47 = vpop.f32.mrb[2].mxu0  ;;  %v1586_v3 = vadd.f32 %v4401_v62, %v4399_v61  ;;  %v4428_v13 = vadd.f32 %v1296_v46, %v768_v5 }
 0x23e   :  { %v1035_v49 = vpop.f32.mrb[3].mxu0  ;;  %v4406_v1 = vadd.f32 %v1033_v47, %v756_v58 }
 0x23f   :  { %v1300_v50 = vpop.f32.mrb[2].mxu1  ;;  %v4408_v2 = vadd.f32 %v1035_v49, %v760_v59  ;;  %v1587_v12 = vadd.f32 %v4412_v4, %v1586_v3 }
 0x240   :  { %v1302_v24 = vpop.f32.mrb[3].mxu1  ;;  %v4421_v9 = vadd.f32 %v1300_v50, %v764_v63 }
 0x241   :  { %v1039_v51 = vpop.f32.mrb[4].mxu0  ;;  %v1593_v8 = vadd.f32 %v4408_v2, %v4406_v1  ;;  %v4435_v18 = vadd.f32 %v1302_v24, %v768_v5  ;;  %v1588_v21 = vadd.f32 %v4428_v13, %v1587_v12  ;;  %v1884_v12 = vld [vmem:[#allocation11 + $0x98] sm:$0xff] }
 0x242   :  { %v1041_v26 = vpop.f32.mrb[5].mxu0  ;;  %v4423_v10 = vadd.f32 %v1039_v51, %v756_v58 }
 0x243   :  { %v1306_v52 = vpop.f32.mrb[4].mxu1  ;;  %v4425_v11 = vadd.f32 %v1041_v26, %v760_v59  ;;  %v1594_v16 = vadd.f32 %v4421_v9, %v1593_v8  ;;  %v1883_v8 = vld [vmem:[#allocation11 + $0x90] sm:$0xff] }
 0x244   :  { %v1308_v32 = vpop.f32.mrb[5].mxu1  ;;  %v4437_v19 = vadd.f32 %v1306_v52, %v764_v63 }
 0x245   :  { %v1045_v53 = vpop.f32.mrb[6].mxu0  ;;  %v1600_v17 = vadd.f32 %v4425_v11, %v4423_v10  ;;  %v1595_v30 = vadd.f32 %v4435_v18, %v1594_v16  ;;  %v4451_v33 = vadd.f32 %v1308_v32, %v768_v5  ;;  %v3581_v16 = vpack.c.bf16 %v1884_v12, %v1883_v8 }
 0x246   :  { %v1047_v34 = vpop.f32.mrb[7].mxu0  ;;  %v4440_v22 = vadd.f32 %v1045_v53, %v756_v58  ;;  %v1881_v58 = vld [vmem:[#allocation11 + $0x80] sm:$0xff] }
 0x247   :  { %v1312_v54 = vpop.f32.mrb[6].mxu1  ;;  %v4442_v23 = vadd.f32 %v1047_v34, %v760_v59  ;;  %v1601_v31 = vadd.f32 %v4437_v19, %v1600_v17  ;;  %v1882_v59 = vld [vmem:[#allocation11 + $0x88] sm:$0xff]  ;;  %v1867_v17 = vld [vmem:[#allocation11 + $0x10] sm:$0xff] }
 0x248   :  { %v1314_v40 = vpop.f32.mrb[7].mxu1  ;;  %v4455_v37 = vadd.f32 %v1312_v54, %v764_v63  ;;  %v1865_v63 = vld [vmem:[#allocation11] sm:$0xff]  ;;  %v3577_v3 = vpack.c.bf16 %v1882_v59, %v1881_v58 }
 0x249   :  { %v1607_v36 = vadd.f32 %v4442_v23, %v4440_v22  ;;  %v1602_v45 = vadd.f32 %v4451_v33, %v1601_v31  ;;  %v4465_v49 = vadd.f32 %v1314_v40, %v768_v5  ;;  %v1866_v5 = vld [vmem:[#allocation11 + $0x8] sm:$0xff] }
 0x24a   :  { %3578 = vmatprep.subr.bf16.mxu1 %v3577_v3 }
 0x24b   :  { %v1608_v47 = vadd.f32 %v4455_v37, %v1607_v36 }
 0x24d   :  { %v1609_v53 = vadd.f32 %v4465_v49, %v1608_v47 }
 0x2f9   :  { %v1561_v20 = vpop.f32.mrb[8].mxu0 }
 0x2fa   :  { %v4444_v25 = vadd.f32 %v1561_v20, %v772_v14  ;;  %v1563_v27 = vpop.f32.mrb[9].mxu0  ;;  %v1868_v20 = vld [vmem:[#allocation11 + $0x18] sm:$0xff] }
 0x2fb   :  { %v4446_v28 = vadd.f32 %v1563_v27, %v776_v15  ;;  %v3583_v27 = vpack.c.bf16 %v1868_v20, %v1867_v17 }
 0x2fc   :  { %v1589_v29 = vadd.f32 %v4444_v25, %v1588_v21  ;;  %v1885_v21 = vld [vmem:[#allocation11 + $0xa0] sm:$0xff] }
 0x2fd   :  { %v1567_v35 = vpop.f32.mrb[10].mxu0 }
 0x2fe   :  { %v4457_v38 = vadd.f32 %v1567_v35, %v772_v14  ;;  %v1569_v39 = vpop.f32.mrb[11].mxu0  ;;  %v1590_v41 = vadd.f32 %v4446_v28, %v1589_v29 }
 0x2ff   :  { %v4460_v43 = vadd.f32 %v1569_v39, %v776_v15 }
 0x300   :  { %v1596_v44 = vadd.f32 %v4457_v38, %v1595_v30  ;;  %1591 = vadd.xlane.f32.xlu0 %v1590_v41 }
 0x301   :  { %v1573_v46 = vpop.f32.mrb[12].mxu0 }
 0x302   :  { %v4467_v50 = vadd.f32 %v1573_v46, %v772_v14  ;;  %v1575_v24 = vpop.f32.mrb[13].mxu0  ;;  %v1597_v51 = vadd.f32 %v4460_v43, %v1596_v44 }
 0x303   :  { %v4470_v26 = vadd.f32 %v1575_v24, %v776_v15 }
 0x304   :  { %1598 = vadd.xlane.f32.xlu0 %v1597_v51  ;;  %v1603_v52 = vadd.f32 %v4467_v50, %v1602_v45 }
 0x305   :  { %v1579_v32 = vpop.f32.mrb[14].mxu0 }
 0x306   :  { %v4474_v34 = vadd.f32 %v1579_v32, %v772_v14  ;;  %v1581_v54 = vpop.f32.mrb[15].mxu0  ;;  %v1604_v55 = vadd.f32 %v4470_v26, %v1603_v52  ;;  %v3579_v14 = vpack.c.bf16 %v1866_v5, %v1865_v63 }
 0x307   :  { %v4477_v40 = vadd.f32 %v1581_v54, %v776_v15  ;;  %v1886_v15 = vld [vmem:[#allocation11 + $0xa8] sm:$0xff] }
 0x308   :  { %v1610_v42 = vadd.f32 %v4474_v34, %v1609_v53  ;;  %1605 = vadd.xlane.f32.xlu1 %v1604_v55  ;;  %3580 = vmatpush3.bf16.msra.mxu1 %v3579_v14  ;;  %v3585_v29 = vpack.c.bf16 %v1886_v15, %v1885_v21 }
 0x309   :  { %3582 = vmatprep.subr.bf16.mxu1 %v3581_v16 }
 0x30a   :  { %v1611_v57 = vadd.f32 %v4477_v40, %v1610_v42 }
 0x30c   :  { %1612 = vadd.xlane.f32.xlu1 %v1611_v57  ;;  %3584 = vmatpush3.bf16.msra.mxu1 %v3583_v27 }
 0x30d   :  { %3586 = vmatprep.subr.bf16.mxu1 %v3585_v29 }
 0x38d   :  { %v1592_v30 = vpop.xlane.xlu0 %1591 }
 0x38e   :  { %v1615_v31 = vmul.f32 0.0013020834, %v1592_v30 }
 0x390   :  { %v4482_v35 = vsub.f32 %v4399_v61, %v1615_v31  ;;  %v4485_v36 = vsub.f32 %v4401_v62, %v1615_v31  ;;  %v4488_v39 = vsub.f32 %v4412_v4, %v1615_v31  ;;  %v4491_v44 = vsub.f32 %v4428_v13, %v1615_v31 }
 0x391   :  { %v1599_v41 = vpop.xlane.xlu0 %1598  ;;  %v4498_v61 = vsub.f32 %v4444_v25, %v1615_v31  ;;  %v4512_v32 = vsub.f32 %v4446_v28, %v1615_v31 }
 0x392   :  { %v1616_v45 = vmul.f32 0.0013020834, %v1599_v41  ;;  %v1643_v46 = vmul.f32 %v4482_v35, %v4482_v35  ;;  %v1644_v47 = vmul.f32 %v4485_v36, %v4485_v36  ;;  %v1645_v62 = vmul.f32 %v4488_v39, %v4488_v39 }
 0x393   :  { %v1646_v25 = vmul.f32 %v4491_v44, %v4491_v44  ;;  %v1648_v3 = vmul.f32 %v4512_v32, %v4512_v32 }
 0x394   :  { %v1667_v24 = vadd.f32 %v1644_v47, %v1643_v46  ;;  %v4503_v4 = vsub.f32 %v4406_v1, %v1616_v45  ;;  %v4506_v13 = vsub.f32 %v4408_v2, %v1616_v45  ;;  %v4509_v51 = vsub.f32 %v4421_v9, %v1616_v45 }
 0x395   :  { %v1606_v52 = vpop.xlane.xlu1 %1605  ;;  %v4517_v53 = vsub.f32 %v4435_v18, %v1616_v45  ;;  %v1647_v9 = vmul.f32 %v4498_v61, %v4498_v61  ;;  %v4526_v28 = vsub.f32 %v4457_v38, %v1616_v45  ;;  %v4539_v5 = vsub.f32 %v4460_v43, %v1616_v45 }
 0x396   :  { %v1617_v54 = vmul.f32 0.0013020834, %v1606_v52  ;;  %v1668_v55 = vadd.f32 %v1667_v24, %v1645_v62  ;;  %v1649_v1 = vmul.f32 %v4503_v4, %v4503_v4  ;;  %v1650_v2 = vmul.f32 %v4506_v13, %v4506_v13 }
 0x397   :  { %v1651_v42 = vmul.f32 %v4509_v51, %v4509_v51  ;;  %v1652_v38 = vmul.f32 %v4517_v53, %v4517_v53  ;;  %v1653_v16 = vmul.f32 %v4526_v28, %v4526_v28  ;;  %v1654_v31 = vmul.f32 %v4539_v5, %v4539_v5 }
 0x398   :  { %v1669_v57 = vadd.f32 %v1668_v55, %v1646_v25  ;;  %v1674_v18 = vadd.f32 %v1650_v2, %v1649_v1  ;;  %v4531_v58 = vsub.f32 %v4423_v10, %v1617_v54  ;;  %v4534_v59 = vsub.f32 %v4425_v11, %v1617_v54 }
 0x399   :  { %v1613_v63 = vpop.xlane.xlu1 %1612  ;;  %v4544_v8 = vsub.f32 %v4437_v19, %v1617_v54  ;;  %v4551_v17 = vsub.f32 %v4451_v33, %v1617_v54  ;;  %v4556_v19 = vsub.f32 %v4467_v50, %v1617_v54  ;;  %v4572_v50 = vsub.f32 %v4470_v26, %v1617_v54 }
 0x39a   :  { %v1618_v12 = vmul.f32 0.0013020834, %v1613_v63  ;;  %v1670_v14 = vadd.f32 %v1669_v57, %v1647_v9  ;;  %v1675_v10 = vadd.f32 %v1674_v18, %v1651_v42  ;;  %v1655_v11 = vmul.f32 %v4531_v58, %v4531_v58 }
 0x39b   :  { %v1656_v43 = vmul.f32 %v4534_v59, %v4534_v59  ;;  %v1657_v27 = vmul.f32 %v4544_v8, %v4544_v8  ;;  %v1658_v45 = vmul.f32 %v4551_v17, %v4551_v17  ;;  %v1659_v62 = vmul.f32 %v4556_v19, %v4556_v19 }
 0x39c   :  { %v1671_v20 = vadd.f32 %v1670_v14, %v1648_v3  ;;  %v1676_v21 = vadd.f32 %v1675_v10, %v1652_v38  ;;  %v4559_v15 = vsub.f32 %v4440_v22, %v1618_v12  ;;  %v4564_v30 = vsub.f32 %v4442_v23, %v1618_v12  ;;  %v1869_v3 = vld [vmem:[#allocation11 + $0x20] sm:$0xff]  ;;  %v1870_v38 = vld [vmem:[#allocation11 + $0x28] sm:$0xff]  ;;  %v1888_v14 = vld [vmem:[#allocation11 + $0xb8] sm:$0xff] }
 0x39d   :  { %v1681_v29 = vadd.f32 %v1656_v43, %v1655_v11  ;;  %v4567_v33 = vsub.f32 %v4455_v37, %v1618_v12  ;;  %v4579_v23 = vsub.f32 %v4465_v49, %v1618_v12  ;;  %v4586_v26 = vsub.f32 %v4474_v34, %v1618_v12  ;;  %v1871_v11 = vld [vmem:[#allocation11 + $0x30] sm:$0xff] }
 0x39e   :  { %1672 = vadd.xlane.f32.xlu0 %v1671_v20  ;;  %v1677_v41 = vadd.f32 %v1676_v21, %v1653_v16  ;;  %v1661_v22 = vmul.f32 %v4559_v15, %v4559_v15  ;;  %v1662_v37 = vmul.f32 %v4564_v30, %v4564_v30  ;;  %v1660_v49 = vmul.f32 %v4572_v50, %v4572_v50  ;;  %v1872_v16 = vld [vmem:[#allocation11 + $0x38] sm:$0xff]  ;;  %v1889_v20 = vld [vmem:[#allocation11 + $0xc0] sm:$0xff]  ;;  %v1890_v21 = vld [vmem:[#allocation11 + $0xc8] sm:$0xff] }
 0x39f   :  { %v1682_v46 = vadd.f32 %v1681_v29, %v1657_v27  ;;  %v1663_v52 = vmul.f32 %v4567_v33, %v4567_v33  ;;  %v4593_v55 = vsub.f32 %v4477_v40, %v1618_v12  ;;  %v1664_v1 = vmul.f32 %v4579_v23, %v4579_v23  ;;  %v1887_v12 = vld [vmem:[#allocation11 + $0xb0] sm:$0xff]  ;;  %v1873_v29 = vld [vmem:[#allocation11 + $0x40] sm:$0xff] }
 0x3a0   :  { %v1678_v47 = vadd.f32 %v1677_v41, %v1654_v31  ;;  %v1688_v25 = vadd.f32 %v1662_v37, %v1661_v22  ;;  %v1665_v34 = vmul.f32 %v4586_v26, %v4586_v26  ;;  %v3587_v40 = vpack.c.bf16 %v1870_v38, %v1869_v3  ;;  %v1874_v31 = vld [vmem:[#allocation11 + $0x48] sm:$0xff]  ;;  %v1891_v22 = vld [vmem:[#allocation11 + $0xd0] sm:$0xff] }
 0x3a1   :  { %v1683_v24 = vadd.f32 %v1682_v46, %v1658_v45  ;;  %v1666_v57 = vmul.f32 %v4593_v55, %v4593_v55  ;;  %v3589_v10 = vpack.c.bf16 %v1888_v14, %v1887_v12  ;;  %v3591_v43 = vpack.c.bf16 %v1872_v16, %v1871_v11  ;;  %v1892_v45 = vld [vmem:[#allocation11 + $0xd8] sm:$0xff]  ;;  %v1875_v37 = vld [vmem:[#allocation11 + $0x50] sm:$0xff]  ;;  %v1914_v3 = vld [vmem:[#allocation11 + $0x188] sm:$0xff] }
 0x3a2   :  { %1679 = vadd.xlane.f32.xlu1 %v1678_v47  ;;  %v1689_v2 = vadd.f32 %v1688_v25, %v1663_v52  ;;  %3588 = vmatpush3.bf16.msra.mxu1 %v3587_v40  ;;  %v3593_v27 = vpack.c.bf16 %v1890_v21, %v1889_v20  ;;  %v3595_v41 = vpack.c.bf16 %v1874_v31, %v1873_v29  ;;  %v1876_v47 = vld [vmem:[#allocation11 + $0x58] sm:$0xff]  ;;  %v1894_v52 = vld [vmem:[#allocation11 + $0xe8] sm:$0xff] }
 0x3a3   :  { %v1684_v54 = vadd.f32 %v1683_v24, %v1659_v62  ;;  %3590 = vmatprep.subr.bf16.mxu1 %v3589_v10  ;;  %v3597_v46 = vpack.c.bf16 %v1892_v45, %v1891_v22  ;;  %v3599_v62 = vpack.c.bf16 %v1876_v47, %v1875_v37  ;;  %v1893_v24 = vld [vmem:[#allocation11 + $0xe0] sm:$0xff]  ;;  %v4601_v21 = vld [vmem:[#allocation8] sm:$0x3f] }
 0x3a4   :  { %v1690_v42 = vadd.f32 %v1689_v2, %v1664_v1  ;;  %v3601_v25 = vpack.c.bf16 %v1894_v52, %v1893_v24  ;;  %v1895_v2 = vld [vmem:[#allocation11 + $0xf0] sm:$0xff]  ;;  %v4611_v45 = vrot.slane %v4601_v21, %v4393_v48 }
 0x3a5   :  { %v1685_v9 = vadd.f32 %v1684_v54, %v1660_v49  ;;  %v1877_v49 = vld [vmem:[#allocation11 + $0x60] sm:$0xff]  ;;  %v1878_v54 = vld [vmem:[#allocation11 + $0x68] sm:$0xff] }
 0x3a6   :  { %v1691_v18 = vadd.f32 %v1690_v42, %v1665_v34  ;;  %3592 = vmatpush3.bf16.msra.mxu1 %v3591_v43  ;;  %v3603_v1 = vpack.c.bf16 %v1878_v54, %v1877_v49  ;;  %v1879_v34 = vld [vmem:[#allocation11 + $0x70] sm:$0xff]  ;;  %v1897_v54 = vld [vmem:[#allocation11 + $0x100] sm:$0xff] }
 0x3a7   :  { %1686 = vadd.xlane.f32.xlu0 %v1685_v9  ;;  %3594 = vmatprep.subr.bf16.mxu1 %v3593_v27  ;;  %v1896_v9 = vld [vmem:[#allocation11 + $0xf8] sm:$0xff] }
 0x3a8   :  { %v1692_v63 = vadd.f32 %v1691_v18, %v1666_v57  ;;  %v3605_v42 = vpack.c.bf16 %v1896_v9, %v1895_v2  ;;  %v1880_v57 = vld [vmem:[#allocation11 + $0x78] sm:$0xff]  ;;  %v1915_v9 = vld [vmem:[#allocation11 + $0x190] sm:$0xff] }
 0x3a9   :  { %v3607_v18 = vpack.c.bf16 %v1880_v57, %v1879_v34  ;;  %v4603_v27 = vld [vmem:[#allocation10] sm:$0x3f] }
 0x3aa   :  { %1693 = vadd.xlane.f32.xlu1 %v1692_v63  ;;  %3596 = vmatpush3.bf16.msra.mxu1 %v3595_v41  ;;  %v1913_v63 = vld [vmem:[#allocation11 + $0x180] sm:$0xff]  ;;  %v4607_v41 = vrot.slane %v4601_v21, %v4391_v56  ;;  %v4617_v37 = vrot.slane %v4603_v27, %v4391_v56  ;;  %v4623_v24 = vrot.slane %v4603_v27, %v4393_v48  ;;  %v1916_v34 = vld [vmem:[#allocation11 + $0x198] sm:$0xff] }
 0x3ab   :  { %3598 = vmatprep.subr.bf16.mxu1 %v3597_v46  ;;  %v3609_v38 = vpack.c.bf16 %v1914_v3, %v1913_v63 }
 0x3ae   :  { %3600 = vmatpush3.bf16.msra.mxu1 %v3599_v62 }
 0x3af   :  { %3602 = vmatprep.subr.bf16.mxu1 %v3601_v25 }
 0x3b2   :  { %3604 = vmatpush3.bf16.msra.mxu1 %v3603_v1  ;;  %v1898_v1 = vld [vmem:[#allocation11 + $0x108] sm:$0xff] }
 0x3b3   :  { %3606 = vmatprep.subr.bf16.mxu1 %v3605_v42  ;;  %v3611_v42 = vpack.c.bf16 %v1898_v1, %v1897_v54 }
 0x3b6   :  { %3608 = vmatpush3.bf16.msra.mxu1 %v3607_v18 }
 0x3b7   :  { %3610 = vmatprep.subr.bf16.mxu1 %v3609_v38  ;;  %v3613_v38 = vpack.c.bf16 %v1916_v34, %v1915_v9  ;;  %v1920_v9 = vld [vmem:[#allocation11 + $0x1b8] sm:$0xff] }
 0x42b   :  { %v1673_v40 = vpop.xlane.xlu0 %1672 }
 0x42c   :  { %v1695_v12 = vmul.f32 0.0013020834, %v1673_v40  ;;  %v1899_v40 = vld [vmem:[#allocation11 + $0x110] sm:$0xff] }
 0x42e   :  { %v1699_v14 = vadd.f32 1e-05, %v1695_v12  ;;  %v1900_v12 = vld [vmem:[#allocation11 + $0x118] sm:$0xff] }
 0x42f   :  { %v1680_v10 = vpop.xlane.xlu1 %1679 }
 0x430   :  { %3855 = vrsqrt.f32 %v1699_v14  ;;  %v1696_v11 = vmul.f32 0.0013020834, %v1680_v10 }
 0x432   :  { %v1700_v16 = vadd.f32 1e-05, %v1696_v11  ;;  %v1917_v11 = vld [vmem:[#allocation11 + $0x1a0] sm:$0xff] }
 0x434   :  { %3857 = vrsqrt.f32 %v1700_v16  ;;  %v1687_v43 = vpop.xlane.xlu0 %1686  ;;  %v1918_v16 = vld [vmem:[#allocation11 + $0x1a8] sm:$0xff] }
 0x435   :  { %v1697_v20 = vmul.f32 0.0013020834, %v1687_v43  ;;  %v4647_v43 = vrot.slane %v4601_v21, %v4404_v0 }
 0x437   :  { %v1701_v29 = vadd.f32 1e-05, %v1697_v20  ;;  %v1694_v31 = vpop.xlane.xlu1 %1693 }
 0x438   :  { %v1698_v22 = vmul.f32 0.0013020834, %v1694_v31 }
 0x439   :  { %3859 = vrsqrt.f32 %v1701_v29 }
 0x43a   :  { %v4613_v46 = vpop.eup %3855  ;;  %v1702_v47 = vadd.f32 1e-05, %v1698_v22 }
 0x43b   :  { %v1708_v62 = vmul.f32 %v4613_v46, %v4485_v36  ;;  %v1707_v52 = vmul.f32 %v4613_v46, %v4482_v35 }
 0x43c   :  { %3861 = vrsqrt.f32 %v1702_v47  ;;  %v3615_v47 = vpack.c.bf16 %v1900_v12, %v1899_v40 }
 0x43d   :  { %v1763_v25 = vmul.f32 %v4611_v45, %v1708_v62  ;;  %v1762_v49 = vmul.f32 %v4607_v41, %v1707_v52  ;;  %v3617_v52 = vpack.c.bf16 %v1918_v16, %v1917_v11 }
 0x43e   :  { %v4629_v56 = vpop.eup %3857 }
 0x43f   :  { %v1818_v2 = vadd.f32 %v4623_v24, %v1763_v25  ;;  %v1817_v36 = vadd.f32 %v4617_v37, %v1762_v49  ;;  %v1714_v48 = vmul.f32 %v4629_v56, %v4506_v13  ;;  %v1713_v35 = vmul.f32 %v4629_v56, %v4503_v4  ;;  %v1901_v25 = vld [vmem:[#allocation11 + $0x120] sm:$0xff]  ;;  %v1902_v49 = vld [vmem:[#allocation11 + $0x128] sm:$0xff] }
 0x440   :  { %v1710_v4 = vmul.f32 %v4613_v46, %v4491_v44 }
 0x441   :  { %v1842_v57 = vmax.f32 %v1818_v2, 0.0  ;;  %v1841_v18 = vmax.f32 %v1817_v36, 0.0  ;;  %v1769_v63 = vmul.f32 %v4611_v45, %v1714_v48  ;;  %v1768_v3 = vmul.f32 %v4607_v41, %v1713_v35  ;;  %v1919_v48 = vld [vmem:[#allocation11 + $0x1b0] sm:$0xff] }
 0x442   :  { %v3619_v35 = vpack.c.bf16 %v1902_v49, %v1901_v25  ;;  %v4675_v25 = vrot.slane %v4601_v21, %v4397_v60 }
 0x443   :  { %v4639_v14 = vpop.eup %3859  ;;  %2032 = vmatprep.mubr.f32.mxu1 %v1842_v57  ;;  %v1824_v13 = vadd.f32 %v4623_v24, %v1769_v63  ;;  %v1823_v10 = vadd.f32 %v4617_v37, %v1768_v3  ;;  %v3621_v63 = vpack.c.bf16 %v1920_v9, %v1919_v48  ;;  %v1903_v3 = vld [vmem:[#allocation11 + $0x130] sm:$0xff]  ;;  %v1928_v48 = vld [vmem:[#allocation11 + $0x1f8] sm:$0xff]  ;;  %v1716_v9 = vmul.f32 %v4629_v56, %v4517_v53 }
 0x444   :  { %2033 = vmatmul.mubr.f32.vlgmr.msra.gmra.mrb[8].mxu1 %v1841_v18  ;;  %v1720_v20 = vmul.f32 %v4639_v14, %v4534_v59  ;;  %v1719_v29 = vmul.f32 %v4639_v14, %v4531_v58  ;;  %v1765_v59 = vmul.f32 %v4647_v43, %v1710_v4  ;;  %v4660_v58 = vrot.slane %v4603_v27, %v4404_v0  ;;  %v1906_v4 = vld [vmem:[#allocation11 + $0x148] sm:$0xff] }
 0x445   :  { %3612 = vmatpush3.bf16.msra.mxu1 %v3611_v42  ;;  %v1848_v31 = vmax.f32 %v1824_v13, 0.0  ;;  %v1847_v22 = vmax.f32 %v1823_v10, 0.0  ;;  %v1922_v13 = vld [vmem:[#allocation11 + $0x1c8] sm:$0xff]  ;;  %v1722_v53 = vmul.f32 %v4639_v14, %v4551_v17 }
 0x446   :  { %3614 = vmatprep.subr.bf16.mxu1 %v3613_v38  ;;  %v1775_v62 = vmul.f32 %v4611_v45, %v1720_v20  ;;  %v1774_v44 = vmul.f32 %v4607_v41, %v1719_v29  ;;  %v4655_v54 = vpop.eup %3861  ;;  %v1904_v38 = vld [vmem:[#allocation11 + $0x138] sm:$0xff]  ;;  %v1820_v12 = vadd.f32 %v4660_v58, %v1765_v59  ;;  %v1923_v29 = vld [vmem:[#allocation11 + $0x1d0] sm:$0xff]  ;;  %v1909_v59 = vld [vmem:[#allocation11 + $0x160] sm:$0xff] }
 0x447   :  { %2037 = vmatprep.mubr.f32.mxu1 %v1848_v31  ;;  %v1726_v36 = vmul.f32 %v4655_v54, %v4564_v30  ;;  %v1725_v34 = vmul.f32 %v4655_v54, %v4559_v15  ;;  %v1921_v15 = vld [vmem:[#allocation11 + $0x1c0] sm:$0xff]  ;;  %v3623_v16 = vpack.c.bf16 %v1904_v38, %v1903_v3  ;;  %v1924_v31 = vld [vmem:[#allocation11 + $0x1d8] sm:$0xff]  ;;  %v1946_v3 = vld [vmem:[#allocation11 + $0x288] sm:$0xff]  ;;  %v1771_v38 = vmul.f32 %v4647_v43, %v1716_v9 }
 0x448   :  { %2038 = vmatmul.mubr.f32.gmra.mrb[10].mxu1 %v1847_v22  ;;  %v1830_v1 = vadd.f32 %v4623_v24, %v1775_v62  ;;  %v1829_v2 = vadd.f32 %v4617_v37, %v1774_v44  ;;  %v1844_v20 = vmax.f32 %v1820_v12, 0.0  ;;  %v1907_v22 = vld [vmem:[#allocation11 + $0x150] sm:$0xff]  ;;  %v1925_v62 = vld [vmem:[#allocation11 + $0x1e0] sm:$0xff]  ;;  %v1728_v17 = vmul.f32 %v4655_v54, %v4579_v23 }
 0x449   :  { %3616 = vmatpush3.bf16.msra.mxu1 %v3615_v47  ;;  %v1781_v0 = vmul.f32 %v4611_v45, %v1726_v36  ;;  %v1780_v18 = vmul.f32 %v4607_v41, %v1725_v34  ;;  %v3625_v45 = vpack.c.bf16 %v1922_v13, %v1921_v15  ;;  %v1905_v41 = vld [vmem:[#allocation11 + $0x140] sm:$0xff]  ;;  %v1908_v47 = vld [vmem:[#allocation11 + $0x158] sm:$0xff]  ;;  %v1927_v36 = vld [vmem:[#allocation11 + $0x1f0] sm:$0xff] }
 0x44a   :  { %v1854_v42 = vmax.f32 %v1830_v1, 0.0  ;;  %3618 = vmatprep.subr.bf16.mxu1 %v3617_v52  ;;  %v1853_v57 = vmax.f32 %v1829_v2, 0.0  ;;  %v1926_v52 = vld [vmem:[#allocation11 + $0x1e8] sm:$0xff]  ;;  %v3631_v44 = vpack.c.bf16 %v1908_v47, %v1907_v22  ;;  %v1709_v2 = vmul.f32 %v4613_v46, %v4488_v39 }
 0x44b   :  { %v1836_v30 = vadd.f32 %v4623_v24, %v1781_v0  ;;  %v1835_v40 = vadd.f32 %v4617_v37, %v1780_v18  ;;  %v3627_v37 = vpack.c.bf16 %v1906_v4, %v1905_v41  ;;  %v3629_v24 = vpack.c.bf16 %v1924_v31, %v1923_v29  ;;  %v1910_v1 = vld [vmem:[#allocation11 + $0x168] sm:$0xff]  ;;  %v1912_v0 = vld [vmem:[#allocation11 + $0x178] sm:$0xff] }
 0x44c   :  { %2042 = vmatprep.mubr.f32.mxu1 %v1854_v42  ;;  %v3633_v49 = vpack.c.bf16 %v1926_v52, %v1925_v62  ;;  %v3635_v34 = vpack.c.bf16 %v1910_v1, %v1909_v59  ;;  %v3637_v42 = vpack.c.bf16 %v1928_v48, %v1927_v36  ;;  %v1764_v18 = vmul.f32 %v4675_v25, %v1709_v2  ;;  %v1930_v15 = vld [vmem:[#allocation11 + $0x208] sm:$0xff]  ;;  %v1949_v62 = vld [vmem:[#allocation11 + $0x2a0] sm:$0xff] }
 0x44d   :  { %2043 = vmatmul.mubr.f32.gmra.mrb[12].mxu1 %v1853_v57  ;;  %v1860_v10 = vmax.f32 %v1836_v30, 0.0  ;;  %v1859_v11 = vmax.f32 %v1835_v40, 0.0  ;;  %v1911_v57 = vld [vmem:[#allocation11 + $0x170] sm:$0xff]  ;;  %v1715_v39 = vmul.f32 %v4629_v56, %v4509_v51  ;;  %v1721_v51 = vmul.f32 %v4639_v14, %v4544_v8  ;;  %v1932_v8 = vld [vmem:[#allocation11 + $0x218] sm:$0xff]  ;;  %v1950_v52 = vld [vmem:[#allocation11 + $0x2a8] sm:$0xff] }
 0x44e   :  { %3620 = vmatpush3.bf16.msra.mxu1 %v3619_v35  ;;  %v4683_v35 = vrot.slane %v4603_v27, %v4397_v60  ;;  %v3639_v30 = vpack.c.bf16 %v1912_v0, %v1911_v57  ;;  %v1929_v60 = vld [vmem:[#allocation11 + $0x200] sm:$0xff]  ;;  %v1727_v22 = vmul.f32 %v4655_v54, %v4567_v33  ;;  %v3649_v36 = vpack.c.bf16 %v1950_v52, %v1949_v62  ;;  %v1934_v48 = vld [vmem:[#allocation11 + $0x228] sm:$0xff]  ;;  %v1952_v57 = vld [vmem:[#allocation11 + $0x2b8] sm:$0xff] }
 0x44f   :  { %3622 = vmatprep.subr.bf16.mxu1 %v3621_v63  ;;  %2047 = vmatprep.mubr.f32.mxu1 %v1860_v10  ;;  %v1945_v63 = vld [vmem:[#allocation11 + $0x280] sm:$0xff]  ;;  %v1770_v13 = vmul.f32 %v4675_v25, %v1715_v39  ;;  %v1947_v10 = vld [vmem:[#allocation11 + $0x290] sm:$0xff]  ;;  %v3643_v41 = vpack.c.bf16 %v1930_v15, %v1929_v60  ;;  %v4717_v0 = vrot.slane %v4603_v27, %v4417_v7  ;;  %v1954_v60 = vld [vmem:[#allocation11 + $0x2c8] sm:$0xff] }
 0x450   :  { %v1819_v40 = vadd.f32 %v4683_v35, %v1764_v18  ;;  %v3641_v12 = vpack.c.bf16 %v1946_v3, %v1945_v63  ;;  %v1933_v33 = vld [vmem:[#allocation11 + $0x220] sm:$0xff]  ;;  %v1782_v9 = vmul.f32 %v4675_v25, %v1727_v22  ;;  %v1935_v3 = vld [vmem:[#allocation11 + $0x230] sm:$0xff]  ;;  %v1711_v22 = vmul.f32 %v4613_v46, %v4498_v61 }
 0x451   :  { %2048 = vmatmul.mubr.f32.gmra.mrb[14].mxu1 %v1859_v11  ;;  %v1948_v11 = vld [vmem:[#allocation11 + $0x298] sm:$0xff]  ;;  %v1825_v31 = vadd.f32 %v4683_v35, %v1770_v13  ;;  %v3651_v18 = vpack.c.bf16 %v1934_v48, %v1933_v33  ;;  %v1937_v15 = vld [vmem:[#allocation11 + $0x240] sm:$0xff]  ;;  %v1938_v13 = vld [vmem:[#allocation11 + $0x248] sm:$0xff]  ;;  %v1718_v62 = vmul.f32 %v4629_v56, %v4539_v5 }
 0x452   :  { %3624 = vmatpush3.bf16.msra.mxu1 %v3623_v16  ;;  %2117 = vmatprep.mubr.f32.mxu1 %v1844_v20  ;;  %v1826_v16 = vadd.f32 %v4660_v58, %v1771_v38  ;;  %v3645_v4 = vpack.c.bf16 %v1948_v11, %v1947_v10  ;;  %v4701_v20 = vrot.slane %v4601_v21, %v4417_v7  ;;  %v1843_v29 = vmax.f32 %v1819_v40, 0.0  ;;  %v1936_v38 = vld [vmem:[#allocation11 + $0x238] sm:$0xff]  ;;  %v1955_v11 = vld [vmem:[#allocation11 + $0x2d0] sm:$0xff] }
 0x453   :  { %3626 = vmatprep.subr.bf16.mxu1 %v3625_v45  ;;  %v1777_v45 = vmul.f32 %v4647_v43, %v1722_v53  ;;  %v1849_v1 = vmax.f32 %v1825_v31, 0.0  ;;  %v1837_v63 = vadd.f32 %v4683_v35, %v1782_v9  ;;  %v3655_v7 = vpack.c.bf16 %v1936_v38, %v1935_v3  ;;  %v2363_v3 = vld [vmem:[%s5118_s9 + $0x88] sm:$0xff] }
 0x454   :  { %v1850_v47 = vmax.f32 %v1826_v16, 0.0  ;;  %v1751_v31 = vrot.slane %v4601_v21, %v4415_v6  ;;  %v1943_v21 = vld [vmem:[#allocation11 + $0x270] sm:$0xff]  ;;  %v1773_v61 = vmul.f32 %v4701_v20, %v1718_v62  ;;  %v2373_v62 = vld [vmem:[%s5118_s9 + $0xd8] sm:$0xff] }
 0x455   :  { %v1832_v23 = vadd.f32 %v4660_v58, %v1777_v45  ;;  %v1861_v40 = vmax.f32 %v1837_v63, 0.0  ;;  %v1939_v45 = vld [vmem:[#allocation11 + $0x250] sm:$0xff] }
 0x456   :  { %3628 = vmatpush3.bf16.msra.mxu1 %v3627_v37  ;;  %v1931_v37 = vld [vmem:[#allocation11 + $0x210] sm:$0xff] }
 0x457   :  { %3630 = vmatprep.subr.bf16.mxu1 %v3629_v24  ;;  %v1776_v24 = vmul.f32 %v4675_v25, %v1721_v51  ;;  %v3647_v59 = vpack.c.bf16 %v1932_v8, %v1931_v37  ;;  %v3659_v51 = vpack.c.bf16 %v1938_v13, %v1937_v15  ;;  %v1941_v8 = vld [vmem:[#allocation11 + $0x260] sm:$0xff]  ;;  %v2366_v15 = vld [vmem:[%s5118_s9 + $0xa0] sm:$0xff]  ;;  %v2367_v13 = vld [vmem:[%s5118_s9 + $0xa8] sm:$0xff] }
 0x459   :  { %v1831_v2 = vadd.f32 %v4683_v35, %v1776_v24  ;;  %v1956_v35 = vld [vmem:[#allocation11 + $0x2d8] sm:$0xff]  ;;  %v1942_v24 = vld [vmem:[#allocation11 + $0x268] sm:$0xff] }
 0x45a   :  { %3632 = vmatpush3.bf16.msra.mxu1 %v3631_v44  ;;  %v1783_v44 = vmul.f32 %v4647_v43, %v1728_v17  ;;  %v1951_v43 = vld [vmem:[#allocation11 + $0x2b0] sm:$0xff]  ;;  %v3661_v16 = vpack.c.bf16 %v1956_v35, %v1955_v11  ;;  %v1940_v17 = vld [vmem:[#allocation11 + $0x258] sm:$0xff]  ;;  %v3667_v52 = vpack.c.bf16 %v1942_v24, %v1941_v8  ;;  %v3681_v11 = vpack.c.bf16 %v2367_v13, %v2366_v15 }
 0x45b   :  { %3634 = vmatprep.subr.bf16.mxu1 %v3633_v49  ;;  %v1712_v49 = vmul.f32 %v4613_v46, %v4512_v32  ;;  %v1855_v39 = vmax.f32 %v1831_v2, 0.0  ;;  %v3653_v25 = vpack.c.bf16 %v1952_v57, %v1951_v43  ;;  %v1717_v2 = vmul.f32 %v4629_v56, %v4526_v28  ;;  %v2350_v35 = vld [vmem:[%s5118_s9 + $0x20] sm:$0xff] }
 0x45c   :  { %v1724_v46 = vmul.f32 %v4639_v14, %v4572_v50  ;;  %v1730_v28 = vmul.f32 %v4655_v54, %v4593_v55  ;;  %v1729_v50 = vmul.f32 %v4655_v54, %v4586_v26  ;;  %v3904_v54 = vld [vmem:[#allocation2 + $0x8] sm:$0xff] }
 0x45d   :  { %v1767_v32 = vmul.f32 %v4701_v20, %v1712_v49  ;;  %v1772_v33 = vmul.f32 %v1751_v31, %v1717_v2 }
 0x45e   :  { %3636 = vmatpush3.bf16.msra.mxu1 %v3635_v34  ;;  %v1856_v34 = vmax.f32 %v1832_v23, 0.0  ;;  %v1960_v23 = vld [vmem:[#allocation11 + $0x2f8] sm:$0xff]  ;;  %v1779_v48 = vmul.f32 %v4701_v20, %v1724_v46  ;;  %v1785_v57 = vmul.f32 %v4701_v20, %v1730_v28  ;;  %v2362_v20 = vld [vmem:[%s5118_s9 + $0x80] sm:$0xff] }
 0x45f   :  { %3638 = vmatprep.subr.bf16.mxu1 %v3637_v42  ;;  %v1838_v42 = vadd.f32 %v4660_v58, %v1783_v44  ;;  %v1822_v53 = vadd.f32 %v4717_v0, %v1767_v32  ;;  %v1806_v44 = vrot.slane %v4603_v27, %v4415_v6  ;;  %v1723_v6 = vmul.f32 %v4639_v14, %v4556_v19  ;;  %v2358_v46 = vld [vmem:[%s5118_s9 + $0x60] sm:$0xff] }
 0x460   :  { %v1828_v27 = vadd.f32 %v4717_v0, %v1773_v61  ;;  %v1834_v43 = vadd.f32 %v4717_v0, %v1779_v48  ;;  %v1784_v32 = vmul.f32 %v1751_v31, %v1729_v50  ;;  %v1840_v55 = vadd.f32 %v4717_v0, %v1785_v57  ;;  %v2346_v0 = vld [vmem:[%s5118_s9] sm:$0xff] }
 0x461   :  { %v1862_v58 = vmax.f32 %v1838_v42, 0.0  ;;  %v1846_v10 = vmax.f32 %v1822_v53, 0.0  ;;  %v1827_v9 = vadd.f32 %v1806_v44, %v1772_v33  ;;  %v3673_v38 = vpack.c.bf16 %v2363_v3, %v2362_v20  ;;  %v2364_v53 = vld [vmem:[%s5118_s9 + $0x90] sm:$0xff]  ;;  %v2377_v33 = vld [vmem:[%s5118_s9 + $0xf8] sm:$0xff] }
 0x462   :  { %3640 = vmatpush3.bf16.msra.mxu1 %v3639_v30  ;;  %v1953_v30 = vld [vmem:[#allocation11 + $0x2c0] sm:$0xff]  ;;  %v1852_v42 = vmax.f32 %v1828_v27, 0.0  ;;  %v1839_v63 = vadd.f32 %v1806_v44, %v1784_v32 }
 0x463   :  { %3642 = vmatprep.subr.bf16.mxu1 %v3641_v12  ;;  %v3657_v12 = vpack.c.bf16 %v1954_v60, %v1953_v30  ;;  %v1851_v19 = vmax.f32 %v1827_v9, 0.0  ;;  %v2365_v30 = vld [vmem:[%s5118_s9 + $0x98] sm:$0xff] }
 0x464   :  { %v1863_v26 = vmax.f32 %v1839_v63, 0.0 }
 0x465   :  { %2118 = vmatmul.mubr.f32.vlgmr.msra.gmra.mrb[16].mxu1 %v1843_v29  ;;  %v3663_v29 = vpack.c.bf16 %v1940_v17, %v1939_v45  ;;  %v2369_v45 = vld [vmem:[%s5118_s9 + $0xb8] sm:$0xff] }
 0x466   :  { %2122 = vmatprep.mubr.f32.mxu1 %v1850_v47  ;;  %3644 = vmatpush3.bf16.msra.mxu1 %v3643_v41  ;;  %v1957_v41 = vld [vmem:[#allocation11 + $0x2e0] sm:$0xff]  ;;  %v1959_v47 = vld [vmem:[#allocation11 + $0x2f0] sm:$0xff] }
 0x467   :  { %3646 = vmatprep.subr.bf16.mxu1 %v3645_v4  ;;  %v1958_v4 = vld [vmem:[#allocation11 + $0x2e8] sm:$0xff]  ;;  %v3669_v49 = vpack.c.bf16 %v1960_v23, %v1959_v47  ;;  %v2355_v47 = vld [vmem:[%s5118_s9 + $0x48] sm:$0xff]  ;;  %v2372_v23 = vld [vmem:[%s5118_s9 + $0xd0] sm:$0xff] }
 0x468   :  { %v3665_v37 = vpack.c.bf16 %v1958_v4, %v1957_v41  ;;  %v2352_v4 = vld [vmem:[%s5118_s9 + $0x30] sm:$0xff] }
 0x469   :  { %2123 = vmatmul.mubr.f32.gmra.mrb[18].mxu1 %v1849_v1  ;;  %v1766_v1 = vmul.f32 %v1751_v31, %v1711_v22  ;;  %v2354_v22 = vld [vmem:[%s5118_s9 + $0x40] sm:$0xff] }
 0x46a   :  { %2127 = vmatprep.mubr.f32.mxu1 %v1856_v34  ;;  %3648 = vmatpush3.bf16.msra.mxu1 %v3647_v59  ;;  %v1944_v59 = vld [vmem:[#allocation11 + $0x278] sm:$0xff]  ;;  %v1778_v34 = vmul.f32 %v1751_v31, %v1723_v6  ;;  %v2370_v31 = vld [vmem:[%s5118_s9 + $0xc0] sm:$0xff] }
 0x46b   :  { %3650 = vmatprep.subr.bf16.mxu1 %v3649_v36  ;;  %v3671_v5 = vpack.c.bf16 %v1944_v59, %v1943_v21  ;;  %v1821_v36 = vadd.f32 %v1806_v44, %v1766_v1  ;;  %v2357_v21 = vld [vmem:[%s5118_s9 + $0x58] sm:$0xff]  ;;  %v2374_v59 = vld [vmem:[%s5118_s9 + $0xe0] sm:$0xff]  ;;  %v2375_v1 = vld [vmem:[%s5118_s9 + $0xe8] sm:$0xff] }
 0x46c   :  { %v1833_v14 = vadd.f32 %v1806_v44, %v1778_v34  ;;  %v3693_v44 = vpack.c.bf16 %v2373_v62, %v2372_v23  ;;  %v3697_v61 = vpack.c.bf16 %v2375_v1, %v2374_v59  ;;  %v2360_v62 = vld [vmem:[%s5118_s9 + $0x70] sm:$0xff]  ;;  %v2378_v1 = vld [vmem:[%s5118_s9 + $0x100] sm:$0xff] }
 0x46d   :  { %2128 = vmatmul.mubr.f32.gmra.mrb[20].mxu1 %v1855_v39  ;;  %v1845_v56 = vmax.f32 %v1821_v36, 0.0  ;;  %v2376_v36 = vld [vmem:[%s5118_s9 + $0xf0] sm:$0xff] }
 0x46e   :  { %2132 = vmatprep.mubr.f32.mxu1 %v1862_v58  ;;  %3652 = vmatpush3.bf16.msra.mxu1 %v3651_v18  ;;  %v1858_v18 = vmax.f32 %v1834_v43, 0.0  ;;  %v1857_v39 = vmax.f32 %v1833_v14, 0.0  ;;  %v2347_v58 = vld [vmem:[%s5118_s9 + $0x8] sm:$0xff]  ;;  %v3701_v27 = vpack.c.bf16 %v2377_v33, %v2376_v36  ;;  %v3905_v36 = vld [vmem:[#allocation2] sm:$0xff] }
 0x46f   :  { %3654 = vmatprep.subr.bf16.mxu1 %v3653_v25  ;;  %v1864_v25 = vmax.f32 %v1840_v55, 0.0  ;;  %v3675_v60 = vpack.c.bf16 %v2347_v58, %v2346_v0 }
 0x471   :  { %2133 = vmatmul.mubr.f32.gmra.mrb[22].mxu1 %v1861_v40  ;;  %v2348_v40 = vld [vmem:[%s5118_s9 + $0x10] sm:$0xff] }
 0x472   :  { %3656 = vmatpush3.bf16.msra.mxu1 %v3655_v7  ;;  %2202 = vmatprep.mubr.f32.mxu1 %v1846_v10  ;;  %v3677_v7 = vpack.c.bf16 %v2365_v30, %v2364_v53 }
 0x473   :  { %3658 = vmatprep.subr.bf16.mxu1 %v3657_v12  ;;  %v2349_v12 = vld [vmem:[%s5118_s9 + $0x18] sm:$0xff] }
 0x474   :  { %v3679_v10 = vpack.c.bf16 %v2349_v12, %v2348_v40 }
 0x476   :  { %3660 = vmatpush3.bf16.msra.mxu1 %v3659_v51  ;;  %v2351_v51 = vld [vmem:[%s5118_s9 + $0x28] sm:$0xff] }
 0x477   :  { %3662 = vmatprep.subr.bf16.mxu1 %v3661_v16  ;;  %v2368_v16 = vld [vmem:[%s5118_s9 + $0xb0] sm:$0xff]  ;;  %v3683_v17 = vpack.c.bf16 %v2351_v51, %v2350_v35 }
 0x478   :  { %v3685_v41 = vpack.c.bf16 %v2369_v45, %v2368_v16 }
 0x47a   :  { %3664 = vmatpush3.bf16.msra.mxu1 %v3663_v29  ;;  %v2353_v29 = vld [vmem:[%s5118_s9 + $0x38] sm:$0xff] }
 0x47b   :  { %3666 = vmatprep.subr.bf16.mxu1 %v3665_v37  ;;  %v2371_v37 = vld [vmem:[%s5118_s9 + $0xc8] sm:$0xff]  ;;  %v3687_v8 = vpack.c.bf16 %v2353_v29, %v2352_v4 }
 0x47c   :  { %v3689_v24 = vpack.c.bf16 %v2371_v37, %v2370_v31 }
 0x47e   :  { %3668 = vmatpush3.bf16.msra.mxu1 %v3667_v52  ;;  %v3691_v52 = vpack.c.bf16 %v2355_v47, %v2354_v22 }
 0x47f   :  { %3670 = vmatprep.subr.bf16.mxu1 %v3669_v49  ;;  %v2356_v49 = vld [vmem:[%s5118_s9 + $0x50] sm:$0xff] }
 0x480   :  { %v3695_v2 = vpack.c.bf16 %v2357_v21, %v2356_v49  ;;  %v2395_v21 = vld [vmem:[%s5118_s9 + $0x188] sm:$0xff] }
 0x482   :  { %3672 = vmatpush3.bf16.msra.mxu1 %v3671_v5  ;;  %v2359_v5 = vld [vmem:[%s5118_s9 + $0x68] sm:$0xff] }
 0x483   :  { %3674 = vmatprep.subr.bf16.mxu1 %v3673_v38  ;;  %v3699_v6 = vpack.c.bf16 %v2359_v5, %v2358_v46  ;;  %v2397_v5 = vld [vmem:[%s5118_s9 + $0x198] sm:$0xff] }
 0x485   :  { %2203 = vmatmul.mubr.f32.vlgmr.msra.gmra.mrb[24].mxu1 %v1845_v56 }
 0x486   :  { %2207 = vmatprep.mubr.f32.mxu1 %v1852_v42  ;;  %3676 = vmatpush3.bf16.msra.mxu1 %v3675_v60 }
 0x487   :  { %3678 = vmatprep.subr.bf16.mxu1 %v3677_v7 }
 0x489   :  { %2208 = vmatmul.mubr.f32.gmra.mrb[26].mxu1 %v1851_v19 }
 0x48a   :  { %2212 = vmatprep.mubr.f32.mxu1 %v1858_v18  ;;  %3680 = vmatpush3.bf16.msra.mxu1 %v3679_v10  ;;  %v2733_v18 = vld [vmem:[#allocation13] ss:$0 sm:$0xff] }
 0x48b   :  { %3682 = vmatprep.subr.bf16.mxu1 %v3681_v11 }
 0x48d   :  { %2213 = vmatmul.mubr.f32.gmra.mrb[28].mxu1 %v1857_v39 }
 0x48e   :  { %2217 = vmatprep.mubr.f32.mxu1 %v1864_v25  ;;  %3684 = vmatpush3.bf16.msra.mxu1 %v3683_v17 }
 0x48f   :  { %3686 = vmatprep.subr.bf16.mxu1 %v3685_v41 }
 0x491   :  { %2218 = vmatmul.mubr.f32.gmra.mrb[30].mxu1 %v1863_v26 }
 0x492   :  { %2513 = vmatprep.mubr.f32.mxu1 %v3904_v54  ;;  %3688 = vmatpush3.bf16.msra.mxu1 %v3687_v8 }
 0x493   :  { %3690 = vmatprep.subr.bf16.mxu1 %v3689_v24 }
 0x496   :  { %3692 = vmatpush3.bf16.msra.mxu1 %v3691_v52  ;;  %v2361_v52 = vld [vmem:[%s5118_s9 + $0x78] sm:$0xff] }
 0x497   :  { %3694 = vmatprep.subr.bf16.mxu1 %v3693_v44  ;;  %v2394_v44 = vld [vmem:[%s5118_s9 + $0x180] sm:$0xff]  ;;  %v3703_v49 = vpack.c.bf16 %v2361_v52, %v2360_v62 }
 0x498   :  { %v3705_v59 = vpack.c.bf16 %v2395_v21, %v2394_v44  ;;  %v2410_v44 = vld [vmem:[%s5118_s9 + $0x200] sm:$0xff]  ;;  %v2428_v21 = vld [vmem:[%s5118_s9 + $0x290] sm:$0xff] }
 0x49a   :  { %3696 = vmatpush3.bf16.msra.mxu1 %v3695_v2  ;;  %v2379_v2 = vld [vmem:[%s5118_s9 + $0x108] sm:$0xff] }
 0x49b   :  { %3698 = vmatprep.subr.bf16.mxu1 %v3697_v61  ;;  %v2396_v61 = vld [vmem:[%s5118_s9 + $0x190] sm:$0xff]  ;;  %v3707_v46 = vpack.c.bf16 %v2379_v2, %v2378_v1 }
 0x49c   :  { %v3709_v33 = vpack.c.bf16 %v2397_v5, %v2396_v61  ;;  %v2412_v61 = vld [vmem:[%s5118_s9 + $0x210] sm:$0xff]  ;;  %v2430_v5 = vld [vmem:[%s5118_s9 + $0x2a0] sm:$0xff] }
 0x49e   :  { %3700 = vmatpush3.bf16.msra.mxu1 %v3699_v6  ;;  %v3906_v6 = vld [vmem:[#allocation2 + $0x38] sm:$0xff] }
 0x49f   :  { %3702 = vmatprep.subr.bf16.mxu1 %v3701_v27  ;;  %v2380_v27 = vld [vmem:[%s5118_s9 + $0x110] sm:$0xff] }
 0x4a2   :  { %3704 = vmatpush3.bf16.msra.mxu1 %v3703_v49  ;;  %v2411_v49 = vld [vmem:[%s5118_s9 + $0x208] sm:$0xff] }
 0x4a3   :  { %3706 = vmatprep.subr.bf16.mxu1 %v3705_v59  ;;  %v2429_v59 = vld [vmem:[%s5118_s9 + $0x298] sm:$0xff]  ;;  %v3739_v1 = vpack.c.bf16 %v2411_v49, %v2410_v44 }
 0x4a4   :  { %v3741_v2 = vpack.c.bf16 %v2429_v59, %v2428_v21 }
 0x4a5   :  { %2514 = vmatmul.mubr.f32.vlgmr.msra.gmra.mrb[32].mxu1 %v3905_v36  ;;  %v2431_v36 = vld [vmem:[%s5118_s9 + $0x2a8] sm:$0xff] }
 0x4a6   :  { %3708 = vmatpush3.bf16.msra.mxu1 %v3707_v46  ;;  %2518 = vmatprep.mubr.f32.mxu1 %v3906_v6  ;;  %v2413_v46 = vld [vmem:[%s5118_s9 + $0x218] sm:$0xff] }
 0x4a7   :  { %3710 = vmatprep.subr.bf16.mxu1 %v3709_v33  ;;  %v3913_v33 = vld [vmem:[#allocation2 + $0x10] sm:$0xff]  ;;  %v3743_v6 = vpack.c.bf16 %v2413_v46, %v2412_v61 }
 0x517   :  { %v2769_v48 = vpop.f32.mrb[8].mxu1 }
 0x518   :  { %v2770_v28 = vpop.f32.mrb[9].mxu1 }
 0x519   :  { %v2771_v56 = vadd.f32 %v2770_v28, %v2769_v48  ;;  %v2381_v48 = vld [vmem:[%s5118_s9 + $0x118] sm:$0xff]  ;;  %v2398_v28 = vld [vmem:[%s5118_s9 + $0x1a0] sm:$0xff] }
 0x51b   :  { %v2772_v9 = vpop.f32.mrb[10].mxu1  ;;  %v2035_v63 = vadd.f32 %v2771_v56, %v2733_v18  ;;  %v3711_v56 = vpack.c.bf16 %v2381_v48, %v2380_v27  ;;  %v3914_v27 = vld [vmem:[#allocation2 + $0x48] sm:$0xff]  ;;  %v3745_v48 = vpack.c.bf16 %v2431_v36, %v2430_v5 }
 0x51c   :  { %v2773_v34 = vpop.f32.mrb[11].mxu1 }
 0x51d   :  { %v2774_v50 = vadd.f32 %v2773_v34, %v2772_v9  ;;  %v2399_v9 = vld [vmem:[%s5118_s9 + $0x1a8] sm:$0xff]  ;;  %3712 = vmatpush3.bf16.msra.mxu1 %v3711_v56 }
 0x51e   :  { %v3713_v34 = vpack.c.bf16 %v2399_v9, %v2398_v28  ;;  %v2414_v28 = vld [vmem:[%s5118_s9 + $0x220] sm:$0xff]  ;;  %v2415_v56 = vld [vmem:[%s5118_s9 + $0x228] sm:$0xff]  ;;  %v2432_v9 = vld [vmem:[%s5118_s9 + $0x2b0] sm:$0xff] }
 0x51f   :  { %v2040_v3 = vadd.f32 %v2774_v50, %v2733_v18  ;;  %v3907_v50 = vld [vmem:[#allocation2 + $0x30] sm:$0xff] }
 0x520   :  { %v2775_v42 = vpop.f32.mrb[12].mxu1  ;;  %2519 = vmatmul.mubr.f32.gmra.mrb[34].mxu1 %v3907_v50  ;;  %3714 = vmatprep.subr.bf16.mxu1 %v3713_v34  ;;  %v2433_v34 = vld [vmem:[%s5118_s9 + $0x2b8] sm:$0xff]  ;;  %v3915_v50 = vld [vmem:[#allocation2 + $0x40] sm:$0xff] }
 0x521   :  { %v2776_v43 = vpop.f32.mrb[13].mxu1 }
 0x522   :  { %v2777_v57 = vadd.f32 %v2776_v43, %v2775_v42  ;;  %v3908_v42 = vld [vmem:[#allocation2 + $0x68] sm:$0xff]  ;;  %v2382_v43 = vld [vmem:[%s5118_s9 + $0x120] sm:$0xff] }
 0x523   :  { %2523 = vmatprep.mubr.f32.mxu1 %v3908_v42  ;;  %v3747_v42 = vpack.c.bf16 %v2415_v56, %v2414_v28 }
 0x524   :  { %v2778_v19 = vpop.f32.mrb[14].mxu1  ;;  %v2045_v30 = vadd.f32 %v2777_v57, %v2733_v18  ;;  %v2383_v57 = vld [vmem:[%s5118_s9 + $0x128] sm:$0xff] }
 0x525   :  { %v2779_v14 = vpop.f32.mrb[15].mxu1 }
 0x526   :  { %v2780_v32 = vadd.f32 %v2779_v14, %v2778_v19  ;;  %v2400_v19 = vld [vmem:[%s5118_s9 + $0x1b0] sm:$0xff]  ;;  %v3715_v14 = vpack.c.bf16 %v2383_v57, %v2382_v43  ;;  %v3916_v43 = vld [vmem:[#allocation2 + $0x78] sm:$0xff]  ;;  %v3749_v57 = vpack.c.bf16 %v2433_v34, %v2432_v9 }
 0x528   :  { %v2050_v15 = vadd.f32 %v2780_v32, %v2733_v18  ;;  %v2401_v32 = vld [vmem:[%s5118_s9 + $0x1b8] sm:$0xff]  ;;  %v2384_v18 = vld [vmem:[%s5118_s9 + $0x130] sm:$0xff]  ;;  %3716 = vmatpush3.bf16.msra.mxu1 %v3715_v14 }
 0x529   :  { %v2417_v14 = vld [vmem:[%s5118_s9 + $0x238] sm:$0xff] }
 0x538   :  { %v2813_v55 = vpop.f32.mrb[16].mxu1 }
 0x539   :  { %v2814_v39 = vpop.f32.mrb[17].mxu1 }
 0x53a   :  { %v2815_v25 = vadd.f32 %v2814_v39, %v2813_v55  ;;  %v2385_v55 = vld [vmem:[%s5118_s9 + $0x138] sm:$0xff]  ;;  %v3717_v39 = vpack.c.bf16 %v2401_v32, %v2400_v19  ;;  %v2416_v19 = vld [vmem:[%s5118_s9 + $0x230] sm:$0xff]  ;;  %v2434_v32 = vld [vmem:[%s5118_s9 + $0x2c0] sm:$0xff] }
 0x53c   :  { %v2120_v26 = vadd.f32 %v2815_v25, %v2035_v63  ;;  %v2816_v54 = vpop.f32.mrb[18].mxu1  ;;  %v3909_v63 = vld [vmem:[#allocation2 + $0x60] sm:$0xff]  ;;  %v3719_v25 = vpack.c.bf16 %v2385_v55, %v2384_v18  ;;  %3718 = vmatprep.subr.bf16.mxu1 %v3717_v39  ;;  %v2435_v18 = vld [vmem:[%s5118_s9 + $0x2c8] sm:$0xff]  ;;  %v3917_v55 = vld [vmem:[#allocation2 + $0x70] sm:$0xff]  ;;  %v3751_v39 = vpack.c.bf16 %v2417_v14, %v2416_v19 }
 0x53d   :  { %v2817_v20 = vpop.f32.mrb[19].mxu1  ;;  %2524 = vmatmul.mubr.f32.gmra.mrb[36].mxu1 %v3909_v63  ;;  %v3918_v63 = vld [vmem:[#allocation2 + $0xa8] sm:$0xff] }
 0x53e   :  { %v2818_v0 = vadd.f32 %v2817_v20, %v2816_v54  ;;  %v2402_v54 = vld [vmem:[%s5118_s9 + $0x1c0] sm:$0xff]  ;;  %v2403_v20 = vld [vmem:[%s5118_s9 + $0x1c8] sm:$0xff]  ;;  %3720 = vmatpush3.bf16.msra.mxu1 %v3719_v25  ;;  %v3753_v25 = vpack.c.bf16 %v2435_v18, %v2434_v32 }
 0x540   :  { %v2125_v38 = vadd.f32 %v2818_v0, %v2040_v3  ;;  %v2819_v58 = vpop.f32.mrb[20].mxu1  ;;  %v2386_v3 = vld [vmem:[%s5118_s9 + $0x140] sm:$0xff]  ;;  %v3721_v0 = vpack.c.bf16 %v2403_v20, %v2402_v54  ;;  %v2419_v54 = vld [vmem:[%s5118_s9 + $0x248] sm:$0xff]  ;;  %v2436_v20 = vld [vmem:[%s5118_s9 + $0x2d0] sm:$0xff] }
 0x541   :  { %v2820_v53 = vpop.f32.mrb[21].mxu1 }
 0x542   :  { %v2821_v60 = vadd.f32 %v2820_v53, %v2819_v58  ;;  %v2404_v58 = vld [vmem:[%s5118_s9 + $0x1d0] sm:$0xff]  ;;  %v2405_v53 = vld [vmem:[%s5118_s9 + $0x1d8] sm:$0xff]  ;;  %3722 = vmatprep.subr.bf16.mxu1 %v3721_v0  ;;  %v3919_v0 = vld [vmem:[#allocation2 + $0xa0] sm:$0xff] }
 0x544   :  { %v2130_v7 = vadd.f32 %v2821_v60, %v2045_v30  ;;  %v2822_v40 = vpop.f32.mrb[22].mxu1  ;;  %v3911_v30 = vld [vmem:[#allocation2 + $0x90] sm:$0xff] }
 0x545   :  { %v2823_v12 = vpop.f32.mrb[23].mxu1 }
 0x546   :  { %v2824_v13 = vadd.f32 %v2823_v12, %v2822_v40  ;;  %v3725_v40 = vpack.c.bf16 %v2405_v53, %v2404_v58  ;;  %v2388_v12 = vld [vmem:[%s5118_s9 + $0x150] sm:$0xff]  ;;  %v3920_v58 = vld [vmem:[#allocation2 + $0x28] sm:$0xff] }
 0x548   :  { %v2135_v10 = vadd.f32 %v2824_v13, %v2050_v15  ;;  %v2389_v15 = vld [vmem:[%s5118_s9 + $0x158] sm:$0xff]  ;;  %v2406_v13 = vld [vmem:[%s5118_s9 + $0x1e0] sm:$0xff] }
 0x558   :  { %v2857_v11 = vpop.f32.mrb[24].mxu1 }
 0x559   :  { %v2858_v35 = vpop.f32.mrb[25].mxu1 }
 0x55a   :  { %v2859_v51 = vadd.f32 %v2858_v35, %v2857_v11  ;;  %v3727_v11 = vpack.c.bf16 %v2389_v15, %v2388_v12 }
 0x55c   :  { %v2860_v16 = vpop.f32.mrb[26].mxu1  ;;  %v4835_v45 = vadd.f32 %v2859_v51, %v2120_v26  ;;  %v3910_v26 = vld [vmem:[#allocation2 + $0x98] sm:$0xff]  ;;  %v2390_v51 = vld [vmem:[%s5118_s9 + $0x160] sm:$0xff] }
 0x55d   :  { %v2861_v17 = vpop.f32.mrb[27].mxu1  ;;  %2528 = vmatprep.mubr.f32.mxu1 %v3910_v26  ;;  %v2418_v26 = vld [vmem:[%s5118_s9 + $0x240] sm:$0xff] }
 0x55e   :  { %v2862_v41 = vadd.f32 %v2861_v17, %v2860_v16  ;;  %2225 = vadd.xlane.f32.xlu0 %v4835_v45  ;;  %2529 = vmatmul.mubr.f32.gmra.mrb[38].mxu1 %v3911_v30  ;;  %v2391_v16 = vld [vmem:[%s5118_s9 + $0x168] sm:$0xff]  ;;  %v2408_v17 = vld [vmem:[%s5118_s9 + $0x1f0] sm:$0xff] }
 0x55f   :  { %v2420_v30 = vld [vmem:[%s5118_s9 + $0x250] sm:$0xff] }
 0x560   :  { %v2863_v4 = vpop.f32.mrb[28].mxu1  ;;  %v4838_v29 = vadd.f32 %v2862_v41, %v2125_v38  ;;  %v2387_v38 = vld [vmem:[%s5118_s9 + $0x148] sm:$0xff]  ;;  %v2409_v41 = vld [vmem:[%s5118_s9 + $0x1f8] sm:$0xff] }
 0x561   :  { %v2864_v31 = vpop.f32.mrb[29].mxu1  ;;  %v3723_v60 = vpack.c.bf16 %v2387_v38, %v2386_v3  ;;  %v2437_v3 = vld [vmem:[%s5118_s9 + $0x2d8] sm:$0xff]  ;;  %v3755_v38 = vpack.c.bf16 %v2419_v54, %v2418_v26 }
 0x562   :  { %v2865_v37 = vadd.f32 %v2864_v31, %v2863_v4  ;;  %2227 = vadd.xlane.f32.xlu1 %v4838_v29  ;;  %v3731_v4 = vpack.c.bf16 %v2391_v16, %v2390_v51  ;;  %v3733_v31 = vpack.c.bf16 %v2409_v41, %v2408_v17  ;;  %v3757_v53 = vpack.c.bf16 %v2437_v3, %v2436_v20  ;;  %v2424_v17 = vld [vmem:[%s5118_s9 + $0x270] sm:$0xff]  ;;  %v2425_v41 = vld [vmem:[%s5118_s9 + $0x278] sm:$0xff] }
 0x563   :  { %3724 = vmatpush3.bf16.msra.mxu1 %v3723_v60  ;;  %v2421_v60 = vld [vmem:[%s5118_s9 + $0x258] sm:$0xff] }
 0x564   :  { %v2866_v8 = vpop.f32.mrb[30].mxu1  ;;  %v4841_v24 = vadd.f32 %v2865_v37, %v2130_v7  ;;  %v3912_v7 = vld [vmem:[#allocation2 + $0x18] sm:$0xff]  ;;  %3726 = vmatprep.subr.bf16.mxu1 %v3725_v40  ;;  %v2392_v37 = vld [vmem:[%s5118_s9 + $0x170] sm:$0xff]  ;;  %v2439_v40 = vld [vmem:[%s5118_s9 + $0x2e8] sm:$0xff]  ;;  %v3759_v12 = vpack.c.bf16 %v2421_v60, %v2420_v30 }
 0x565   :  { %v2867_v22 = vpop.f32.mrb[31].mxu1  ;;  %2598 = vmatprep.mubr.f32.mxu1 %v3912_v7  ;;  %v2438_v7 = vld [vmem:[%s5118_s9 + $0x2e0] sm:$0xff] }
 0x566   :  { %v2868_v47 = vadd.f32 %v2867_v22, %v2866_v8  ;;  %2229 = vadd.xlane.f32.xlu0 %v4841_v24  ;;  %v2393_v8 = vld [vmem:[%s5118_s9 + $0x178] sm:$0xff]  ;;  %v2426_v22 = vld [vmem:[%s5118_s9 + $0x280] sm:$0xff]  ;;  %v3761_v15 = vpack.c.bf16 %v2439_v40, %v2438_v7 }
 0x567   :  { %3728 = vmatpush3.bf16.msra.mxu1 %v3727_v11  ;;  %v3735_v62 = vpack.c.bf16 %v2393_v8, %v2392_v37  ;;  %v2440_v11 = vld [vmem:[%s5118_s9 + $0x2f0] sm:$0xff]  ;;  %v3922_v37 = vld [vmem:[#allocation2 + $0x58] sm:$0xff] }
 0x568   :  { %v4844_v23 = vadd.f32 %v2868_v47, %v2135_v10  ;;  %v2407_v10 = vld [vmem:[%s5118_s9 + $0x1e8] sm:$0xff]  ;;  %v3923_v8 = vld [vmem:[#allocation2 + $0x50] sm:$0xff] }
 0x569   :  { %v3729_v35 = vpack.c.bf16 %v2407_v10, %v2406_v13  ;;  %v2427_v47 = vld [vmem:[%s5118_s9 + $0x288] sm:$0xff]  ;;  %v2422_v13 = vld [vmem:[%s5118_s9 + $0x260] sm:$0xff] }
 0x56a   :  { %2231 = vadd.xlane.f32.xlu1 %v4844_v23  ;;  %v3737_v52 = vpack.c.bf16 %v2427_v47, %v2426_v22  ;;  %v2423_v10 = vld [vmem:[%s5118_s9 + $0x268] sm:$0xff]  ;;  %v3925_v47 = vld [vmem:[#allocation2 + $0x80] sm:$0xff] }
 0x56b   :  { %3730 = vmatprep.subr.bf16.mxu1 %v3729_v35  ;;  %v2441_v35 = vld [vmem:[%s5118_s9 + $0x2f8] sm:$0xff]  ;;  %v3763_v51 = vpack.c.bf16 %v2423_v10, %v2422_v13  ;;  %v3924_v22 = vld [vmem:[#allocation2 + $0x88] sm:$0xff] }
 0x56c   :  { %3732 = vmatpush3.bf16.msra.mxu1 %v3731_v4  ;;  %v3765_v16 = vpack.c.bf16 %v2441_v35, %v2440_v11  ;;  %v3767_v4 = vpack.c.bf16 %v2425_v41, %v2424_v17 }
 0x56d   :  { %3734 = vmatprep.subr.bf16.mxu1 %v3733_v31  ;;  %v3921_v31 = vld [vmem:[#allocation2 + $0x20] sm:$0xff] }
 0x570   :  { %3736 = vmatpush3.bf16.msra.mxu1 %v3735_v62  ;;  %v3926_v62 = vld [vmem:[#allocation2 + $0xb8] sm:$0xff] }
 0x571   :  { %3738 = vmatprep.subr.bf16.mxu1 %v3737_v52  ;;  %v3927_v52 = vld [vmem:[#allocation2 + $0xb0] sm:$0xff] }
 0x573   :  { %2599 = vmatmul.mubr.f32.vlgmr.msra.gmra.mrb[40].mxu1 %v3913_v33 }
 0x574   :  { %3740 = vmatpush3.bf16.msra.mxu1 %v3739_v1  ;;  %2603 = vmatprep.mubr.f32.mxu1 %v3914_v27 }
 0x575   :  { %3742 = vmatprep.subr.bf16.mxu1 %v3741_v2 }
 0x577   :  { %2604 = vmatmul.mubr.f32.gmra.mrb[42].mxu1 %v3915_v50 }
 0x578   :  { %3744 = vmatpush3.bf16.msra.mxu1 %v3743_v6  ;;  %2608 = vmatprep.mubr.f32.mxu1 %v3916_v43  ;;  %v2901_v28 = vpop.f32.mrb[32].mxu1 }
 0x579   :  { %3746 = vmatprep.subr.bf16.mxu1 %v3745_v48  ;;  %v2902_v56 = vpop.f32.mrb[33].mxu1 }
 0x57a   :  { %v2903_v9 = vadd.f32 %v2902_v56, %v2901_v28 }
 0x57b   :  { %2609 = vmatmul.mubr.f32.gmra.mrb[44].mxu1 %v3917_v55 }
 0x57c   :  { %3748 = vmatpush3.bf16.msra.mxu1 %v3747_v42  ;;  %2613 = vmatprep.mubr.f32.mxu1 %v3918_v63 }
 0x57d   :  { %3750 = vmatprep.subr.bf16.mxu1 %v3749_v57 }
 0x57f   :  { %2614 = vmatmul.mubr.f32.gmra.mrb[46].mxu1 %v3919_v0 }
 0x580   :  { %3752 = vmatpush3.bf16.msra.mxu1 %v3751_v39  ;;  %2683 = vmatprep.mubr.f32.mxu1 %v3920_v58 }
 0x581   :  { %3754 = vmatprep.subr.bf16.mxu1 %v3753_v25 }
 0x584   :  { %3756 = vmatpush3.bf16.msra.mxu1 %v3755_v38 }
 0x585   :  { %3758 = vmatprep.subr.bf16.mxu1 %v3757_v53 }
 0x588   :  { %3760 = vmatpush3.bf16.msra.mxu1 %v3759_v12 }
 0x589   :  { %3762 = vmatprep.subr.bf16.mxu1 %v3761_v15 }
 0x58c   :  { %3764 = vmatpush3.bf16.msra.mxu1 %v3763_v51 }
 0x58d   :  { %3766 = vmatprep.subr.bf16.mxu1 %v3765_v16 }
 0x590   :  { %3768 = vmatpush3.bf16.msra.mxu1 %v3767_v4 }
 0x593   :  { %2684 = vmatmul.mubr.f32.vlgmr.msra.gmra.mrb[48].mxu1 %v3921_v31 }
 0x594   :  { %2688 = vmatprep.mubr.f32.mxu1 %v3922_v37 }
 0x597   :  { %2689 = vmatmul.mubr.f32.gmra.mrb[50].mxu1 %v3923_v8 }
 0x598   :  { %2693 = vmatprep.mubr.f32.mxu1 %v3924_v22 }
 0x59b   :  { %2694 = vmatmul.mubr.f32.gmra.mrb[52].mxu1 %v3925_v47 }
 0x59c   :  { %2698 = vmatprep.mubr.f32.mxu1 %v3926_v62 }
 0x59f   :  { %2699 = vmatmul.mubr.f32.gmra.mrb[54].mxu1 %v3927_v52 }
 0x5eb   :  { %v2226_v44 = vpop.xlane.xlu0 %2225 }
 0x5ec   :  { %v2234_v49 = vmul.f32 0.0078125, %v2226_v44 }
 0x5ee   :  { %v5046_v21 = vsub.f32 %v4835_v45, %v2234_v49 }
 0x5ef   :  { %v2228_v59 = vpop.xlane.xlu1 %2227 }
 0x5f0   :  { %v2235_v1 = vmul.f32 0.0078125, %v2228_v59  ;;  %v2242_v2 = vmul.f32 %v5046_v21, %v5046_v21 }
 0x5f2   :  { %v5051_v61 = vsub.f32 %v4838_v29, %v2235_v1  ;;  %2246 = vadd.xlane.f32.xlu0 %v2242_v2 }
 0x5f3   :  { %v2230_v46 = vpop.xlane.xlu0 %2229  ;;  %v2904_v34 = vpop.f32.mrb[34].mxu1 }
 0x5f4   :  { %v2236_v5 = vmul.f32 0.0078125, %v2230_v46  ;;  %v2243_v36 = vmul.f32 %v5051_v61, %v5051_v61  ;;  %v2734_v46 = vld [vmem:[#allocation14] ss:$0 sm:$0xff] }
 0x5f6   :  { %v5056_v33 = vsub.f32 %v4841_v24, %v2236_v5  ;;  %2248 = vadd.xlane.f32.xlu1 %v2243_v36  ;;  %v2905_v24 = vpop.f32.mrb[35].mxu1 }
 0x5f7   :  { %v2232_v45 = vpop.xlane.xlu1 %2231  ;;  %v2906_v50 = vadd.f32 %v2905_v24, %v2904_v34 }
 0x5f8   :  { %v2237_v6 = vmul.f32 0.0078125, %v2232_v45  ;;  %v2244_v27 = vmul.f32 %v5056_v33, %v5056_v33 }
 0x5fa   :  { %v5061_v48 = vsub.f32 %v4844_v23, %v2237_v6  ;;  %2250 = vadd.xlane.f32.xlu0 %v2244_v27  ;;  %v2736_v23 = vld [vmem:[%s5119_s10] ss:$0 sm:$0xff]  ;;  %v2735_v6 = vld [vmem:[#allocation16] ss:$0 sm:$0xff] }
 0x5fb   :  { %v2516_v18 = vadd.f32 %v2903_v9, %v2736_v23  ;;  %v2521_v25 = vadd.f32 %v2906_v50, %v2736_v23 }
 0x5fc   :  { %v2245_v29 = vmul.f32 %v5061_v48, %v5061_v48 }
 0x5fe   :  { %2252 = vadd.xlane.f32.xlu1 %v2245_v29 }
 0x610   :  { %v2907_v42 = vpop.f32.mrb[36].mxu1 }
 0x611   :  { %v2908_v43 = vpop.f32.mrb[37].mxu1 }
 0x612   :  { %v2909_v57 = vadd.f32 %v2908_v43, %v2907_v42 }
 0x614   :  { %v2526_v0 = vadd.f32 %v2909_v57, %v2736_v23 }
 0x631   :  { %v2910_v19 = vpop.f32.mrb[38].mxu1 }
 0x632   :  { %v2911_v14 = vpop.f32.mrb[39].mxu1 }
 0x633   :  { %v2912_v32 = vadd.f32 %v2911_v14, %v2910_v19 }
 0x635   :  { %v2531_v60 = vadd.f32 %v2912_v32, %v2736_v23 }
 0x646   :  { %v2945_v55 = vpop.f32.mrb[40].mxu1 }
 0x647   :  { %v2946_v39 = vpop.f32.mrb[41].mxu1 }
 0x648   :  { %v2947_v63 = vadd.f32 %v2946_v39, %v2945_v55 }
 0x64a   :  { %v2601_v26 = vadd.f32 %v2947_v63, %v2516_v18  ;;  %v2948_v54 = vpop.f32.mrb[42].mxu1 }
 0x64b   :  { %v2949_v20 = vpop.f32.mrb[43].mxu1 }
 0x64c   :  { %v2950_v3 = vadd.f32 %v2949_v20, %v2948_v54 }
 0x64e   :  { %v2606_v38 = vadd.f32 %v2950_v3, %v2521_v25  ;;  %v2951_v58 = vpop.f32.mrb[44].mxu1 }
 0x64f   :  { %v2952_v53 = vpop.f32.mrb[45].mxu1 }
 0x650   :  { %v2953_v30 = vadd.f32 %v2952_v53, %v2951_v58 }
 0x652   :  { %v2611_v7 = vadd.f32 %v2953_v30, %v2526_v0  ;;  %v2954_v40 = vpop.f32.mrb[46].mxu1 }
 0x653   :  { %v2955_v12 = vpop.f32.mrb[47].mxu1 }
 0x654   :  { %v2956_v15 = vadd.f32 %v2955_v12, %v2954_v40 }
 0x656   :  { %v2616_v13 = vadd.f32 %v2956_v15, %v2531_v60 }
 0x666   :  { %v2989_v4 = vpop.f32.mrb[48].mxu1 }
 0x667   :  { %v2990_v37 = vpop.f32.mrb[49].mxu1 }
 0x668   :  { %v2991_v8 = vadd.f32 %v2990_v37, %v2989_v4 }
 0x66a   :  { %v2686_v62 = vadd.f32 %v2991_v8, %v2601_v26  ;;  %v2992_v52 = vpop.f32.mrb[50].mxu1 }
 0x66b   :  { %v2993_v49 = vpop.f32.mrb[51].mxu1 }
 0x66c   :  { %2704 = vst [vmem:[%s5121_s12] sm:$0xff] %v2686_v62  ;;  %v2994_v59 = vadd.f32 %v2993_v49, %v2992_v52 }
 0x66e   :  { %v2691_v36 = vadd.f32 %v2994_v59, %v2606_v38  ;;  %v2995_v45 = vpop.f32.mrb[52].mxu1 }
 0x66f   :  { %v2996_v27 = vpop.f32.mrb[53].mxu1 }
 0x670   :  { %2705 = vst [vmem:[%s5121_s12 + $0x8] sm:$0xff] %v2691_v36  ;;  %v2997_v28 = vadd.f32 %v2996_v27, %v2995_v45 }
 0x672   :  { %v2696_v24 = vadd.f32 %v2997_v28, %v2611_v7  ;;  %v2998_v50 = vpop.f32.mrb[54].mxu1 }
 0x673   :  { %v2999_v42 = vpop.f32.mrb[55].mxu1 }
 0x674   :  { %2706 = vst [vmem:[%s5121_s12 + $0x10] sm:$0xff] %v2696_v24  ;;  %v3000_v57 = vadd.f32 %v2999_v42, %v2998_v50 }
 0x676   :  { %v2701_v23 = vadd.f32 %v3000_v57, %v2616_v13 }
 0x678   :  { %2707 = vst [vmem:[%s5121_s12 + $0x18] sm:$0xff] %v2701_v23  ;;  %s4173_s12 = smov [#allocation17]  }
 0x679   :  { %s2713_s8 = sshll.u32 %s4173_s12, 4  ;;  %s2714_s8 = int_to_ptr.vmem [resolvable:$true] %s2713_s8 }
 0x67a   :  { %s4126_s21 = scalar_lea.vmem %s2714_s8, 512  ;;  %p4131_p3 = scmp.lt.s32.totalorder %s2714_s8, %s2714_s8 }
 0x67b   :  { %p4127_p2 = scmp.ne.s32.totalorder %s2714_s8, %s4126_s21  ;;  %p4132_p4 = scmp.lt.s32.totalorder %s4126_s21, %s4126_s21 }
 0x67d   :  { %p4133_p5 = por %p4132_p4, %p4131_p3 }
 0x67f   :  { %v2247_v10 = vpop.xlane.xlu0 %2246  ;;  %p4134_p6 = pnand %p4133_p5, %p4127_p2 }
 0x680   :  { %v2254_v11 = vmul.f32 0.0078125, %v2247_v10 }
 0x682   :  { %v2258_v35 = vadd.f32 1e-05, %v2254_v11 }
 0x683   :  { %v2249_v51 = vpop.xlane.xlu1 %2248 }
 0x684   :  { %3863 = vrsqrt.f32 %v2258_v35  ;;  %v2255_v16 = vmul.f32 0.0078125, %v2249_v51 }
 0x686   :  { %v2259_v17 = vadd.f32 1e-05, %v2255_v16 }
 0x687   :  { %v2251_v41 = vpop.xlane.xlu0 %2250 }
 0x688   :  { %3865 = vrsqrt.f32 %v2259_v17  ;;  %v2256_v31 = vmul.f32 0.0078125, %v2251_v41 }
 0x68a   :  { %v2260_v22 = vadd.f32 1e-05, %v2256_v31 }
 0x68b   :  { %v2253_v47 = vpop.xlane.xlu1 %2252 }
 0x68c   :  { %3867 = vrsqrt.f32 %v2260_v22  ;;  %v2257_v44 = vmul.f32 0.0078125, %v2253_v47 }
 0x68e   :  { %v3864_v1 = vpop.eup %3863  ;;  %v2261_v2 = vadd.f32 1e-05, %v2257_v44 }
 0x68f   :  { %v2266_v5 = vmul.f32 %v3864_v1, %v5046_v21 }
 0x690   :  { %3869 = vrsqrt.f32 %v2261_v2 }
 0x691   :  { %v2276_v29 = vmul.f32 %v2734_v46, %v2266_v5 }
 0x692   :  { %v3866_v56 = vpop.eup %3865 }
 0x693   :  { %v5075_v9 = vadd.f32 %v2735_v6, %v2276_v29  ;;  %v2267_v34 = vmul.f32 %v3866_v56, %v5051_v61 }
 0x695   :  { %v2290_v21 = vmul.f32 %v5075_v9, %v5075_v9  ;;  %v2277_v43 = vmul.f32 %v2734_v46, %v2267_v34 }
 0x696   :  { %v3868_v19 = vpop.eup %3867 }
 0x697   :  { %2294 = vadd.xlane.f32.xlu0 %v2290_v21  ;;  %v5083_v14 = vadd.f32 %v2735_v6, %v2277_v43  ;;  %v2268_v32 = vmul.f32 %v3868_v19, %v5056_v33 }
 0x699   :  { %v2291_v61 = vmul.f32 %v5083_v14, %v5083_v14  ;;  %v2278_v18 = vmul.f32 %v2734_v46, %v2268_v32 }
 0x69a   :  { %v3870_v55 = vpop.eup %3869 }
 0x69b   :  { %2296 = vadd.xlane.f32.xlu1 %v2291_v61  ;;  %v2288_v39 = vadd.f32 %v2735_v6, %v2278_v18  ;;  %v2269_v63 = vmul.f32 %v3870_v55, %v5061_v48 }
 0x69d   :  { %v2292_v25 = vmul.f32 %v2288_v39, %v2288_v39  ;;  %v2279_v26 = vmul.f32 %v2734_v46, %v2269_v63 }
 0x69f   :  { %2298 = vadd.xlane.f32.xlu0 %v2292_v25  ;;  %v2289_v54 = vadd.f32 %v2735_v6, %v2279_v26 }
 0x6a1   :  { %v2293_v20 = vmul.f32 %v2289_v54, %v2289_v54 }
 0x6a3   :  { %2300 = vadd.xlane.f32.xlu1 %v2293_v20 }
 0x724   :  { %v2295_v33 = vpop.xlane.xlu0 %2294 }
 0x725   :  { %3871 = vrsqrt.f32 %v2295_v33  ;;  %vm2304_vm0 = vcmp.eq.f32.partialorder %v2295_v33, inf  ;;  %v2307_v30 = vand.u32 2147483648, %v2295_v33  ;;  %vm2306_vm1 = vcmp.eq.f32.partialorder %v2295_v33, 0.0 }
 0x728   :  { %v2297_v3 = vpop.xlane.xlu1 %2296 }
 0x729   :  { %3873 = vrsqrt.f32 %v2297_v3  ;;  %vm2311_vm2 = vcmp.eq.f32.partialorder %v2297_v3, inf  ;;  %v2314_v15 = vand.u32 2147483648, %v2297_v3  ;;  %vm2313_vm3 = vcmp.eq.f32.partialorder %v2297_v3, 0.0 }
 0x72c   :  { %v2299_v0 = vpop.xlane.xlu0 %2298 }
 0x72d   :  { %3875 = vrsqrt.f32 %v2299_v0  ;;  %vm2318_vm4 = vcmp.eq.f32.partialorder %v2299_v0, inf  ;;  %v2321_v16 = vand.u32 2147483648, %v2299_v0  ;;  %vm2320_vm5 = vcmp.eq.f32.partialorder %v2299_v0, 0.0 }
 0x72f   :  { %v3872_v38 = vpop.eup %3871 }
 0x730   :  { %v2303_v58 = vmul.f32 %v3872_v38, %v2295_v33  ;;  %v2301_v53 = vpop.xlane.xlu1 %2300 }
 0x731   :  { %3877 = vrsqrt.f32 %v2301_v53  ;;  %vm2325_vm6 = vcmp.eq.f32.partialorder %v2301_v53, inf  ;;  %v2328_v8 = vand.u32 2147483648, %v2301_v53  ;;  %vm2327_vm7 = vcmp.eq.f32.partialorder %v2301_v53, 0.0 }
 0x732   :  { %v2305_v60 = vsel %vm2304_vm0, %v2295_v33, %v2303_v58 }
 0x733   :  { %v3874_v48 = vpop.eup %3873  ;;  %v2308_v7 = vsel %vm2306_vm1, %v2307_v30, %v2305_v60 }
 0x734   :  { %v2330_v40 = vmax.f32 %v2308_v7, 1e-12  ;;  %v2310_v12 = vmul.f32 %v3874_v48, %v2297_v3 }
 0x736   :  { %3879 = vrcp.f32 %v2330_v40  ;;  %v2312_v13 = vsel %vm2311_vm2, %v2297_v3, %v2310_v12 }
 0x737   :  { %v3876_v10 = vpop.eup %3875  ;;  %v2315_v11 = vsel %vm2313_vm3, %v2314_v15, %v2312_v13 }
 0x738   :  { %v2331_v35 = vmax.f32 %v2315_v11, 1e-12  ;;  %v2317_v51 = vmul.f32 %v3876_v10, %v2299_v0 }
 0x73a   :  { %3881 = vrcp.f32 %v2331_v35  ;;  %v2319_v17 = vsel %vm2318_vm4, %v2299_v0, %v2317_v51 }
 0x73b   :  { %v3878_v41 = vpop.eup %3877  ;;  %v2322_v4 = vsel %vm2320_vm5, %v2321_v16, %v2319_v17 }
 0x73c   :  { %v2332_v31 = vmax.f32 %v2322_v4, 1e-12  ;;  %v2324_v37 = vmul.f32 %v3878_v41, %v2301_v53 }
 0x73e   :  { %3883 = vrcp.f32 %v2332_v31  ;;  %v2326_v22 = vsel %vm2325_vm6, %v2301_v53, %v2324_v37 }
 0x73f   :  { %v2329_v47 = vsel %vm2327_vm7, %v2328_v8, %v2326_v22 }
 0x740   :  { %v3880_v62 = vpop.eup %3879  ;;  %v2333_v52 = vmax.f32 %v2329_v47, 1e-12 }
 0x741   :  { %v2338_v44 = vmul.f32 %v3880_v62, %v5075_v9 }
 0x742   :  { %3885 = vrcp.f32 %v2333_v52 }
 0x743   :  { %2342 = vst [vmem:[#allocation17] sm:$0xff] %v2338_v44 }
 0x744   :  { %v3882_v49 = vpop.eup %3881 }
 0x745   :  { %v2339_v59 = vmul.f32 %v3882_v49, %v5083_v14 }
 0x747   :  { %2343 = vst [vmem:[#allocation17 + $0x8] sm:$0xff] %v2339_v59 }
 0x748   :  { %v3884_v1 = vpop.eup %3883 }
 0x749   :  { %v2340_v2 = vmul.f32 %v3884_v1, %v2288_v39 }
 0x74b   :  { %2344 = vst [vmem:[#allocation17 + $0x10] sm:$0xff] %v2340_v2 }
 0x74c   :  { %v3886_v46 = vpop.eup %3885 }
 0x74d   :  { %v2341_v5 = vmul.f32 %v3886_v46, %v2289_v54 }
 0x74f   :  { %2345 = vst [vmem:[#allocation17 + $0x18] sm:$0xff] %v2341_v5 }
 0x750   :  { %4137 = shalt.err (!%p4134_p6)
}
 0x751   :  { %s4138_s26 = scalar_lea.hbm %s5120_s11, 512 }
 0x752   :  { %p4139_p7 = scmp.ne.s32.totalorder %s5120_s11, %s4138_s26  ;;  %p4142_p8 = scmp.lt.u32.totalorder %s4138_s26, %s5120_s11 }
 0x754   :  { %p4144_p9 = pnand %p4142_p8, %p4139_p7 }
 0x756   :  { %4147 = shalt.err (!%p4144_p9)
}
 0x757   :  { %2719 = dma.vmem_to_hbm [thread:$0]  %s2714_s8, 512, %s5120_s11, [#allocation4], %s4165_s3, %s4165_s3, %s4166_s24  }
 0x758   :  { %4158 = dma.done.wait [#allocation4], 512  }
 0x759   :  { %4159 = vsyncadd [#allocation4], 4294966784 }
 0x75a   :  { %2727 = vsyncpa [#allocation3], 1 }
 0x75b   :  { %2728 = vsyncpa [#allocation6], 1 }
 0x75c   :  { %2729 = vsyncpa [#allocation9], 1 }
 0x75d   :  { %2730 = vsyncpa [#allocation12], 1 }
 0x75e   :  { %2731 = vsyncpa [#allocation15], 1 }
 0x75f   :  { %2732 = vsyncpa [#allocation4], 1 }

</bundles_post_ra>
